<compile_context>
chip_gen: v7x
topology: tpu7x:2x2x1
jax: 0.10.0
libtpu: 0.0.40
codegen_flags: <defaults>
</compile_context>

<pallas_src>
import functools

import numpy as np

import jax
import jax.numpy as jnp
from jax.experimental import pallas as pl
from jax.experimental.pallas import tpu as pltpu

# ----------------------------------------------------------------------------
# ESM alphabet constants (from esm.data.Alphabet for ESM-2 models)
# ----------------------------------------------------------------------------
VOCAB = 33
CLS_IDX, PAD_IDX, EOS_IDX, MASK_IDX = 0, 1, 2, 32
# af2_to_esm = [padding_idx] + [esm_dict.get_idx(v) for v in restypes_with_x]
AF2_TO_ESM = jnp.array(
    [1, 5, 10, 17, 13, 23, 16, 9, 6, 21, 12, 4, 15, 20, 18, 14, 8, 11, 22, 19, 7, 24],
    dtype=jnp.int32,
)

# ----------------------------------------------------------------------------
# Small synthetic ESM-2 config
# ----------------------------------------------------------------------------
EMBED_DIM = 32
NUM_HEADS = 4
HEAD_DIM = EMBED_DIM // NUM_HEADS
FFN_DIM = 4 * EMBED_DIM
NUM_LAYERS = 2
NEG_INF = -1e9


# ----------------------------------------------------------------------------
# In-kernel helpers
# ----------------------------------------------------------------------------
def _ln(x, g, b, eps=1e-5):
    mu = jnp.mean(x, axis=-1, keepdims=True)
    xc = x - mu
    var = jnp.mean(xc * xc, axis=-1, keepdims=True)
    return xc * jax.lax.rsqrt(var + eps) * g + b


def _bf16(x):
    return x.astype(jnp.bfloat16)


# ----------------------------------------------------------------------------
# Fused transformer-layer kernel (single program over the flattened batch)
#
# Residual stream x is (M, D) with M = B * T_pad.  Attention runs over the
# full M x M score matrix per head; a precomputed additive bias makes it
# block-diagonal per batch element and masks padded keys.
# ----------------------------------------------------------------------------
def _esm_layer_kernel(
    x_ref,       # (M, D)     f32   residual stream (batch-flattened)
    bias_ref,    # (M, M)     f32   0 for same-batch valid keys, -1e9 otherwise
    nprt_ref,    # (1, H*M)   f32   non-pad query mask, tiled per head
    rope_ref,    # (M, 2D)    f32   [cos | sin] tables, full width, per row
    vecs_ref,    # (8, D)     f32   ln1_g, ln1_b, ln2_g, ln2_b, bo, b2, lnf_g, lnf_b
    b5_ref,      # (1, 5D)    f32   packed QKV(+rot) bias
    b1_ref,      # (1, F)     f32   FFN in bias
    w5_ref,      # (D, 5D)    bf16  [Wq*s | Wk | Wv | Wq*s@R | Wk@R]
    wo_ref,      # (D, D)     bf16
    w1_ref,      # (D, F)     bf16
    w2_ref,      # (F, D)     bf16
    xo_ref,      # (M, D)     f32   layer output (post final-LN if is_last)
    pair_ref,    # (M, H*M)   f32   pad-masked probs, (key, head*query) layout
    *, num_heads, head_dim, d_model, is_last,
):
    d = d_model
    x = x_ref[...]                           # (M, D)
    bias = bias_ref[...]                     # (M, M)
    vecs = vecs_ref[...]                     # (8, D)
    rope = rope_ref[...]                     # (M, 2D)
    cos = rope[:, :d]
    sin = rope[:, d:]

    # ---------------- self-attention block (pre-LN) ----------------
    h1 = _ln(x, vecs[0:1, :], vecs[1:2, :])
    qkv = jnp.dot(_bf16(h1), w5_ref[...],
                  preferred_element_type=jnp.float32) + b5_ref[...]     # (M, 5D)

    # RoPE: rotate-half (and query scaling) are folded into the weight, so the
    # rotated components arrive pre-computed in lanes [3D:4D] / [4D:5D].
    q = qkv[:, 0 * d:1 * d] * cos + qkv[:, 3 * d:4 * d] * sin           # (M, D)
    k = qkv[:, 1 * d:2 * d] * cos + qkv[:, 4 * d:5 * d] * sin           # (M, D)
    v = qkv[:, 2 * d:3 * d]                                             # (M, D)
    qb, kb, vb = _bf16(q), _bf16(k), _bf16(v)

    pair_parts = []
    ctx_parts = []
    for hh in range(num_heads):
        sl = slice(hh * head_dim, (hh + 1) * head_dim)
        # Scores in (key, query) orientation -> no in-kernel transposes.
        sT = jax.lax.dot_general(
            kb[:, sl], qb[:, sl], (((1,), (1,)), ((), ())),
            preferred_element_type=jnp.float32)                          # (Mk, Mq)
        sT = sT + bias                         # mask pad keys + cross-batch
        m = jnp.max(sT, axis=0, keepdims=True)
        e = jnp.exp(sT - m)
        denom = jnp.sum(e, axis=0, keepdims=True)
        pT = e * pl.reciprocal(denom, approx=True)      # softmax over keys
        pair_parts.append(pT)
        # ctx_h[q, :] = sum_k pT[k, q] * v_h[k, :]
        ctx_parts.append(jax.lax.dot_general(
            _bf16(pT), vb[:, sl], (((0,), (0,)), ((), ())),
            preferred_element_type=jnp.float32))                         # (Mq, hd)

    # Single lane-dense store of all heads' probs; pad-query columns zeroed
    # with one pre-tiled multiplier (pad keys / cross-batch entries are
    # already exactly zero after the -1e9 bias + softmax).
    pair_ref[...] = jnp.concatenate(pair_parts, axis=1) * nprt_ref[...]  # (M, H*M)

    ctx = jnp.concatenate(ctx_parts, axis=1)                             # (M, D)
    attn_out = jnp.dot(_bf16(ctx), wo_ref[...],
                       preferred_element_type=jnp.float32) + vecs[4:5, :]
    x = x + attn_out

    # ---------------- feed-forward block (pre-LN) ----------------
    h2 = _ln(x, vecs[2:3, :], vecs[3:4, :])
    f = jnp.dot(_bf16(h2), w1_ref[...],
                preferred_element_type=jnp.float32) + b1_ref[...]
    # TODO(synk): real ESM-2 uses the exact erf GELU; tanh approximation is
    # used here (EUP-friendly, guaranteed Mosaic lowering).
    f = jax.nn.gelu(f, approximate=True)
    f = jnp.dot(_bf16(f), w2_ref[...],
                preferred_element_type=jnp.float32) + vecs[5:6, :]
    x = x + f

    if is_last:
        # Fused final (post-trunk) LayerNorm -> no extra pallas_call.
        x = _ln(x, vecs[6:7, :], vecs[7:8, :])
    xo_ref[...] = x


def esm_layer(xf, attn_bias, npr_t, rope, p, is_last):
    m, d = xf.shape
    kernel = functools.partial(
        _esm_layer_kernel,
        num_heads=NUM_HEADS, head_dim=HEAD_DIM, d_model=EMBED_DIM, is_last=is_last)

    def fs(shape):  # full-array block (single program)
        return pl.BlockSpec(shape, lambda i: (0, 0))

    # TODO(synk): on v7x a 2-program "parallel" grid over batch halves would
    # populate both TensorCores; a single program is optimal on v5e/v6e.
    x_out, pair = pl.pallas_call(
        kernel,
        grid=(1,),
        in_specs=[
            fs((m, d)),                    # x
            fs((m, m)),                    # additive attention bias
            fs((1, NUM_HEADS * m)),        # pad-query multiplier (tiled per head)
            fs((m, 2 * d)),                # [cos | sin]
            fs((8, d)),                    # packed LN / bias vectors
            fs((1, 5 * d)),                # qkv(+rot) bias
            fs((1, FFN_DIM)),              # ffn bias 1
            fs((d, 5 * d)),                # w5
            fs((d, d)),                    # wo
            fs((d, FFN_DIM)),              # w1
            fs((FFN_DIM, d)),              # w2
        ],
        out_specs=[
            fs((m, d)),
            fs((m, NUM_HEADS * m)),
        ],
        out_shape=[
            jax.ShapeDtypeStruct((m, d), jnp.float32),
            jax.ShapeDtypeStruct((m, NUM_HEADS * m), jnp.float32),
        ],
        compiler_params=pltpu.CompilerParams(
            dimension_semantics=("arbitrary",)),
    )(xf, attn_bias, npr_t, rope,
      p["vecs"], p["b5"], p["b1"], p["w5"], p["wo"], p["w1"], p["w2"])
    return x_out, pair


# ----------------------------------------------------------------------------
# Rotary-embedding helpers (ESM-2 style), precomputed in the wrapper
# ----------------------------------------------------------------------------
def _rotate_matrix(d, num_heads, head_dim):
    """R such that (u @ R) == per-head rotate_half(u) (sign included)."""
    half = head_dim // 2
    R = np.zeros((d, d), dtype=np.float32)
    for h in range(num_heads):
        o = h * head_dim
        for j in range(half):
            R[o + j + half, o + j] = -1.0          # out[j] = -u[j + half]
        for j in range(half, head_dim):
            R[o + j - half, o + j] = 1.0           # out[j] =  u[j - half]
    return jnp.asarray(R)


def rope_tables_flat(batch, t_pad, num_heads, head_dim):
    """(M, 2D) table: [cos | sin], full feature width, row r = position r % t_pad."""
    inv_freq = 1.0 / (10000.0 ** (jnp.arange(0, head_dim, 2, dtype=jnp.float32)
                                  / head_dim))
    pos = jnp.arange(t_pad, dtype=jnp.float32)
    freqs = pos[:, None] * inv_freq[None, :]               # (T, hd/2)
    emb = jnp.concatenate([freqs, freqs], axis=-1)         # (T, hd)
    cos = jnp.tile(jnp.cos(emb), (1, num_heads))           # (T, D)
    sin = jnp.tile(jnp.sin(emb), (1, num_heads))           # (T, D)
    cos = jnp.tile(cos, (batch, 1))                        # (M, D)
    sin = jnp.tile(sin, (batch, 1))                        # (M, D)
    return jnp.concatenate([cos, sin], axis=1)             # (M, 2D)


# ----------------------------------------------------------------------------
# Synthetic frozen ESM-2 trunk parameters (weights stored in bf16, pre-packed)
# ----------------------------------------------------------------------------
def init_params(key):
    std = 0.02
    scale = float(HEAD_DIM) ** -0.5
    R = _rotate_matrix(EMBED_DIM, NUM_HEADS, HEAD_DIM)

    keys = jax.random.split(key, 1 + NUM_LAYERS)
    params = {
        "embed": std * jax.random.normal(keys[0], (VOCAB, EMBED_DIM), jnp.float32),
        "layers": [],
    }
    ones = jnp.ones((EMBED_DIM,), jnp.float32)
    zeros = jnp.zeros((EMBED_DIM,), jnp.float32)
    lnf_g, lnf_b = ones, zeros                              # final-LN params

    for l in range(NUM_LAYERS):
        lk = jax.random.split(keys[1 + l], 6)
        wq = std * jax.random.normal(lk[0], (EMBED_DIM, EMBED_DIM), jnp.float32)
        wk = std * jax.random.normal(lk[1], (EMBED_DIM, EMBED_DIM), jnp.float32)
        wv = std * jax.random.normal(lk[2], (EMBED_DIM, EMBED_DIM), jnp.float32)
        wo = std * jax.random.normal(lk[3], (EMBED_DIM, EMBED_DIM), jnp.float32)
        w1 = std * jax.random.normal(lk[4], (EMBED_DIM, FFN_DIM), jnp.float32)
        w2 = std * jax.random.normal(lk[5], (FFN_DIM, EMBED_DIM), jnp.float32)

        wq_s = wq * scale                                   # fold 1/sqrt(hd) into Wq
        # Packed projection [q | k | v | rotate_half(q) | rotate_half(k)]:
        # one (D, 5D) MXU matmul, RoPE rotation folded into the frozen weight.
        w5 = jnp.concatenate([wq_s, wk, wv, wq_s @ R, wk @ R], axis=1)
        b5 = jnp.zeros((1, 5 * EMBED_DIM), jnp.float32)     # qkv biases (zero init)

        is_last = (l == NUM_LAYERS - 1)
        vecs = jnp.stack([
            ones, zeros,                                    # ln1 gamma / beta
            ones, zeros,                                    # ln2 gamma / beta
            zeros,                                          # bo
            zeros,                                          # b2
            lnf_g if is_last else zeros,                    # final-LN gamma
            lnf_b if is_last else zeros,                    # final-LN beta
        ], axis=0)                                          # (8, D)

        params["layers"].append(dict(
            w5=w5.astype(jnp.bfloat16),
            wo=wo.astype(jnp.bfloat16),
            w1=w1.astype(jnp.bfloat16),
            w2=w2.astype(jnp.bfloat16),
            b5=b5,
            b1=jnp.zeros((1, FFN_DIM), jnp.float32),
            vecs=vecs,
        ))
    return params


# ----------------------------------------------------------------------------
# ESM-2 trunk forward on the batch-flattened token slab
# ----------------------------------------------------------------------------
def esm_trunk_forward(params, tokens, t_pad):
    b, t0 = tokens.shape
    tokens_p = jnp.pad(tokens, ((0, 0), (0, t_pad - t0)), constant_values=PAD_IDX)
    nonpad = (tokens_p != PAD_IDX).astype(jnp.float32)           # (B, TP)

    # Embedding lookup (gather kept in plain JAX glue).
    x = jnp.take(params["embed"], tokens_p, axis=0)              # (B, TP, D)

    # ESM-2 token-dropout rescaling (eval semantics).
    mask_tok = tokens_p == MASK_IDX
    x = jnp.where(mask_tok[..., None], 0.0, x)
    src_len = jnp.sum(nonpad, axis=-1)
    mask_ratio = jnp.sum(mask_tok, axis=-1).astype(jnp.float32) / src_len
    x = x * ((1.0 - 0.15 * 0.8) / (1.0 - mask_ratio))[:, None, None]
    x = x * nonpad[..., None]                                    # zero padded rows

    m = b * t_pad
    xf = x.reshape(m, EMBED_DIM)
    np_flat = nonpad.reshape(m)

    # Additive attention bias: 0 where key is a valid token of the same batch
    # element as the query, -1e9 otherwise (block-diagonal + pad-key masking).
    bidx = jnp.arange(m, dtype=jnp.int32) // t_pad
    same_b = bidx[:, None] == bidx[None, :]
    attn_bias = jnp.where(same_b & (np_flat[:, None] > 0), 0.0, NEG_INF)
    attn_bias = attn_bias.astype(jnp.float32)                    # (M, M)

    npr_t = jnp.tile(np_flat[None, :], (1, NUM_HEADS))           # (1, H*M)
    rope = rope_tables_flat(b, t_pad, NUM_HEADS, HEAD_DIM)       # (M, 2D)

    reps = [xf]
    pairs = []
    for l in range(NUM_LAYERS):
        xf, pair = esm_layer(xf, attn_bias, npr_t, rope, params["layers"][l],
                             is_last=(l == NUM_LAYERS - 1))
        reps.append(xf)                  # last layer's rep already has final LN
        pairs.append(pair)               # (M, H*M), pad-masked, (key, query)
    return reps, pairs


# ----------------------------------------------------------------------------
# FrozenEsmModel.forward equivalent
# ----------------------------------------------------------------------------
def frozen_esm_forward(
    params,
    aa_sequence,
    chain_idx,
    attn_mask=None,
    seq_mask=None,
    convert_to_esm=True,
    use_esm_attn_map=True,
):
    del chain_idx  # single-chain path: only used for linker insertion (unused here)

    if convert_to_esm:
        aa = aa_sequence + 1
        aa = jnp.where(attn_mask != 1, 0, aa)
        esmaa = jnp.take(AF2_TO_ESM, aa, axis=0)
        if seq_mask is not None:
            esmaa = jnp.where(seq_mask == 1, MASK_IDX, esmaa)
    else:
        esmaa = aa_sequence

    # _add_special_tokens: prepend <cls>, append <pad>, place <eos> after last
    # non-pad token (same trailing-padding assumption as the reference).
    b, lr = esmaa.shape
    bos = jnp.full((b, 1), CLS_IDX, dtype=esmaa.dtype)
    pad = jnp.full((b, 1), PAD_IDX, dtype=esmaa.dtype)
    seq = jnp.concatenate([bos, esmaa, pad], axis=1)             # (B, Lr+2)
    eos_pos = jnp.sum(seq != PAD_IDX, axis=1)
    seq = seq.at[jnp.arange(b), eos_pos].set(EOS_IDX)

    # Pad the token length to a sublane multiple; extra <pad> tokens are fully
    # masked in attention, so kept positions are bit-identical to the unpadded
    # computation.  (B=2, H=4, TP=16 makes the pair store exactly 128 lanes.)
    t0 = lr + 2
    t_pad = ((t0 + 7) // 8) * 8

    # TODO(synk): host-side result caching (_previous_call) has no functional
    # JAX equivalent; it only memoizes identical calls and does not change math.
    reps, pairs = esm_trunk_forward(params, seq, t_pad)

    # single_repns: stack per-layer reps on dim=2, drop bos/eos/padding.
    reps3 = [r.reshape(b, t_pad, EMBED_DIM) for r in reps]
    single = jnp.stack(reps3, axis=2)[:, 1:lr + 1]               # (B, Lr, layers+1, D)

    pair_out = None
    if use_esm_attn_map:
        # pairs[l][k_g, h*M + q_g] == attentions[b,l,h,q,k] (already pad-masked),
        # so torch's permute(0,4,3,1,2).flatten(3,4) reduces to extracting the
        # per-batch diagonal blocks and permuting a tiny tensor.
        pa = jnp.stack(pairs, axis=0)                            # (L, M, H*M)
        pa = pa.reshape(NUM_LAYERS, b, t_pad, NUM_HEADS, b, t_pad)
        diag = jnp.diagonal(pa, axis1=1, axis2=4)                # (L, TPk, H, TPq, B)
        pair_out = jnp.transpose(diag, (4, 1, 3, 0, 2))          # (B, TPk, TPq, L, H)
        pair_out = pair_out.reshape(b, t_pad, t_pad, NUM_LAYERS * NUM_HEADS)
        pair_out = pair_out[:, 1:lr + 1, 1:lr + 1, :]
    return single, pair_out


# ----------------------------------------------------------------------------
if __name__ == "__main__":
    key = jax.random.PRNGKey(0)
    k_seq, k_params = jax.random.split(key)

    B, L = 2, 8
    aa_sequence = jax.random.randint(k_seq, (B, L), 0, 20, dtype=jnp.int32)
    chain_idx = jnp.zeros((B, L), dtype=jnp.int32)
    attn_mask = jnp.ones((B, L), dtype=jnp.int32)

    params = init_params(k_params)

    fwd = jax.jit(
        lambda aa, ci, am: frozen_esm_forward(params, aa, ci, attn_mask=am))
    single_repns, pair_repns = fwd(aa_sequence, chain_idx, attn_mask)
    jax.block_until_ready((single_repns, pair_repns))

    assert single_repns.shape == (B, L, NUM_LAYERS + 1, EMBED_DIM), single_repns.shape
    assert pair_repns.shape == (B, L, L, NUM_LAYERS * NUM_HEADS), pair_repns.shape
    assert bool(jnp.all(jnp.isfinite(single_repns)))
    assert bool(jnp.all(jnp.isfinite(pair_repns)))

    print("KERNEL_OK")
</pallas_src>

<mosaic_0001>
module attributes {stable_mosaic.version = 11 : i64} {
  func.func @_esm_layer_kernel(%arg0: i32, %arg1: memref<32x32xf32, #tpu.memory_space<vmem>>, %arg2: memref<32x32xf32, #tpu.memory_space<vmem>>, %arg3: memref<1x128xf32, #tpu.memory_space<vmem>>, %arg4: memref<32x64xf32, #tpu.memory_space<vmem>>, %arg5: memref<8x32xf32, #tpu.memory_space<vmem>>, %arg6: memref<1x160xf32, #tpu.memory_space<vmem>>, %arg7: memref<1x128xf32, #tpu.memory_space<vmem>>, %arg8: memref<32x160xbf16, #tpu.memory_space<vmem>>, %arg9: memref<32x32xbf16, #tpu.memory_space<vmem>>, %arg10: memref<32x128xbf16, #tpu.memory_space<vmem>>, %arg11: memref<128x32xbf16, #tpu.memory_space<vmem>>, %arg12: memref<32x32xf32, #tpu.memory_space<vmem>>, %arg13: memref<32x128xf32, #tpu.memory_space<vmem>>) attributes {dimension_semantics = [#tpu.dimension_semantics<arbitrary>], iteration_bounds = array<i64: 1>, scalar_prefetch = 0 : i64, scratch_operands = 0 : i64, tpu.core_type = #tpu.core_type<tc>, window_params = [{pipeline_mode = #tpu.pipeline_mode<synchronous>, transform_indices = @transform_0, window_bounds = array<i64: 32, 32>}, {pipeline_mode = #tpu.pipeline_mode<synchronous>, transform_indices = @transform_1, window_bounds = array<i64: 32, 32>}, {pipeline_mode = #tpu.pipeline_mode<synchronous>, transform_indices = @transform_2, window_bounds = array<i64: 1, 128>}, {pipeline_mode = #tpu.pipeline_mode<synchronous>, transform_indices = @transform_3, window_bounds = array<i64: 32, 64>}, {pipeline_mode = #tpu.pipeline_mode<synchronous>, transform_indices = @transform_4, window_bounds = array<i64: 8, 32>}, {pipeline_mode = #tpu.pipeline_mode<synchronous>, transform_indices = @transform_5, window_bounds = array<i64: 1, 160>}, {pipeline_mode = #tpu.pipeline_mode<synchronous>, transform_indices = @transform_6, window_bounds = array<i64: 1, 128>}, {pipeline_mode = #tpu.pipeline_mode<synchronous>, transform_indices = @transform_7, window_bounds = array<i64: 32, 160>}, {pipeline_mode = #tpu.pipeline_mode<synchronous>, transform_indices = @transform_8, window_bounds = array<i64: 32, 32>}, {pipeline_mode = #tpu.pipeline_mode<synchronous>, transform_indices = @transform_9, window_bounds = array<i64: 32, 128>}, {pipeline_mode = #tpu.pipeline_mode<synchronous>, transform_indices = @transform_10, window_bounds = array<i64: 128, 32>}, {pipeline_mode = #tpu.pipeline_mode<synchronous>, transform_indices = @transform_11, window_bounds = array<i64: 32, 32>}, {pipeline_mode = #tpu.pipeline_mode<synchronous>, transform_indices = @transform_12, window_bounds = array<i64: 32, 128>}]} {
    %c0 = arith.constant 0 : index
    %c0_0 = arith.constant 0 : index
    %0 = vector.load %arg1[%c0, %c0_0] : memref<32x32xf32, #tpu.memory_space<vmem>>, vector<32x32xf32>
    %c0_1 = arith.constant 0 : index
    %c0_2 = arith.constant 0 : index
    %1 = vector.load %arg2[%c0_1, %c0_2] : memref<32x32xf32, #tpu.memory_space<vmem>>, vector<32x32xf32>
    %c0_3 = arith.constant 0 : index
    %c0_4 = arith.constant 0 : index
    %2 = vector.load %arg5[%c0_3, %c0_4] : memref<8x32xf32, #tpu.memory_space<vmem>>, vector<8x32xf32>
    %c0_5 = arith.constant 0 : index
    %c0_6 = arith.constant 0 : index
    %3 = vector.load %arg4[%c0_5, %c0_6] : memref<32x64xf32, #tpu.memory_space<vmem>>, vector<32x64xf32>
    %4 = vector.extract_strided_slice %3 {offsets = [0, 0], sizes = [32, 32], strides = [1, 1]} : vector<32x64xf32> to vector<32x32xf32>
    %5 = vector.extract_strided_slice %3 {offsets = [0, 32], sizes = [32, 32], strides = [1, 1]} : vector<32x64xf32> to vector<32x32xf32>
    %6 = vector.extract_strided_slice %2 {offsets = [0, 0], sizes = [1, 32], strides = [1, 1]} : vector<8x32xf32> to vector<1x32xf32>
    %7 = vector.extract_strided_slice %2 {offsets = [1, 0], sizes = [1, 32], strides = [1, 1]} : vector<8x32xf32> to vector<1x32xf32>
    %cst = arith.constant dense<0.000000e+00> : vector<32xf32>
    %8 = vector.multi_reduction <add>, %0, %cst [1] : vector<32x32xf32> to vector<32xf32>
    %9 = vector.shape_cast %8 : vector<32xf32> to vector<32x1xf32>
    %cst_7 = arith.constant 3.200000e+01 : f32
    %10 = vector.broadcast %cst_7 : f32 to vector<32x1xf32>
    %11 = arith.divf %9, %10 : vector<32x1xf32>
    %12 = vector.broadcast %11 : vector<32x1xf32> to vector<32x32xf32>
    %13 = arith.subf %0, %12 : vector<32x32xf32>
    %14 = arith.mulf %13, %13 : vector<32x32xf32>
    %cst_8 = arith.constant dense<0.000000e+00> : vector<32xf32>
    %15 = vector.multi_reduction <add>, %14, %cst_8 [1] : vector<32x32xf32> to vector<32xf32>
    %16 = vector.shape_cast %15 : vector<32xf32> to vector<32x1xf32>
    %cst_9 = arith.constant 3.200000e+01 : f32
    %17 = vector.broadcast %cst_9 : f32 to vector<32x1xf32>
    %18 = arith.divf %16, %17 : vector<32x1xf32>
    %cst_10 = arith.constant 9.99999974E-6 : f32
    %19 = vector.broadcast %cst_10 : f32 to vector<32x1xf32>
    %20 = arith.addf %18, %19 : vector<32x1xf32>
    %21 = math.rsqrt %20 : vector<32x1xf32>
    %22 = vector.broadcast %21 : vector<32x1xf32> to vector<32x32xf32>
    %23 = arith.mulf %13, %22 : vector<32x32xf32>
    %24 = vector.broadcast %6 : vector<1x32xf32> to vector<32x32xf32>
    %25 = arith.mulf %23, %24 : vector<32x32xf32>
    %26 = vector.broadcast %7 : vector<1x32xf32> to vector<32x32xf32>
    %27 = arith.addf %25, %26 : vector<32x32xf32>
    %28 = arith.truncf %27 : vector<32x32xf32> to vector<32x32xbf16>
    %c0_11 = arith.constant 0 : index
    %c0_12 = arith.constant 0 : index
    %29 = vector.load %arg8[%c0_11, %c0_12] : memref<32x160xbf16, #tpu.memory_space<vmem>>, vector<32x160xbf16>
    %cst_13 = arith.constant dense<0.000000e+00> : vector<32x160xf32>
    %30 = tpu.matmul %28, %29, %cst_13 {dimension_numbers = #tpu.dot_dimension_numbers<[1], [0], [0], [1], [0, 0, 1, 1], [], []>} : vector<32x32xbf16>, vector<32x160xbf16>, vector<32x160xf32> -> vector<32x160xf32>
    %c0_14 = arith.constant 0 : index
    %c0_15 = arith.constant 0 : index
    %31 = vector.load %arg6[%c0_14, %c0_15] : memref<1x160xf32, #tpu.memory_space<vmem>>, vector<1x160xf32>
    %32 = vector.broadcast %31 : vector<1x160xf32> to vector<32x160xf32>
    %33 = arith.addf %30, %32 : vector<32x160xf32>
    %34 = vector.extract_strided_slice %33 {offsets = [0, 0], sizes = [32, 32], strides = [1, 1]} : vector<32x160xf32> to vector<32x32xf32>
    %35 = arith.mulf %34, %4 : vector<32x32xf32>
    %36 = vector.extract_strided_slice %33 {offsets = [0, 96], sizes = [32, 32], strides = [1, 1]} : vector<32x160xf32> to vector<32x32xf32>
    %37 = arith.mulf %36, %5 : vector<32x32xf32>
    %38 = arith.addf %35, %37 : vector<32x32xf32>
    %39 = vector.extract_strided_slice %33 {offsets = [0, 32], sizes = [32, 32], strides = [1, 1]} : vector<32x160xf32> to vector<32x32xf32>
    %40 = arith.mulf %39, %4 : vector<32x32xf32>
    %41 = vector.extract_strided_slice %33 {offsets = [0, 128], sizes = [32, 32], strides = [1, 1]} : vector<32x160xf32> to vector<32x32xf32>
    %42 = arith.mulf %41, %5 : vector<32x32xf32>
    %43 = arith.addf %40, %42 : vector<32x32xf32>
    %44 = vector.extract_strided_slice %33 {offsets = [0, 64], sizes = [32, 32], strides = [1, 1]} : vector<32x160xf32> to vector<32x32xf32>
    %45 = arith.truncf %38 : vector<32x32xf32> to vector<32x32xbf16>
    %46 = arith.truncf %43 : vector<32x32xf32> to vector<32x32xbf16>
    %47 = arith.truncf %44 : vector<32x32xf32> to vector<32x32xbf16>
    %48 = vector.extract_strided_slice %46 {offsets = [0, 0], sizes = [32, 8], strides = [1, 1]} : vector<32x32xbf16> to vector<32x8xbf16>
    %49 = vector.extract_strided_slice %45 {offsets = [0, 0], sizes = [32, 8], strides = [1, 1]} : vector<32x32xbf16> to vector<32x8xbf16>
    %cst_16 = arith.constant dense<0.000000e+00> : vector<32x32xf32>
    %50 = tpu.matmul %48, %49, %cst_16 {dimension_numbers = #tpu.dot_dimension_numbers<[1], [1], [0], [0], [0, 0, 1, 0], [], []>} : vector<32x8xbf16>, vector<32x8xbf16>, vector<32x32xf32> -> vector<32x32xf32>
    %51 = arith.addf %50, %1 : vector<32x32xf32>
    %cst_17 = arith.constant dense<0xFF800000> : vector<32xf32>
    %52 = vector.multi_reduction <maximumf>, %51, %cst_17 [0] : vector<32x32xf32> to vector<32xf32>
    %53 = vector.shape_cast %52 : vector<32xf32> to vector<1x32xf32>
    %54 = vector.broadcast %53 : vector<1x32xf32> to vector<32x32xf32>
    %55 = arith.subf %51, %54 : vector<32x32xf32>
    %56 = math.exp %55 : vector<32x32xf32>
    %cst_18 = arith.constant dense<0.000000e+00> : vector<32xf32>
    %57 = vector.multi_reduction <add>, %56, %cst_18 [0] : vector<32x32xf32> to vector<32xf32>
    %58 = vector.shape_cast %57 : vector<32xf32> to vector<1x32xf32>
    %59 = tpu.reciprocal %58 {approx = true} : vector<1x32xf32> -> vector<1x32xf32>
    %60 = vector.broadcast %59 : vector<1x32xf32> to vector<32x32xf32>
    %61 = arith.mulf %56, %60 : vector<32x32xf32>
    %62 = arith.truncf %61 : vector<32x32xf32> to vector<32x32xbf16>
    %63 = vector.extract_strided_slice %47 {offsets = [0, 0], sizes = [32, 8], strides = [1, 1]} : vector<32x32xbf16> to vector<32x8xbf16>
    %cst_19 = arith.constant dense<0.000000e+00> : vector<32x8xf32>
    %64 = tpu.matmul %62, %63, %cst_19 {dimension_numbers = #tpu.dot_dimension_numbers<[0], [0], [1], [1], [0, 1, 1, 1], [], []>} : vector<32x32xbf16>, vector<32x8xbf16>, vector<32x8xf32> -> vector<32x8xf32>
    %65 = vector.extract_strided_slice %46 {offsets = [0, 8], sizes = [32, 8], strides = [1, 1]} : vector<32x32xbf16> to vector<32x8xbf16>
    %66 = vector.extract_strided_slice %45 {offsets = [0, 8], sizes = [32, 8], strides = [1, 1]} : vector<32x32xbf16> to vector<32x8xbf16>
    %cst_20 = arith.constant dense<0.000000e+00> : vector<32x32xf32>
    %67 = tpu.matmul %65, %66, %cst_20 {dimension_numbers = #tpu.dot_dimension_numbers<[1], [1], [0], [0], [0, 0, 1, 0], [], []>} : vector<32x8xbf16>, vector<32x8xbf16>, vector<32x32xf32> -> vector<32x32xf32>
    %68 = arith.addf %67, %1 : vector<32x32xf32>
    %cst_21 = arith.constant dense<0xFF800000> : vector<32xf32>
    %69 = vector.multi_reduction <maximumf>, %68, %cst_21 [0] : vector<32x32xf32> to vector<32xf32>
    %70 = vector.shape_cast %69 : vector<32xf32> to vector<1x32xf32>
    %71 = vector.broadcast %70 : vector<1x32xf32> to vector<32x32xf32>
    %72 = arith.subf %68, %71 : vector<32x32xf32>
    %73 = math.exp %72 : vector<32x32xf32>
    %cst_22 = arith.constant dense<0.000000e+00> : vector<32xf32>
    %74 = vector.multi_reduction <add>, %73, %cst_22 [0] : vector<32x32xf32> to vector<32xf32>
    %75 = vector.shape_cast %74 : vector<32xf32> to vector<1x32xf32>
    %76 = tpu.reciprocal %75 {approx = true} : vector<1x32xf32> -> vector<1x32xf32>
    %77 = vector.broadcast %76 : vector<1x32xf32> to vector<32x32xf32>
    %78 = arith.mulf %73, %77 : vector<32x32xf32>
    %79 = arith.truncf %78 : vector<32x32xf32> to vector<32x32xbf16>
    %80 = vector.extract_strided_slice %47 {offsets = [0, 8], sizes = [32, 8], strides = [1, 1]} : vector<32x32xbf16> to vector<32x8xbf16>
    %cst_23 = arith.constant dense<0.000000e+00> : vector<32x8xf32>
    %81 = tpu.matmul %79, %80, %cst_23 {dimension_numbers = #tpu.dot_dimension_numbers<[0], [0], [1], [1], [0, 1, 1, 1], [], []>} : vector<32x32xbf16>, vector<32x8xbf16>, vector<32x8xf32> -> vector<32x8xf32>
    %82 = vector.extract_strided_slice %46 {offsets = [0, 16], sizes = [32, 8], strides = [1, 1]} : vector<32x32xbf16> to vector<32x8xbf16>
    %83 = vector.extract_strided_slice %45 {offsets = [0, 16], sizes = [32, 8], strides = [1, 1]} : vector<32x32xbf16> to vector<32x8xbf16>
    %cst_24 = arith.constant dense<0.000000e+00> : vector<32x32xf32>
    %84 = tpu.matmul %82, %83, %cst_24 {dimension_numbers = #tpu.dot_dimension_numbers<[1], [1], [0], [0], [0, 0, 1, 0], [], []>} : vector<32x8xbf16>, vector<32x8xbf16>, vector<32x32xf32> -> vector<32x32xf32>
    %85 = arith.addf %84, %1 : vector<32x32xf32>
    %cst_25 = arith.constant dense<0xFF800000> : vector<32xf32>
    %86 = vector.multi_reduction <maximumf>, %85, %cst_25 [0] : vector<32x32xf32> to vector<32xf32>
    %87 = vector.shape_cast %86 : vector<32xf32> to vector<1x32xf32>
    %88 = vector.broadcast %87 : vector<1x32xf32> to vector<32x32xf32>
    %89 = arith.subf %85, %88 : vector<32x32xf32>
    %90 = math.exp %89 : vector<32x32xf32>
    %cst_26 = arith.constant dense<0.000000e+00> : vector<32xf32>
    %91 = vector.multi_reduction <add>, %90, %cst_26 [0] : vector<32x32xf32> to vector<32xf32>
    %92 = vector.shape_cast %91 : vector<32xf32> to vector<1x32xf32>
    %93 = tpu.reciprocal %92 {approx = true} : vector<1x32xf32> -> vector<1x32xf32>
    %94 = vector.broadcast %93 : vector<1x32xf32> to vector<32x32xf32>
    %95 = arith.mulf %90, %94 : vector<32x32xf32>
    %96 = arith.truncf %95 : vector<32x32xf32> to vector<32x32xbf16>
    %97 = vector.extract_strided_slice %47 {offsets = [0, 16], sizes = [32, 8], strides = [1, 1]} : vector<32x32xbf16> to vector<32x8xbf16>
    %cst_27 = arith.constant dense<0.000000e+00> : vector<32x8xf32>
    %98 = tpu.matmul %96, %97, %cst_27 {dimension_numbers = #tpu.dot_dimension_numbers<[0], [0], [1], [1], [0, 1, 1, 1], [], []>} : vector<32x32xbf16>, vector<32x8xbf16>, vector<32x8xf32> -> vector<32x8xf32>
    %99 = vector.extract_strided_slice %46 {offsets = [0, 24], sizes = [32, 8], strides = [1, 1]} : vector<32x32xbf16> to vector<32x8xbf16>
    %100 = vector.extract_strided_slice %45 {offsets = [0, 24], sizes = [32, 8], strides = [1, 1]} : vector<32x32xbf16> to vector<32x8xbf16>
    %cst_28 = arith.constant dense<0.000000e+00> : vector<32x32xf32>
    %101 = tpu.matmul %99, %100, %cst_28 {dimension_numbers = #tpu.dot_dimension_numbers<[1], [1], [0], [0], [0, 0, 1, 0], [], []>} : vector<32x8xbf16>, vector<32x8xbf16>, vector<32x32xf32> -> vector<32x32xf32>
    %102 = arith.addf %101, %1 : vector<32x32xf32>
    %cst_29 = arith.constant dense<0xFF800000> : vector<32xf32>
    %103 = vector.multi_reduction <maximumf>, %102, %cst_29 [0] : vector<32x32xf32> to vector<32xf32>
    %104 = vector.shape_cast %103 : vector<32xf32> to vector<1x32xf32>
    %105 = vector.broadcast %104 : vector<1x32xf32> to vector<32x32xf32>
    %106 = arith.subf %102, %105 : vector<32x32xf32>
    %107 = math.exp %106 : vector<32x32xf32>
    %cst_30 = arith.constant dense<0.000000e+00> : vector<32xf32>
    %108 = vector.multi_reduction <add>, %107, %cst_30 [0] : vector<32x32xf32> to vector<32xf32>
    %109 = vector.shape_cast %108 : vector<32xf32> to vector<1x32xf32>
    %110 = tpu.reciprocal %109 {approx = true} : vector<1x32xf32> -> vector<1x32xf32>
    %111 = vector.broadcast %110 : vector<1x32xf32> to vector<32x32xf32>
    %112 = arith.mulf %107, %111 : vector<32x32xf32>
    %113 = arith.truncf %112 : vector<32x32xf32> to vector<32x32xbf16>
    %114 = vector.extract_strided_slice %47 {offsets = [0, 24], sizes = [32, 8], strides = [1, 1]} : vector<32x32xbf16> to vector<32x8xbf16>
    %cst_31 = arith.constant dense<0.000000e+00> : vector<32x8xf32>
    %115 = tpu.matmul %113, %114, %cst_31 {dimension_numbers = #tpu.dot_dimension_numbers<[0], [0], [1], [1], [0, 1, 1, 1], [], []>} : vector<32x32xbf16>, vector<32x8xbf16>, vector<32x8xf32> -> vector<32x8xf32>
    %116 = tpu.concatenate %61, %78, %95, %112 in 1 : vector<32x32xf32>, vector<32x32xf32>, vector<32x32xf32>, vector<32x32xf32> -> vector<32x128xf32>
    %c0_32 = arith.constant 0 : index
    %c0_33 = arith.constant 0 : index
    %117 = vector.load %arg3[%c0_32, %c0_33] : memref<1x128xf32, #tpu.memory_space<vmem>>, vector<1x128xf32>
    %118 = vector.broadcast %117 : vector<1x128xf32> to vector<32x128xf32>
    %119 = arith.mulf %116, %118 : vector<32x128xf32>
    %c0_34 = arith.constant 0 : index
    %c0_35 = arith.constant 0 : index
    %120 = vector.load %arg13[%c0_34, %c0_35] : memref<32x128xf32, #tpu.memory_space<vmem>>, vector<32x128xf32>
    tpu.vector_store %arg13[%c0_34, %c0_35], %119 {strides = array<i32>} : memref<32x128xf32, #tpu.memory_space<vmem>>, vector<32x128xf32>,
    %121 = tpu.concatenate %64, %81, %98, %115 in 1 : vector<32x8xf32>, vector<32x8xf32>, vector<32x8xf32>, vector<32x8xf32> -> vector<32x32xf32>
    %122 = arith.truncf %121 : vector<32x32xf32> to vector<32x32xbf16>
    %c0_36 = arith.constant 0 : index
    %c0_37 = arith.constant 0 : index
    %123 = vector.load %arg9[%c0_36, %c0_37] : memref<32x32xbf16, #tpu.memory_space<vmem>>, vector<32x32xbf16>
    %cst_38 = arith.constant dense<0.000000e+00> : vector<32x32xf32>
    %124 = tpu.matmul %122, %123, %cst_38 {dimension_numbers = #tpu.dot_dimension_numbers<[1], [0], [0], [1], [0, 0, 1, 1], [], []>} : vector<32x32xbf16>, vector<32x32xbf16>, vector<32x32xf32> -> vector<32x32xf32>
    %125 = vector.extract_strided_slice %2 {offsets = [4, 0], sizes = [1, 32], strides = [1, 1]} : vector<8x32xf32> to vector<1x32xf32>
    %126 = vector.broadcast %125 : vector<1x32xf32> to vector<32x32xf32>
    %127 = arith.addf %124, %126 : vector<32x32xf32>
    %128 = arith.addf %0, %127 : vector<32x32xf32>
    %129 = vector.extract_strided_slice %2 {offsets = [2, 0], sizes = [1, 32], strides = [1, 1]} : vector<8x32xf32> to vector<1x32xf32>
    %130 = vector.extract_strided_slice %2 {offsets = [3, 0], sizes = [1, 32], strides = [1, 1]} : vector<8x32xf32> to vector<1x32xf32>
    %cst_39 = arith.constant dense<0.000000e+00> : vector<32xf32>
    %131 = vector.multi_reduction <add>, %128, %cst_39 [1] : vector<32x32xf32> to vector<32xf32>
    %132 = vector.shape_cast %131 : vector<32xf32> to vector<32x1xf32>
    %cst_40 = arith.constant 3.200000e+01 : f32
    %133 = vector.broadcast %cst_40 : f32 to vector<32x1xf32>
    %134 = arith.divf %132, %133 : vector<32x1xf32>
    %135 = vector.broadcast %134 : vector<32x1xf32> to vector<32x32xf32>
    %136 = arith.subf %128, %135 : vector<32x32xf32>
    %137 = arith.mulf %136, %136 : vector<32x32xf32>
    %cst_41 = arith.constant dense<0.000000e+00> : vector<32xf32>
    %138 = vector.multi_reduction <add>, %137, %cst_41 [1] : vector<32x32xf32> to vector<32xf32>
    %139 = vector.shape_cast %138 : vector<32xf32> to vector<32x1xf32>
    %cst_42 = arith.constant 3.200000e+01 : f32
    %140 = vector.broadcast %cst_42 : f32 to vector<32x1xf32>
    %141 = arith.divf %139, %140 : vector<32x1xf32>
    %cst_43 = arith.constant 9.99999974E-6 : f32
    %142 = vector.broadcast %cst_43 : f32 to vector<32x1xf32>
    %143 = arith.addf %141, %142 : vector<32x1xf32>
    %144 = math.rsqrt %143 : vector<32x1xf32>
    %145 = vector.broadcast %144 : vector<32x1xf32> to vector<32x32xf32>
    %146 = arith.mulf %136, %145 : vector<32x32xf32>
    %147 = vector.broadcast %129 : vector<1x32xf32> to vector<32x32xf32>
    %148 = arith.mulf %146, %147 : vector<32x32xf32>
    %149 = vector.broadcast %130 : vector<1x32xf32> to vector<32x32xf32>
    %150 = arith.addf %148, %149 : vector<32x32xf32>
    %151 = arith.truncf %150 : vector<32x32xf32> to vector<32x32xbf16>
    %c0_44 = arith.constant 0 : index
    %c0_45 = arith.constant 0 : index
    %152 = vector.load %arg10[%c0_44, %c0_45] : memref<32x128xbf16, #tpu.memory_space<vmem>>, vector<32x128xbf16>
    %cst_46 = arith.constant dense<0.000000e+00> : vector<32x128xf32>
    %153 = tpu.matmul %151, %152, %cst_46 {dimension_numbers = #tpu.dot_dimension_numbers<[1], [0], [0], [1], [0, 0, 1, 1], [], []>} : vector<32x32xbf16>, vector<32x128xbf16>, vector<32x128xf32> -> vector<32x128xf32>
    %c0_47 = arith.constant 0 : index
    %c0_48 = arith.constant 0 : index
    %154 = vector.load %arg7[%c0_47, %c0_48] : memref<1x128xf32, #tpu.memory_space<vmem>>, vector<1x128xf32>
    %155 = vector.broadcast %154 : vector<1x128xf32> to vector<32x128xf32>
    %156 = arith.addf %153, %155 : vector<32x128xf32>
    %157 = arith.mulf %156, %156 : vector<32x128xf32>
    %158 = arith.mulf %156, %157 : vector<32x128xf32>
    %cst_49 = arith.constant 4.471500e-02 : f32
    %159 = vector.broadcast %cst_49 : f32 to vector<32x128xf32>
    %160 = arith.mulf %159, %158 : vector<32x128xf32>
    %161 = arith.addf %156, %160 : vector<32x128xf32>
    %cst_50 = arith.constant 0.797884583 : f32
    %162 = vector.broadcast %cst_50 : f32 to vector<32x128xf32>
    %163 = arith.mulf %162, %161 : vector<32x128xf32>
    %164 = math.tanh %163 : vector<32x128xf32>
    %cst_51 = arith.constant 1.000000e+00 : f32
    %165 = vector.broadcast %cst_51 : f32 to vector<32x128xf32>
    %166 = arith.addf %165, %164 : vector<32x128xf32>
    %cst_52 = arith.constant 5.000000e-01 : f32
    %167 = vector.broadcast %cst_52 : f32 to vector<32x128xf32>
    %168 = arith.mulf %167, %166 : vector<32x128xf32>
    %169 = arith.mulf %156, %168 : vector<32x128xf32>
    %170 = arith.truncf %169 : vector<32x128xf32> to vector<32x128xbf16>
    %c0_53 = arith.constant 0 : index
    %c0_54 = arith.constant 0 : index
    %171 = vector.load %arg11[%c0_53, %c0_54] : memref<128x32xbf16, #tpu.memory_space<vmem>>, vector<128x32xbf16>
    %cst_55 = arith.constant dense<0.000000e+00> : vector<32x32xf32>
    %172 = tpu.matmul %170, %171, %cst_55 {dimension_numbers = #tpu.dot_dimension_numbers<[1], [0], [0], [1], [0, 0, 1, 1], [], []>} : vector<32x128xbf16>, vector<128x32xbf16>, vector<32x32xf32> -> vector<32x32xf32>
    %173 = vector.extract_strided_slice %2 {offsets = [5, 0], sizes = [1, 32], strides = [1, 1]} : vector<8x32xf32> to vector<1x32xf32>
    %174 = vector.broadcast %173 : vector<1x32xf32> to vector<32x32xf32>
    %175 = arith.addf %172, %174 : vector<32x32xf32>
    %176 = arith.addf %128, %175 : vector<32x32xf32>
    %c0_56 = arith.constant 0 : index
    %c0_57 = arith.constant 0 : index
    %177 = vector.load %arg12[%c0_56, %c0_57] : memref<32x32xf32, #tpu.memory_space<vmem>>, vector<32x32xf32>
    tpu.vector_store %arg12[%c0_56, %c0_57], %176 {strides = array<i32>} : memref<32x32xf32, #tpu.memory_space<vmem>>, vector<32x32xf32>,
    return
  }
  func.func @transform_0(%arg0: i32) -> (i32, i32) {
    %c0_i32 = arith.constant 0 : i32
    %c0_i32_0 = arith.constant 0 : i32
    %c0_i32_1 = arith.constant 0 : i32
    return %c0_i32, %c0_i32_0 : i32, i32
  }
  func.func @transform_1(%arg0: i32) -> (i32, i32) {
    %c0_i32 = arith.constant 0 : i32
    %c0_i32_0 = arith.constant 0 : i32
    %c0_i32_1 = arith.constant 0 : i32
    return %c0_i32, %c0_i32_0 : i32, i32
  }
  func.func @transform_2(%arg0: i32) -> (i32, i32) {
    %c0_i32 = arith.constant 0 : i32
    %c0_i32_0 = arith.constant 0 : i32
    %c0_i32_1 = arith.constant 0 : i32
    return %c0_i32, %c0_i32_0 : i32, i32
  }
  func.func @transform_3(%arg0: i32) -> (i32, i32) {
    %c0_i32 = arith.constant 0 : i32
    %c0_i32_0 = arith.constant 0 : i32
    %c0_i32_1 = arith.constant 0 : i32
    return %c0_i32, %c0_i32_0 : i32, i32
  }
  func.func @transform_4(%arg0: i32) -> (i32, i32) {
    %c0_i32 = arith.constant 0 : i32
    %c0_i32_0 = arith.constant 0 : i32
    %c0_i32_1 = arith.constant 0 : i32
    return %c0_i32, %c0_i32_0 : i32, i32
  }
  func.func @transform_5(%arg0: i32) -> (i32, i32) {
    %c0_i32 = arith.constant 0 : i32
    %c0_i32_0 = arith.constant 0 : i32
    %c0_i32_1 = arith.constant 0 : i32
    return %c0_i32, %c0_i32_0 : i32, i32
  }
  func.func @transform_6(%arg0: i32) -> (i32, i32) {
    %c0_i32 = arith.constant 0 : i32
    %c0_i32_0 = arith.constant 0 : i32
    %c0_i32_1 = arith.constant 0 : i32
    return %c0_i32, %c0_i32_0 : i32, i32
  }
  func.func @transform_7(%arg0: i32) -> (i32, i32) {
    %c0_i32 = arith.constant 0 : i32
    %c0_i32_0 = arith.constant 0 : i32
    %c0_i32_1 = arith.constant 0 : i32
    return %c0_i32, %c0_i32_0 : i32, i32
  }
  func.func @transform_8(%arg0: i32) -> (i32, i32) {
    %c0_i32 = arith.constant 0 : i32
    %c0_i32_0 = arith.constant 0 : i32
    %c0_i32_1 = arith.constant 0 : i32
    return %c0_i32, %c0_i32_0 : i32, i32
  }
  func.func @transform_9(%arg0: i32) -> (i32, i32) {
    %c0_i32 = arith.constant 0 : i32
    %c0_i32_0 = arith.constant 0 : i32
    %c0_i32_1 = arith.constant 0 : i32
    return %c0_i32, %c0_i32_0 : i32, i32
  }
  func.func @transform_10(%arg0: i32) -> (i32, i32) {
    %c0_i32 = arith.constant 0 : i32
    %c0_i32_0 = arith.constant 0 : i32
    %c0_i32_1 = arith.constant 0 : i32
    return %c0_i32, %c0_i32_0 : i32, i32
  }
  func.func @transform_11(%arg0: i32) -> (i32, i32) {
    %c0_i32 = arith.constant 0 : i32
    %c0_i32_0 = arith.constant 0 : i32
    %c0_i32_1 = arith.constant 0 : i32
    return %c0_i32, %c0_i32_0 : i32, i32
  }
  func.func @transform_12(%arg0: i32) -> (i32, i32) {
    %c0_i32 = arith.constant 0 : i32
    %c0_i32_0 = arith.constant 0 : i32
    %c0_i32_1 = arith.constant 0 : i32
    return %c0_i32, %c0_i32_0 : i32, i32
  }
}

module attributes {stable_mosaic.version = 11 : i64} {
  func.func @_esm_layer_kernel(%arg0: i32, %arg1: memref<32x32xf32, #tpu.memory_space<vmem>>, %arg2: memref<32x32xf32, #tpu.memory_space<vmem>>, %arg3: memref<1x128xf32, #tpu.memory_space<vmem>>, %arg4: memref<32x64xf32, #tpu.memory_space<vmem>>, %arg5: memref<8x32xf32, #tpu.memory_space<vmem>>, %arg6: memref<1x160xf32, #tpu.memory_space<vmem>>, %arg7: memref<1x128xf32, #tpu.memory_space<vmem>>, %arg8: memref<32x160xbf16, #tpu.memory_space<vmem>>, %arg9: memref<32x32xbf16, #tpu.memory_space<vmem>>, %arg10: memref<32x128xbf16, #tpu.memory_space<vmem>>, %arg11: memref<128x32xbf16, #tpu.memory_space<vmem>>, %arg12: memref<32x32xf32, #tpu.memory_space<vmem>>, %arg13: memref<32x128xf32, #tpu.memory_space<vmem>>) attributes {dimension_semantics = [#tpu.dimension_semantics<arbitrary>], iteration_bounds = array<i64: 1>, scalar_prefetch = 0 : i64, scratch_operands = 0 : i64, tpu.core_type = #tpu.core_type<tc>, window_params = [{pipeline_mode = #tpu.pipeline_mode<synchronous>, transform_indices = @transform_0, window_bounds = array<i64: 32, 32>}, {pipeline_mode = #tpu.pipeline_mode<synchronous>, transform_indices = @transform_1, window_bounds = array<i64: 32, 32>}, {pipeline_mode = #tpu.pipeline_mode<synchronous>, transform_indices = @transform_2, window_bounds = array<i64: 1, 128>}, {pipeline_mode = #tpu.pipeline_mode<synchronous>, transform_indices = @transform_3, window_bounds = array<i64: 32, 64>}, {pipeline_mode = #tpu.pipeline_mode<synchronous>, transform_indices = @transform_4, window_bounds = array<i64: 8, 32>}, {pipeline_mode = #tpu.pipeline_mode<synchronous>, transform_indices = @transform_5, window_bounds = array<i64: 1, 160>}, {pipeline_mode = #tpu.pipeline_mode<synchronous>, transform_indices = @transform_6, window_bounds = array<i64: 1, 128>}, {pipeline_mode = #tpu.pipeline_mode<synchronous>, transform_indices = @transform_7, window_bounds = array<i64: 32, 160>}, {pipeline_mode = #tpu.pipeline_mode<synchronous>, transform_indices = @transform_8, window_bounds = array<i64: 32, 32>}, {pipeline_mode = #tpu.pipeline_mode<synchronous>, transform_indices = @transform_9, window_bounds = array<i64: 32, 128>}, {pipeline_mode = #tpu.pipeline_mode<synchronous>, transform_indices = @transform_10, window_bounds = array<i64: 128, 32>}, {pipeline_mode = #tpu.pipeline_mode<synchronous>, transform_indices = @transform_11, window_bounds = array<i64: 32, 32>}, {pipeline_mode = #tpu.pipeline_mode<synchronous>, transform_indices = @transform_12, window_bounds = array<i64: 32, 128>}]} {
    %c0 = arith.constant 0 : index
    %c0_0 = arith.constant 0 : index
    %0 = vector.load %arg1[%c0, %c0_0] : memref<32x32xf32, #tpu.memory_space<vmem>>, vector<32x32xf32>
    %c0_1 = arith.constant 0 : index
    %c0_2 = arith.constant 0 : index
    %1 = vector.load %arg2[%c0_1, %c0_2] : memref<32x32xf32, #tpu.memory_space<vmem>>, vector<32x32xf32>
    %c0_3 = arith.constant 0 : index
    %c0_4 = arith.constant 0 : index
    %2 = vector.load %arg5[%c0_3, %c0_4] : memref<8x32xf32, #tpu.memory_space<vmem>>, vector<8x32xf32>
    %c0_5 = arith.constant 0 : index
    %c0_6 = arith.constant 0 : index
    %3 = vector.load %arg4[%c0_5, %c0_6] : memref<32x64xf32, #tpu.memory_space<vmem>>, vector<32x64xf32>
    %4 = vector.extract_strided_slice %3 {offsets = [0, 0], sizes = [32, 32], strides = [1, 1]} : vector<32x64xf32> to vector<32x32xf32>
    %5 = vector.extract_strided_slice %3 {offsets = [0, 32], sizes = [32, 32], strides = [1, 1]} : vector<32x64xf32> to vector<32x32xf32>
    %6 = vector.extract_strided_slice %2 {offsets = [0, 0], sizes = [1, 32], strides = [1, 1]} : vector<8x32xf32> to vector<1x32xf32>
    %7 = vector.extract_strided_slice %2 {offsets = [1, 0], sizes = [1, 32], strides = [1, 1]} : vector<8x32xf32> to vector<1x32xf32>
    %cst = arith.constant dense<0.000000e+00> : vector<32xf32>
    %8 = vector.multi_reduction <add>, %0, %cst [1] : vector<32x32xf32> to vector<32xf32>
    %9 = vector.shape_cast %8 : vector<32xf32> to vector<32x1xf32>
    %cst_7 = arith.constant 3.200000e+01 : f32
    %10 = vector.broadcast %cst_7 : f32 to vector<32x1xf32>
    %11 = arith.divf %9, %10 : vector<32x1xf32>
    %12 = vector.broadcast %11 : vector<32x1xf32> to vector<32x32xf32>
    %13 = arith.subf %0, %12 : vector<32x32xf32>
    %14 = arith.mulf %13, %13 : vector<32x32xf32>
    %cst_8 = arith.constant dense<0.000000e+00> : vector<32xf32>
    %15 = vector.multi_reduction <add>, %14, %cst_8 [1] : vector<32x32xf32> to vector<32xf32>
    %16 = vector.shape_cast %15 : vector<32xf32> to vector<32x1xf32>
    %cst_9 = arith.constant 3.200000e+01 : f32
    %17 = vector.broadcast %cst_9 : f32 to vector<32x1xf32>
    %18 = arith.divf %16, %17 : vector<32x1xf32>
    %cst_10 = arith.constant 9.99999974E-6 : f32
    %19 = vector.broadcast %cst_10 : f32 to vector<32x1xf32>
    %20 = arith.addf %18, %19 : vector<32x1xf32>
    %21 = math.rsqrt %20 : vector<32x1xf32>
    %22 = vector.broadcast %21 : vector<32x1xf32> to vector<32x32xf32>
    %23 = arith.mulf %13, %22 : vector<32x32xf32>
    %24 = vector.broadcast %6 : vector<1x32xf32> to vector<32x32xf32>
    %25 = arith.mulf %23, %24 : vector<32x32xf32>
    %26 = vector.broadcast %7 : vector<1x32xf32> to vector<32x32xf32>
    %27 = arith.addf %25, %26 : vector<32x32xf32>
    %28 = arith.truncf %27 : vector<32x32xf32> to vector<32x32xbf16>
    %c0_11 = arith.constant 0 : index
    %c0_12 = arith.constant 0 : index
    %29 = vector.load %arg8[%c0_11, %c0_12] : memref<32x160xbf16, #tpu.memory_space<vmem>>, vector<32x160xbf16>
    %cst_13 = arith.constant dense<0.000000e+00> : vector<32x160xf32>
    %30 = tpu.matmul %28, %29, %cst_13 {dimension_numbers = #tpu.dot_dimension_numbers<[1], [0], [0], [1], [0, 0, 1, 1], [], []>} : vector<32x32xbf16>, vector<32x160xbf16>, vector<32x160xf32> -> vector<32x160xf32>
    %c0_14 = arith.constant 0 : index
    %c0_15 = arith.constant 0 : index
    %31 = vector.load %arg6[%c0_14, %c0_15] : memref<1x160xf32, #tpu.memory_space<vmem>>, vector<1x160xf32>
    %32 = vector.broadcast %31 : vector<1x160xf32> to vector<32x160xf32>
    %33 = arith.addf %30, %32 : vector<32x160xf32>
    %34 = vector.extract_strided_slice %33 {offsets = [0, 0], sizes = [32, 32], strides = [1, 1]} : vector<32x160xf32> to vector<32x32xf32>
    %35 = arith.mulf %34, %4 : vector<32x32xf32>
    %36 = vector.extract_strided_slice %33 {offsets = [0, 96], sizes = [32, 32], strides = [1, 1]} : vector<32x160xf32> to vector<32x32xf32>
    %37 = arith.mulf %36, %5 : vector<32x32xf32>
    %38 = arith.addf %35, %37 : vector<32x32xf32>
    %39 = vector.extract_strided_slice %33 {offsets = [0, 32], sizes = [32, 32], strides = [1, 1]} : vector<32x160xf32> to vector<32x32xf32>
    %40 = arith.mulf %39, %4 : vector<32x32xf32>
    %41 = vector.extract_strided_slice %33 {offsets = [0, 128], sizes = [32, 32], strides = [1, 1]} : vector<32x160xf32> to vector<32x32xf32>
    %42 = arith.mulf %41, %5 : vector<32x32xf32>
    %43 = arith.addf %40, %42 : vector<32x32xf32>
    %44 = vector.extract_strided_slice %33 {offsets = [0, 64], sizes = [32, 32], strides = [1, 1]} : vector<32x160xf32> to vector<32x32xf32>
    %45 = arith.truncf %38 : vector<32x32xf32> to vector<32x32xbf16>
    %46 = arith.truncf %43 : vector<32x32xf32> to vector<32x32xbf16>
    %47 = arith.truncf %44 : vector<32x32xf32> to vector<32x32xbf16>
    %48 = vector.extract_strided_slice %46 {offsets = [0, 0], sizes = [32, 8], strides = [1, 1]} : vector<32x32xbf16> to vector<32x8xbf16>
    %49 = vector.extract_strided_slice %45 {offsets = [0, 0], sizes = [32, 8], strides = [1, 1]} : vector<32x32xbf16> to vector<32x8xbf16>
    %cst_16 = arith.constant dense<0.000000e+00> : vector<32x32xf32>
    %50 = tpu.matmul %48, %49, %cst_16 {dimension_numbers = #tpu.dot_dimension_numbers<[1], [1], [0], [0], [0, 0, 1, 0], [], []>} : vector<32x8xbf16>, vector<32x8xbf16>, vector<32x32xf32> -> vector<32x32xf32>
    %51 = arith.addf %50, %1 : vector<32x32xf32>
    %cst_17 = arith.constant dense<0xFF800000> : vector<32xf32>
    %52 = vector.multi_reduction <maximumf>, %51, %cst_17 [0] : vector<32x32xf32> to vector<32xf32>
    %53 = vector.shape_cast %52 : vector<32xf32> to vector<1x32xf32>
    %54 = vector.broadcast %53 : vector<1x32xf32> to vector<32x32xf32>
    %55 = arith.subf %51, %54 : vector<32x32xf32>
    %56 = math.exp %55 : vector<32x32xf32>
    %cst_18 = arith.constant dense<0.000000e+00> : vector<32xf32>
    %57 = vector.multi_reduction <add>, %56, %cst_18 [0] : vector<32x32xf32> to vector<32xf32>
    %58 = vector.shape_cast %57 : vector<32xf32> to vector<1x32xf32>
    %59 = tpu.reciprocal %58 {approx = true} : vector<1x32xf32> -> vector<1x32xf32>
    %60 = vector.broadcast %59 : vector<1x32xf32> to vector<32x32xf32>
    %61 = arith.mulf %56, %60 : vector<32x32xf32>
    %62 = arith.truncf %61 : vector<32x32xf32> to vector<32x32xbf16>
    %63 = vector.extract_strided_slice %47 {offsets = [0, 0], sizes = [32, 8], strides = [1, 1]} : vector<32x32xbf16> to vector<32x8xbf16>
    %cst_19 = arith.constant dense<0.000000e+00> : vector<32x8xf32>
    %64 = tpu.matmul %62, %63, %cst_19 {dimension_numbers = #tpu.dot_dimension_numbers<[0], [0], [1], [1], [0, 1, 1, 1], [], []>} : vector<32x32xbf16>, vector<32x8xbf16>, vector<32x8xf32> -> vector<32x8xf32>
    %65 = vector.extract_strided_slice %46 {offsets = [0, 8], sizes = [32, 8], strides = [1, 1]} : vector<32x32xbf16> to vector<32x8xbf16>
    %66 = vector.extract_strided_slice %45 {offsets = [0, 8], sizes = [32, 8], strides = [1, 1]} : vector<32x32xbf16> to vector<32x8xbf16>
    %cst_20 = arith.constant dense<0.000000e+00> : vector<32x32xf32>
    %67 = tpu.matmul %65, %66, %cst_20 {dimension_numbers = #tpu.dot_dimension_numbers<[1], [1], [0], [0], [0, 0, 1, 0], [], []>} : vector<32x8xbf16>, vector<32x8xbf16>, vector<32x32xf32> -> vector<32x32xf32>
    %68 = arith.addf %67, %1 : vector<32x32xf32>
    %cst_21 = arith.constant dense<0xFF800000> : vector<32xf32>
    %69 = vector.multi_reduction <maximumf>, %68, %cst_21 [0] : vector<32x32xf32> to vector<32xf32>
    %70 = vector.shape_cast %69 : vector<32xf32> to vector<1x32xf32>
    %71 = vector.broadcast %70 : vector<1x32xf32> to vector<32x32xf32>
    %72 = arith.subf %68, %71 : vector<32x32xf32>
    %73 = math.exp %72 : vector<32x32xf32>
    %cst_22 = arith.constant dense<0.000000e+00> : vector<32xf32>
    %74 = vector.multi_reduction <add>, %73, %cst_22 [0] : vector<32x32xf32> to vector<32xf32>
    %75 = vector.shape_cast %74 : vector<32xf32> to vector<1x32xf32>
    %76 = tpu.reciprocal %75 {approx = true} : vector<1x32xf32> -> vector<1x32xf32>
    %77 = vector.broadcast %76 : vector<1x32xf32> to vector<32x32xf32>
    %78 = arith.mulf %73, %77 : vector<32x32xf32>
    %79 = arith.truncf %78 : vector<32x32xf32> to vector<32x32xbf16>
    %80 = vector.extract_strided_slice %47 {offsets = [0, 8], sizes = [32, 8], strides = [1, 1]} : vector<32x32xbf16> to vector<32x8xbf16>
    %cst_23 = arith.constant dense<0.000000e+00> : vector<32x8xf32>
    %81 = tpu.matmul %79, %80, %cst_23 {dimension_numbers = #tpu.dot_dimension_numbers<[0], [0], [1], [1], [0, 1, 1, 1], [], []>} : vector<32x32xbf16>, vector<32x8xbf16>, vector<32x8xf32> -> vector<32x8xf32>
    %82 = vector.extract_strided_slice %46 {offsets = [0, 16], sizes = [32, 8], strides = [1, 1]} : vector<32x32xbf16> to vector<32x8xbf16>
    %83 = vector.extract_strided_slice %45 {offsets = [0, 16], sizes = [32, 8], strides = [1, 1]} : vector<32x32xbf16> to vector<32x8xbf16>
    %cst_24 = arith.constant dense<0.000000e+00> : vector<32x32xf32>
    %84 = tpu.matmul %82, %83, %cst_24 {dimension_numbers = #tpu.dot_dimension_numbers<[1], [1], [0], [0], [0, 0, 1, 0], [], []>} : vector<32x8xbf16>, vector<32x8xbf16>, vector<32x32xf32> -> vector<32x32xf32>
    %85 = arith.addf %84, %1 : vector<32x32xf32>
    %cst_25 = arith.constant dense<0xFF800000> : vector<32xf32>
    %86 = vector.multi_reduction <maximumf>, %85, %cst_25 [0] : vector<32x32xf32> to vector<32xf32>
    %87 = vector.shape_cast %86 : vector<32xf32> to vector<1x32xf32>
    %88 = vector.broadcast %87 : vector<1x32xf32> to vector<32x32xf32>
    %89 = arith.subf %85, %88 : vector<32x32xf32>
    %90 = math.exp %89 : vector<32x32xf32>
    %cst_26 = arith.constant dense<0.000000e+00> : vector<32xf32>
    %91 = vector.multi_reduction <add>, %90, %cst_26 [0] : vector<32x32xf32> to vector<32xf32>
    %92 = vector.shape_cast %91 : vector<32xf32> to vector<1x32xf32>
    %93 = tpu.reciprocal %92 {approx = true} : vector<1x32xf32> -> vector<1x32xf32>
    %94 = vector.broadcast %93 : vector<1x32xf32> to vector<32x32xf32>
    %95 = arith.mulf %90, %94 : vector<32x32xf32>
    %96 = arith.truncf %95 : vector<32x32xf32> to vector<32x32xbf16>
    %97 = vector.extract_strided_slice %47 {offsets = [0, 16], sizes = [32, 8], strides = [1, 1]} : vector<32x32xbf16> to vector<32x8xbf16>
    %cst_27 = arith.constant dense<0.000000e+00> : vector<32x8xf32>
    %98 = tpu.matmul %96, %97, %cst_27 {dimension_numbers = #tpu.dot_dimension_numbers<[0], [0], [1], [1], [0, 1, 1, 1], [], []>} : vector<32x32xbf16>, vector<32x8xbf16>, vector<32x8xf32> -> vector<32x8xf32>
    %99 = vector.extract_strided_slice %46 {offsets = [0, 24], sizes = [32, 8], strides = [1, 1]} : vector<32x32xbf16> to vector<32x8xbf16>
    %100 = vector.extract_strided_slice %45 {offsets = [0, 24], sizes = [32, 8], strides = [1, 1]} : vector<32x32xbf16> to vector<32x8xbf16>
    %cst_28 = arith.constant dense<0.000000e+00> : vector<32x32xf32>
    %101 = tpu.matmul %99, %100, %cst_28 {dimension_numbers = #tpu.dot_dimension_numbers<[1], [1], [0], [0], [0, 0, 1, 0], [], []>} : vector<32x8xbf16>, vector<32x8xbf16>, vector<32x32xf32> -> vector<32x32xf32>
    %102 = arith.addf %101, %1 : vector<32x32xf32>
    %cst_29 = arith.constant dense<0xFF800000> : vector<32xf32>
    %103 = vector.multi_reduction <maximumf>, %102, %cst_29 [0] : vector<32x32xf32> to vector<32xf32>
    %104 = vector.shape_cast %103 : vector<32xf32> to vector<1x32xf32>
    %105 = vector.broadcast %104 : vector<1x32xf32> to vector<32x32xf32>
    %106 = arith.subf %102, %105 : vector<32x32xf32>
    %107 = math.exp %106 : vector<32x32xf32>
    %cst_30 = arith.constant dense<0.000000e+00> : vector<32xf32>
    %108 = vector.multi_reduction <add>, %107, %cst_30 [0] : vector<32x32xf32> to vector<32xf32>
    %109 = vector.shape_cast %108 : vector<32xf32> to vector<1x32xf32>
    %110 = tpu.reciprocal %109 {approx = true} : vector<1x32xf32> -> vector<1x32xf32>
    %111 = vector.broadcast %110 : vector<1x32xf32> to vector<32x32xf32>
    %112 = arith.mulf %107, %111 : vector<32x32xf32>
    %113 = arith.truncf %112 : vector<32x32xf32> to vector<32x32xbf16>
    %114 = vector.extract_strided_slice %47 {offsets = [0, 24], sizes = [32, 8], strides = [1, 1]} : vector<32x32xbf16> to vector<32x8xbf16>
    %cst_31 = arith.constant dense<0.000000e+00> : vector<32x8xf32>
    %115 = tpu.matmul %113, %114, %cst_31 {dimension_numbers = #tpu.dot_dimension_numbers<[0], [0], [1], [1], [0, 1, 1, 1], [], []>} : vector<32x32xbf16>, vector<32x8xbf16>, vector<32x8xf32> -> vector<32x8xf32>
    %116 = tpu.concatenate %61, %78, %95, %112 in 1 : vector<32x32xf32>, vector<32x32xf32>, vector<32x32xf32>, vector<32x32xf32> -> vector<32x128xf32>
    %c0_32 = arith.constant 0 : index
    %c0_33 = arith.constant 0 : index
    %117 = vector.load %arg3[%c0_32, %c0_33] : memref<1x128xf32, #tpu.memory_space<vmem>>, vector<1x128xf32>
    %118 = vector.broadcast %117 : vector<1x128xf32> to vector<32x128xf32>
    %119 = arith.mulf %116, %118 : vector<32x128xf32>
    %c0_34 = arith.constant 0 : index
    %c0_35 = arith.constant 0 : index
    %120 = vector.load %arg13[%c0_34, %c0_35] : memref<32x128xf32, #tpu.memory_space<vmem>>, vector<32x128xf32>
    tpu.vector_store %arg13[%c0_34, %c0_35], %119 {strides = array<i32>} : memref<32x128xf32, #tpu.memory_space<vmem>>, vector<32x128xf32>,
    %121 = tpu.concatenate %64, %81, %98, %115 in 1 : vector<32x8xf32>, vector<32x8xf32>, vector<32x8xf32>, vector<32x8xf32> -> vector<32x32xf32>
    %122 = arith.truncf %121 : vector<32x32xf32> to vector<32x32xbf16>
    %c0_36 = arith.constant 0 : index
    %c0_37 = arith.constant 0 : index
    %123 = vector.load %arg9[%c0_36, %c0_37] : memref<32x32xbf16, #tpu.memory_space<vmem>>, vector<32x32xbf16>
    %cst_38 = arith.constant dense<0.000000e+00> : vector<32x32xf32>
    %124 = tpu.matmul %122, %123, %cst_38 {dimension_numbers = #tpu.dot_dimension_numbers<[1], [0], [0], [1], [0, 0, 1, 1], [], []>} : vector<32x32xbf16>, vector<32x32xbf16>, vector<32x32xf32> -> vector<32x32xf32>
    %125 = vector.extract_strided_slice %2 {offsets = [4, 0], sizes = [1, 32], strides = [1, 1]} : vector<8x32xf32> to vector<1x32xf32>
    %126 = vector.broadcast %125 : vector<1x32xf32> to vector<32x32xf32>
    %127 = arith.addf %124, %126 : vector<32x32xf32>
    %128 = arith.addf %0, %127 : vector<32x32xf32>
    %129 = vector.extract_strided_slice %2 {offsets = [2, 0], sizes = [1, 32], strides = [1, 1]} : vector<8x32xf32> to vector<1x32xf32>
    %130 = vector.extract_strided_slice %2 {offsets = [3, 0], sizes = [1, 32], strides = [1, 1]} : vector<8x32xf32> to vector<1x32xf32>
    %cst_39 = arith.constant dense<0.000000e+00> : vector<32xf32>
    %131 = vector.multi_reduction <add>, %128, %cst_39 [1] : vector<32x32xf32> to vector<32xf32>
    %132 = vector.shape_cast %131 : vector<32xf32> to vector<32x1xf32>
    %cst_40 = arith.constant 3.200000e+01 : f32
    %133 = vector.broadcast %cst_40 : f32 to vector<32x1xf32>
    %134 = arith.divf %132, %133 : vector<32x1xf32>
    %135 = vector.broadcast %134 : vector<32x1xf32> to vector<32x32xf32>
    %136 = arith.subf %128, %135 : vector<32x32xf32>
    %137 = arith.mulf %136, %136 : vector<32x32xf32>
    %cst_41 = arith.constant dense<0.000000e+00> : vector<32xf32>
    %138 = vector.multi_reduction <add>, %137, %cst_41 [1] : vector<32x32xf32> to vector<32xf32>
    %139 = vector.shape_cast %138 : vector<32xf32> to vector<32x1xf32>
    %cst_42 = arith.constant 3.200000e+01 : f32
    %140 = vector.broadcast %cst_42 : f32 to vector<32x1xf32>
    %141 = arith.divf %139, %140 : vector<32x1xf32>
    %cst_43 = arith.constant 9.99999974E-6 : f32
    %142 = vector.broadcast %cst_43 : f32 to vector<32x1xf32>
    %143 = arith.addf %141, %142 : vector<32x1xf32>
    %144 = math.rsqrt %143 : vector<32x1xf32>
    %145 = vector.broadcast %144 : vector<32x1xf32> to vector<32x32xf32>
    %146 = arith.mulf %136, %145 : vector<32x32xf32>
    %147 = vector.broadcast %129 : vector<1x32xf32> to vector<32x32xf32>
    %148 = arith.mulf %146, %147 : vector<32x32xf32>
    %149 = vector.broadcast %130 : vector<1x32xf32> to vector<32x32xf32>
    %150 = arith.addf %148, %149 : vector<32x32xf32>
    %151 = arith.truncf %150 : vector<32x32xf32> to vector<32x32xbf16>
    %c0_44 = arith.constant 0 : index
    %c0_45 = arith.constant 0 : index
    %152 = vector.load %arg10[%c0_44, %c0_45] : memref<32x128xbf16, #tpu.memory_space<vmem>>, vector<32x128xbf16>
    %cst_46 = arith.constant dense<0.000000e+00> : vector<32x128xf32>
    %153 = tpu.matmul %151, %152, %cst_46 {dimension_numbers = #tpu.dot_dimension_numbers<[1], [0], [0], [1], [0, 0, 1, 1], [], []>} : vector<32x32xbf16>, vector<32x128xbf16>, vector<32x128xf32> -> vector<32x128xf32>
    %c0_47 = arith.constant 0 : index
    %c0_48 = arith.constant 0 : index
    %154 = vector.load %arg7[%c0_47, %c0_48] : memref<1x128xf32, #tpu.memory_space<vmem>>, vector<1x128xf32>
    %155 = vector.broadcast %154 : vector<1x128xf32> to vector<32x128xf32>
    %156 = arith.addf %153, %155 : vector<32x128xf32>
    %157 = arith.mulf %156, %156 : vector<32x128xf32>
    %158 = arith.mulf %156, %157 : vector<32x128xf32>
    %cst_49 = arith.constant 4.471500e-02 : f32
    %159 = vector.broadcast %cst_49 : f32 to vector<32x128xf32>
    %160 = arith.mulf %159, %158 : vector<32x128xf32>
    %161 = arith.addf %156, %160 : vector<32x128xf32>
    %cst_50 = arith.constant 0.797884583 : f32
    %162 = vector.broadcast %cst_50 : f32 to vector<32x128xf32>
    %163 = arith.mulf %162, %161 : vector<32x128xf32>
    %164 = math.tanh %163 : vector<32x128xf32>
    %cst_51 = arith.constant 1.000000e+00 : f32
    %165 = vector.broadcast %cst_51 : f32 to vector<32x128xf32>
    %166 = arith.addf %165, %164 : vector<32x128xf32>
    %cst_52 = arith.constant 5.000000e-01 : f32
    %167 = vector.broadcast %cst_52 : f32 to vector<32x128xf32>
    %168 = arith.mulf %167, %166 : vector<32x128xf32>
    %169 = arith.mulf %156, %168 : vector<32x128xf32>
    %170 = arith.truncf %169 : vector<32x128xf32> to vector<32x128xbf16>
    %c0_53 = arith.constant 0 : index
    %c0_54 = arith.constant 0 : index
    %171 = vector.load %arg11[%c0_53, %c0_54] : memref<128x32xbf16, #tpu.memory_space<vmem>>, vector<128x32xbf16>
    %cst_55 = arith.constant dense<0.000000e+00> : vector<32x32xf32>
    %172 = tpu.matmul %170, %171, %cst_55 {dimension_numbers = #tpu.dot_dimension_numbers<[1], [0], [0], [1], [0, 0, 1, 1], [], []>} : vector<32x128xbf16>, vector<128x32xbf16>, vector<32x32xf32> -> vector<32x32xf32>
    %173 = vector.extract_strided_slice %2 {offsets = [5, 0], sizes = [1, 32], strides = [1, 1]} : vector<8x32xf32> to vector<1x32xf32>
    %174 = vector.broadcast %173 : vector<1x32xf32> to vector<32x32xf32>
    %175 = arith.addf %172, %174 : vector<32x32xf32>
    %176 = arith.addf %128, %175 : vector<32x32xf32>
    %177 = vector.extract_strided_slice %2 {offsets = [6, 0], sizes = [1, 32], strides = [1, 1]} : vector<8x32xf32> to vector<1x32xf32>
    %178 = vector.extract_strided_slice %2 {offsets = [7, 0], sizes = [1, 32], strides = [1, 1]} : vector<8x32xf32> to vector<1x32xf32>
    %cst_56 = arith.constant dense<0.000000e+00> : vector<32xf32>
    %179 = vector.multi_reduction <add>, %176, %cst_56 [1] : vector<32x32xf32> to vector<32xf32>
    %180 = vector.shape_cast %179 : vector<32xf32> to vector<32x1xf32>
    %cst_57 = arith.constant 3.200000e+01 : f32
    %181 = vector.broadcast %cst_57 : f32 to vector<32x1xf32>
    %182 = arith.divf %180, %181 : vector<32x1xf32>
    %183 = vector.broadcast %182 : vector<32x1xf32> to vector<32x32xf32>
    %184 = arith.subf %176, %183 : vector<32x32xf32>
    %185 = arith.mulf %184, %184 : vector<32x32xf32>
    %cst_58 = arith.constant dense<0.000000e+00> : vector<32xf32>
    %186 = vector.multi_reduction <add>, %185, %cst_58 [1] : vector<32x32xf32> to vector<32xf32>
    %187 = vector.shape_cast %186 : vector<32xf32> to vector<32x1xf32>
    %cst_59 = arith.constant 3.200000e+01 : f32
    %188 = vector.broadcast %cst_59 : f32 to vector<32x1xf32>
    %189 = arith.divf %187, %188 : vector<32x1xf32>
    %cst_60 = arith.constant 9.99999974E-6 : f32
    %190 = vector.broadcast %cst_60 : f32 to vector<32x1xf32>
    %191 = arith.addf %189, %190 : vector<32x1xf32>
    %192 = math.rsqrt %191 : vector<32x1xf32>
    %193 = vector.broadcast %192 : vector<32x1xf32> to vector<32x32xf32>
    %194 = arith.mulf %184, %193 : vector<32x32xf32>
    %195 = vector.broadcast %177 : vector<1x32xf32> to vector<32x32xf32>
    %196 = arith.mulf %194, %195 : vector<32x32xf32>
    %197 = vector.broadcast %178 : vector<1x32xf32> to vector<32x32xf32>
    %198 = arith.addf %196, %197 : vector<32x32xf32>
    %c0_61 = arith.constant 0 : index
    %c0_62 = arith.constant 0 : index
    %199 = vector.load %arg12[%c0_61, %c0_62] : memref<32x32xf32, #tpu.memory_space<vmem>>, vector<32x32xf32>
    tpu.vector_store %arg12[%c0_61, %c0_62], %198 {strides = array<i32>} : memref<32x32xf32, #tpu.memory_space<vmem>>, vector<32x32xf32>,
    return
  }
  func.func @transform_0(%arg0: i32) -> (i32, i32) {
    %c0_i32 = arith.constant 0 : i32
    %c0_i32_0 = arith.constant 0 : i32
    %c0_i32_1 = arith.constant 0 : i32
    return %c0_i32, %c0_i32_0 : i32, i32
  }
  func.func @transform_1(%arg0: i32) -> (i32, i32) {
    %c0_i32 = arith.constant 0 : i32
    %c0_i32_0 = arith.constant 0 : i32
    %c0_i32_1 = arith.constant 0 : i32
    return %c0_i32, %c0_i32_0 : i32, i32
  }
  func.func @transform_2(%arg0: i32) -> (i32, i32) {
    %c0_i32 = arith.constant 0 : i32
    %c0_i32_0 = arith.constant 0 : i32
    %c0_i32_1 = arith.constant 0 : i32
    return %c0_i32, %c0_i32_0 : i32, i32
  }
  func.func @transform_3(%arg0: i32) -> (i32, i32) {
    %c0_i32 = arith.constant 0 : i32
    %c0_i32_0 = arith.constant 0 : i32
    %c0_i32_1 = arith.constant 0 : i32
    return %c0_i32, %c0_i32_0 : i32, i32
  }
  func.func @transform_4(%arg0: i32) -> (i32, i32) {
    %c0_i32 = arith.constant 0 : i32
    %c0_i32_0 = arith.constant 0 : i32
    %c0_i32_1 = arith.constant 0 : i32
    return %c0_i32, %c0_i32_0 : i32, i32
  }
  func.func @transform_5(%arg0: i32) -> (i32, i32) {
    %c0_i32 = arith.constant 0 : i32
    %c0_i32_0 = arith.constant 0 : i32
    %c0_i32_1 = arith.constant 0 : i32
    return %c0_i32, %c0_i32_0 : i32, i32
  }
  func.func @transform_6(%arg0: i32) -> (i32, i32) {
    %c0_i32 = arith.constant 0 : i32
    %c0_i32_0 = arith.constant 0 : i32
    %c0_i32_1 = arith.constant 0 : i32
    return %c0_i32, %c0_i32_0 : i32, i32
  }
  func.func @transform_7(%arg0: i32) -> (i32, i32) {
    %c0_i32 = arith.constant 0 : i32
    %c0_i32_0 = arith.constant 0 : i32
    %c0_i32_1 = arith.constant 0 : i32
    return %c0_i32, %c0_i32_0 : i32, i32
  }
  func.func @transform_8(%arg0: i32) -> (i32, i32) {
    %c0_i32 = arith.constant 0 : i32
    %c0_i32_0 = arith.constant 0 : i32
    %c0_i32_1 = arith.constant 0 : i32
    return %c0_i32, %c0_i32_0 : i32, i32
  }
  func.func @transform_9(%arg0: i32) -> (i32, i32) {
    %c0_i32 = arith.constant 0 : i32
    %c0_i32_0 = arith.constant 0 : i32
    %c0_i32_1 = arith.constant 0 : i32
    return %c0_i32, %c0_i32_0 : i32, i32
  }
  func.func @transform_10(%arg0: i32) -> (i32, i32) {
    %c0_i32 = arith.constant 0 : i32
    %c0_i32_0 = arith.constant 0 : i32
    %c0_i32_1 = arith.constant 0 : i32
    return %c0_i32, %c0_i32_0 : i32, i32
  }
  func.func @transform_11(%arg0: i32) -> (i32, i32) {
    %c0_i32 = arith.constant 0 : i32
    %c0_i32_0 = arith.constant 0 : i32
    %c0_i32_1 = arith.constant 0 : i32
    return %c0_i32, %c0_i32_0 : i32, i32
  }
  func.func @transform_12(%arg0: i32) -> (i32, i32) {
    %c0_i32 = arith.constant 0 : i32
    %c0_i32_0 = arith.constant 0 : i32
    %c0_i32_1 = arith.constant 0 : i32
    return %c0_i32, %c0_i32_0 : i32, i32
  }
}

</mosaic_0001>

<bundles_post_ra>
// kernel: _lambda_.2
= control target key start
LH: loop header
LB: loop body
LE: loop exit
PB: predicated region body
PF: predicated region fallthrough
CT: control target
= control target key end

     0   :  { %vm54_vm0 = vcmask 261120   ;;  %v1960_v32 = vmov 0   ;;  %s1961_s23 = smov 64   ;;  %s1962_s25 = smov 96   ;;  %v108_v42 = vlaneseq  ;;  %vm329_vm1 = vcmask 64512   ;;  %s2604_s0 = inlined_call_operand.vmem [shape: f32[32,32], index: 0, kind: input, shape index: {}]   ;;  %s2605_s7 = inlined_call_operand.vmem [shape: bf16[32,160], index: 7, kind: input, shape index: {}]   ;;  %s2606_s3 = inlined_call_operand.vmem [shape: f32[32,64], index: 3, kind: input, shape index: {}]   ;;  %s2607_s4 = inlined_call_operand.vmem [shape: f32[8,32], index: 4, kind: input, shape index: {}]   ;;  %s2608_s5 = inlined_call_operand.vmem [shape: f32[1,160], index: 5, kind: input, shape index: {}]   ;;  %s2609_s1 = inlined_call_operand.vmem [shape: f32[32,32], index: 1, kind: input, shape index: {}]   ;;  %s2610_s8 = inlined_call_operand.vmem [shape: bf16[32,32], index: 8, kind: input, shape index: {}]   ;;  %s2611_s9 = inlined_call_operand.vmem [shape: bf16[32,128], index: 9, kind: input, shape index: {}]   ;;  %s2612_s2 = inlined_call_operand.vmem [shape: f32[1,128], index: 2, kind: input, shape index: {}]   ;;  %s2613_s12 = inlined_call_operand.vmem [shape: f32[32,128], index: 12, kind: output, shape index: {1}]   ;;  %s2614_s10 = inlined_call_operand.vmem [shape: bf16[128,32], index: 10, kind: input, shape index: {}]   ;;  %s2615_s6 = inlined_call_operand.vmem [shape: f32[1,128], index: 6, kind: input, shape index: {}]   ;;  %s2616_s11 = inlined_call_operand.vmem [shape: f32[32,32], index: 11, kind: output, shape index: {0}]  }
   0x1   :  { %v41_v0 = vld [vmem:[%s2604_s0] sm:$0xff]  ;;  %v43_v1 = vld [vmem:[%s2604_s0 + $0x10] sm:$0xff]  ;;  %v42_v2 = vld [vmem:[%s2604_s0 + $0x8] sm:$0xff]  ;;  %200 = vmatprep.mubr.bf16.mxu1 %v1960_v32  ;;  %s1963_s28 = smov 32   ;;  %s1965_s14 = smov 88   ;;  %vm1219_vm2 = vcmask 130048  }
   0x2   :  { %v55_v3 = vsel %vm54_vm0, %v41_v0, 0.0  ;;  %v61_v4 = vsel %vm54_vm0, %v43_v1, 0.0  ;;  %v44_v5 = vld [vmem:[%s2604_s0 + $0x18] sm:$0xff]  ;;  %v58_v6 = vsel %vm54_vm0, %v42_v2, 0.0  ;;  %v1873_v28 = vld [vmem:[%s2605_s7 + $0x4] ss:$8 sps:$4 sm:$0xff]  }
   0x3   :  { %56 = vadd.xlane.f32.xlu0 %v55_v3  ;;  %62 = vadd.xlane.f32.xlu1 %v61_v4  ;;  %v64_v7 = vsel %vm54_vm0, %v44_v5, 0.0  ;;  %v1875_v29 = vld [vmem:[%s2605_s7] ss:$8 sps:$4 sm:$0xff]   ;;  %v1876_v30 = vld [vmem:[%s2605_s7 + $0x14] ss:$8 sps:$4 sm:$0xff]   ;;  %v2134_v48 = vshrl.u32 %v108_v42, 7 }
   0x4   :  { %168 = vmatprep.subr.bf16.mxu1 %v1873_v28  ;;  %v1878_v31 = vld [vmem:[%s2605_s7 + $0x10] ss:$8 sps:$4 sm:$0xff]   ;;  %v2093_v33 = vld [vmem:[%s2606_s3 + $0x8] sm:$0xff]  ;;  %v2098_v34 = vld [vmem:[%s2606_s3] sm:$0xff]  ;;  %s1966_s15 = smov 56   ;;  %s1967_s16 = smov 112  }
   0x5   :  { %169 = vmatpush1.bf16.msra.mxu1 %v1875_v29  ;;  %v2107_v35 = vld [vmem:[%s2606_s3 + $0x10] sm:$0xff]  ;;  %v2120_v36 = vld [vmem:[%s2606_s3 + $0x18] sm:$0xff]  ;;  %v110_v51 = vsub.s32 0, %v2134_v48  ;;  %v49_v52 = vld [vmem:[%s2607_s4] sm:$0xff]  ;;  %v118_v56 = vsub.s32 1, %v2134_v48  ;;  %s1968_s17 = smov 80  }
   0x6   :  { %170 = vmatprep.subr.bf16.mxu1 %v1876_v30  ;;  %s1970_s27 = smov 104   ;;  %s1971_s3 = smov 72   ;;  %vm1224_vm3 = vcmask 195584   ;;  %vm1142_vm4 = vcmask 523264   ;;  %vm1147_vm5 = vcmask 785408  }
   0x7   :  { %59 = vadd.xlane.f32.xlu0 %v58_v6  ;;  %65 = vadd.xlane.f32.xlu1 %v64_v7  ;;  %v111_v55 = vrot.slane %v49_v52, %v110_v51  ;;  %v119_v60 = vrot.slane %v49_v52, %v118_v56  ;;  %s1972_s29 = smov 40   ;;  %s1973_s30 = smov 8  }
   0x8   :  { %s1974_s13 = smov 16  }
   0x9   :  { %171 = vmatpush1.bf16.msra.mxu1 %v1878_v31 }
  0x90   :  { %v57_v8 = vpop.xlane.xlu0 %56  ;;  %v63_v9 = vpop.xlane.xlu1 %62 }
  0x91   :  { %v68_v10 = vmul.f32 0.03125, %v57_v8  ;;  %v70_v11 = vmul.f32 0.03125, %v63_v9 }
  0x93   :  { %v2057_v12 = vsub.f32 %v41_v0, %v68_v10  ;;  %v2059_v13 = vsub.f32 %v43_v1, %v70_v11  ;;  %v130_v11 = vld [vmem:[%s2608_s5] sm:$0x3]  ;;  %s1964_s5 = smov 120  }
  0x94   :  { %v60_v14 = vpop.xlane.xlu0 %59  ;;  %v66_v15 = vpop.xlane.xlu1 %65 }
  0x95   :  { %v69_v16 = vmul.f32 0.03125, %v60_v14  ;;  %v71_v17 = vmul.f32 0.03125, %v66_v15  ;;  %v76_v18 = vmul.f32 %v2057_v12, %v2057_v12  ;;  %v78_v19 = vmul.f32 %v2059_v13, %v2059_v13 }
  0x96   :  { %v139_v14 = vrot.slane %v130_v11, %v118_v56 }
  0x97   :  { %v2065_v20 = vsub.f32 %v42_v2, %v69_v16  ;;  %v2067_v21 = vsub.f32 %v44_v5, %v71_v17  ;;  %v80_v22 = vsel %vm54_vm0, %v76_v18, 0.0  ;;  %v86_v23 = vsel %vm54_vm0, %v78_v19, 0.0 }
  0x98   :  { %81 = vadd.xlane.f32.xlu0 %v80_v22 }
  0x99   :  { %v77_v24 = vmul.f32 %v2065_v20, %v2065_v20  ;;  %v79_v25 = vmul.f32 %v2067_v21, %v2067_v21 }
  0x9b   :  { %v83_v26 = vsel %vm54_vm0, %v77_v24, 0.0  ;;  %v89_v27 = vsel %vm54_vm0, %v79_v25, 0.0 }
  0x9c   :  { %87 = vadd.xlane.f32.xlu0 %v86_v23  ;;  %84 = vadd.xlane.f32.xlu1 %v83_v26 }
  0xa0   :  { %90 = vadd.xlane.f32.xlu1 %v89_v27 }
  0xb1   :  { %231 = vrot.lane.b32.xlu1 %v2093_v33, %s1961_s23 }
  0xb2   :  { %229 = vrot.lane.b32.xlu0 %v2098_v34, %s1961_s23 }
  0xb5   :  { %281 = vrot.lane.b32.xlu1 %v2098_v34, %s1962_s25 }
  0xb6   :  { %285 = vrot.lane.b32.xlu0 %v2107_v35, %s1962_s25 }
  0xb9   :  { %283 = vrot.lane.b32.xlu1 %v2093_v33, %s1962_s25 }
  0xba   :  { %233 = vrot.lane.b32.xlu0 %v2107_v35, %s1961_s23 }
  0xbd   :  { %287 = vrot.lane.b32.xlu1 %v2120_v36, %s1962_s25 }
  0xbe   :  { %265 = vrot.lane.b32.xlu0 %v2098_v34, %s1963_s28 }
  0xc1   :  { %235 = vrot.lane.b32.xlu1 %v2120_v36, %s1961_s23 }
  0xc2   :  { %269 = vrot.lane.b32.xlu0 %v2107_v35, %s1963_s28 }
  0xc5   :  { %267 = vrot.lane.b32.xlu1 %v2093_v33, %s1963_s28 }
  0xc9   :  { %271 = vrot.lane.b32.xlu1 %v2120_v36, %s1963_s28 }
 0x125   :  { %v82_v37 = vpop.xlane.xlu0 %81 }
 0x126   :  { %v92_v38 = vmul.f32 0.03125, %v82_v37 }
 0x128   :  { %v96_v39 = vadd.f32 1e-05, %v92_v38 }
 0x129   :  { %v85_v40 = vpop.xlane.xlu1 %84  ;;  %v88_v41 = vpop.xlane.xlu0 %87 }
 0x12a   :  { %1891 = vrsqrt.f32 %v96_v39  ;;  %v93_v43 = vmul.f32 0.03125, %v85_v40  ;;  %v94_v44 = vmul.f32 0.03125, %v88_v41 }
 0x12c   :  { %v97_v45 = vadd.f32 1e-05, %v93_v43  ;;  %v98_v46 = vadd.f32 1e-05, %v94_v44 }
 0x12d   :  { %v91_v47 = vpop.xlane.xlu1 %90  ;;  %v230_v18 = vpop.permute.xlu0 %229 }
 0x12e   :  { %1893 = vrsqrt.f32 %v97_v45  ;;  %v95_v49 = vmul.f32 0.03125, %v91_v47 }
 0x12f   :  { %1895 = vrsqrt.f32 %v98_v46 }
 0x130   :  { %v99_v50 = vadd.f32 1e-05, %v95_v49 }
 0x131   :  { %v232_v10 = vpop.permute.xlu1 %231  ;;  %v286_v30 = vpop.permute.xlu0 %285 }
 0x132   :  { %1897 = vrsqrt.f32 %v99_v50 }
 0x134   :  { %v1892_v53 = vpop.eup %1891 }
 0x135   :  { %v104_v54 = vmul.f32 %v1892_v53, %v2057_v12  ;;  %v135_v12 = vrot.slane %v130_v11, %v110_v51  ;;  %v234_v47 = vpop.permute.xlu0 %233 }
 0x137   :  { %v112_v59 = vmul.f32 %v111_v55, %v104_v54 }
 0x138   :  { %v1894_v57 = vpop.eup %1893 }
 0x139   :  { %v105_v58 = vmul.f32 %v1894_v57, %v2065_v20  ;;  %v1896_v61 = vpop.eup %1895  ;;  %v120_v2 = vadd.f32 %v119_v60, %v112_v59  ;;  %v266_v52 = vpop.permute.xlu0 %265 }
 0x13a   :  { %v106_v0 = vmul.f32 %v1896_v61, %v2059_v13  ;;  %v282_v13 = vpop.permute.xlu1 %281 }
 0x13b   :  { %v113_v62 = vmul.f32 %v111_v55, %v105_v58 }
 0x13c   :  { %v1898_v63 = vpop.eup %1897  ;;  %v114_v6 = vmul.f32 %v111_v55, %v106_v0 }
 0x13d   :  { %v107_v1 = vmul.f32 %v1898_v63, %v2067_v21  ;;  %v121_v3 = vadd.f32 %v119_v60, %v113_v62  ;;  %v270_v54 = vpop.permute.xlu0 %269 }
 0x13e   :  { %v122_v8 = vadd.f32 %v119_v60, %v114_v6  ;;  %v284_v24 = vpop.permute.xlu1 %283 }
 0x13f   :  { %v124_v4 = vpack.c.bf16 %v121_v3, %v120_v2  ;;  %v115_v5 = vmul.f32 %v111_v55, %v107_v1 }
 0x141   :  { %1633 = vmatmul.mubr.msk.bf16.vlgmr.msra.gmra.mrb[0].mxu1 %vm54_vm0, %v124_v4  ;;  %v123_v7 = vadd.f32 %v119_v60, %v115_v5 }
 0x142   :  { %210 = vmatprep.mubr.bf16.mxu1 %v1960_v32  ;;  %v288_v40 = vpop.permute.xlu1 %287 }
 0x143   :  { %v125_v9 = vpack.c.bf16 %v123_v7, %v122_v8 }
 0x146   :  { %v236_v50 = vpop.permute.xlu1 %235 }
 0x149   :  { %1634 = vmatmul.mubr.msk.bf16.gmra.mrb[4].mxu1 %vm54_vm0, %v125_v9 }
 0x14a   :  { %v268_v53 = vpop.permute.xlu1 %267 }
 0x14e   :  { %v272_v55 = vpop.permute.xlu1 %271 }
 0x214   :  { %v202_v15 = vpop.f32.mrb[0].mxu1 }
 0x215   :  { %v203_v16 = vadd.f32 %v202_v15, %v135_v12  ;;  %v204_v17 = vpop.f32.mrb[1].mxu1 }
 0x216   :  { %v206_v19 = vpop.f32.mrb[2].mxu1  ;;  %v205_v20 = vadd.f32 %v204_v17, %v139_v14 }
 0x217   :  { %v207_v21 = vadd.f32 %v206_v19, %v135_v12  ;;  %v208_v22 = vpop.f32.mrb[3].mxu1  ;;  %v241_v23 = vmul.f32 %v230_v18, %v203_v16  ;;  %v221_v57 = vmul.f32 %v203_v16, %v2098_v34  ;;  %v277_v63 = vmul.f32 %v266_v52, %v203_v16 }
 0x218   :  { %v209_v25 = vadd.f32 %v208_v22, %v139_v14  ;;  %v293_v28 = vmul.f32 %v282_v13, %v205_v20 }
 0x219   :  { %249 = vrot.lane.b32.xlu0 %v241_v23, %s1963_s28  ;;  %v242_v26 = vmul.f32 %v232_v10, %v207_v21  ;;  %v2152_v27 = vpack.c.bf16 %v207_v21, %v203_v16  ;;  %v222_v58 = vmul.f32 %v207_v21, %v2093_v33  ;;  %v278_v0 = vmul.f32 %v268_v53, %v207_v21 }
 0x21a   :  { %v294_v31 = vmul.f32 %v284_v24, %v209_v25 }
 0x21b   :  { %251 = vrot.lane.b32.xlu1 %v242_v26, %s1963_s28 }
 0x21c   :  { %v212_v29 = vpop.f32.mrb[4].mxu1 }
 0x21d   :  { %v213_v32 = vadd.f32 %v212_v29, %v135_v12  ;;  %v214_v37 = vpop.f32.mrb[5].mxu1  ;;  %301 = vrot.lane.b32.xlu0 %v293_v28, %s1963_s28 }
 0x21e   :  { %v215_v38 = vadd.f32 %v214_v37, %v139_v14  ;;  %v216_v39 = vpop.f32.mrb[6].mxu1  ;;  %v2225_v37 = vld [vmem:[%s2609_s1 + $0x18] sm:$0xff] }
 0x21f   :  { %v217_v41 = vadd.f32 %v216_v39, %v135_v12  ;;  %303 = vrot.lane.b32.xlu1 %v294_v31, %s1963_s28  ;;  %v218_v42 = vpop.f32.mrb[7].mxu1  ;;  %v243_v49 = vmul.f32 %v234_v47, %v213_v32  ;;  %v279_v6 = vmul.f32 %v270_v54, %v213_v32  ;;  %v223_v13 = vmul.f32 %v213_v32, %v2107_v35  ;;  %v2220_v31 = vld [vmem:[%s2609_s1] sm:$0xff] }
 0x220   :  { %v295_v43 = vmul.f32 %v286_v30, %v215_v38  ;;  %v219_v44 = vadd.f32 %v218_v42, %v139_v14  ;;  %v2215_v30 = vld [vmem:[%s2609_s1 + $0x10] sm:$0xff] }
 0x221   :  { %v2157_v45 = vpack.c.bf16 %v217_v41, %v213_v32  ;;  %v244_v51 = vmul.f32 %v236_v50, %v217_v41  ;;  %v280_v7 = vmul.f32 %v272_v55, %v217_v41  ;;  %v224_v14 = vmul.f32 %v217_v41, %v2120_v36 }
 0x222   :  { %v296_v46 = vmul.f32 %v288_v40, %v219_v44  ;;  %305 = vrot.lane.b32.xlu0 %v295_v43, %s1963_s28  ;;  %v2231_v40 = vld [vmem:[%s2609_s1 + $0x8] sm:$0xff]  ;;  %s1969_s1 = smov 48  }
 0x224   :  { %307 = vrot.lane.b32.xlu1 %v296_v46, %s1963_s28 }
 0x226   :  { %253 = vrot.lane.b32.xlu0 %v243_v49, %s1963_s28 }
 0x228   :  { %255 = vrot.lane.b32.xlu1 %v244_v51, %s1963_s28 }
 0x28b   :  { %v250_v56 = vpop.permute.xlu0 %249 }
 0x28c   :  { %v261_v60 = vadd.f32 %v250_v56, %v221_v57 }
 0x28d   :  { %v252_v59 = vpop.permute.xlu1 %251 }
 0x28e   :  { %v262_v61 = vadd.f32 %v252_v59, %v222_v58 }
 0x28f   :  { %v302_v62 = vpop.permute.xlu0 %301 }
 0x290   :  { %v2165_v1 = vpack.c.bf16 %v262_v61, %v261_v60  ;;  %v313_v3 = vadd.f32 %v302_v62, %v277_v63 }
 0x291   :  { %v304_v2 = vpop.permute.xlu1 %303 }
 0x292   :  { %v314_v4 = vadd.f32 %v304_v2, %v278_v0  ;;  %521 = vrot.lane.b32.xlu1 %v2165_v1, %s1964_s5  ;;  %1819 = vmatprep.subr.msk.bf16.mxu1 %vm329_vm1, %v2165_v1  ;;  %v337_v33 = vsel %vm329_vm1, %v2165_v1, 0 }
 0x293   :  { %1720 = vmatpush3.bf16.xpose.msra.mxu1 %v337_v33 }
 0x294   :  { %v2172_v34 = vpack.c.bf16 %v314_v4, %v313_v3  ;;  %v306_v5 = vpop.permute.xlu0 %305 }
 0x295   :  { %v315_v9 = vadd.f32 %v306_v5, %v279_v6 }
 0x296   :  { %v308_v8 = vpop.permute.xlu1 %307  ;;  %325 = vrot.lane.b32.xlu0 %v2172_v34, %s1962_s25 }
 0x297   :  { %v316_v10 = vadd.f32 %v308_v8, %v280_v7 }
 0x298   :  { %v254_v11 = vpop.permute.xlu0 %253 }
 0x299   :  { %v2176_v12 = vpack.c.bf16 %v316_v10, %v315_v9  ;;  %v263_v16 = vadd.f32 %v254_v11, %v223_v13 }
 0x29a   :  { %v256_v15 = vpop.permute.xlu1 %255 }
 0x29b   :  { %v264_v17 = vadd.f32 %v256_v15, %v224_v14  ;;  %327 = vrot.lane.b32.xlu0 %v2176_v12, %s1962_s25 }
 0x29d   :  { %v2182_v18 = vpack.c.bf16 %v264_v17, %v263_v16 }
 0x29f   :  { %515 = vrot.lane.b32.xlu0 %v2172_v34, %s1965_s14  ;;  %523 = vrot.lane.b32.xlu1 %v2182_v18, %s1964_s5  ;;  %v340_v19 = vsel %vm329_vm1, %v2182_v18, 0 }
 0x2a0   :  { %1820 = vmatprep.subr.msk.bf16.mxu1 %vm329_vm1, %v2182_v18 }
 0x2a1   :  { %1722 = vmatpush3.bf16.xpose.msra.mxu1 %v340_v19 }
 0x2a3   :  { %454 = vrot.lane.b32.xlu0 %v2152_v27, %s1961_s23  ;;  %517 = vrot.lane.b32.xlu1 %v2176_v12, %s1965_s14 }
 0x2a7   :  { %647 = vrot.lane.b32.xlu0 %v2152_v27, %s1966_s15  ;;  %456 = vrot.lane.b32.xlu1 %v2157_v45, %s1961_s23 }
 0x2ab   :  { %712 = vrot.lane.b32.xlu0 %v2165_v1, %s1967_s16  ;;  %649 = vrot.lane.b32.xlu1 %v2157_v45, %s1966_s15 }
 0x2af   :  { %714 = vrot.lane.b32.xlu0 %v2182_v18, %s1967_s16 }
 0x2b3   :  { %708 = vrot.lane.b32.xlu0 %v2172_v34, %s1968_s17 }
 0x2b7   :  { %710 = vrot.lane.b32.xlu0 %v2176_v12, %s1968_s17  ;;  %s1975_s17 = smov 24  }
 0x304   :  { %v522_v35 = vpop.permute.xlu1 %521 }
 0x305   :  { %1821 = vmatprep.subr.msk.bf16.mxu1 %vm329_vm1, %v522_v35  ;;  %v532_v21 = vsel %vm329_vm1, %v522_v35, 0 }
 0x308   :  { %v326_v36 = vpop.permute.xlu0 %325 }
 0x309   :  { %1723 = vmatprep.mubr.msk.bf16.mxu1 %vm329_vm1, %v326_v36 }
 0x30d   :  { %v328_v20 = vpop.permute.xlu0 %327 }
 0x30e   :  { %1724 = vmatmul.mubr.msk.bf16.vlgmr.msra.gmra.mrb[8].mxu1 %vm329_vm1, %v328_v20 }
 0x30f   :  { %1736 = vmatpush3.bf16.xpose.msra.mxu1 %v532_v21 }
 0x311   :  { %v524_v22 = vpop.permute.xlu1 %523  ;;  %v516_v23 = vpop.permute.xlu0 %515 }
 0x312   :  { %1822 = vmatprep.subr.msk.bf16.mxu1 %vm329_vm1, %v524_v22  ;;  %1739 = vmatprep.mubr.msk.bf16.mxu1 %vm329_vm1, %v516_v23  ;;  %v535_v26 = vsel %vm329_vm1, %v524_v22, 0 }
 0x315   :  { %v518_v24 = vpop.permute.xlu1 %517  ;;  %v455_v25 = vpop.permute.xlu0 %454 }
 0x316   :  { %1727 = vmatprep.subr.bf16.mxu0 %v455_v25 }
 0x317   :  { %1738 = vmatpush3.bf16.xpose.msra.mxu1 %v535_v26  ;;  %1728 = vmatpush3.bf16.msra.mxu0 %v455_v25 }
 0x319   :  { %v457_v28 = vpop.permute.xlu1 %456  ;;  %v2208_v29 = vpop.permute.xlu0 %647 }
 0x31a   :  { %1729 = vmatprep.subr.bf16.mxu0 %v457_v28 }
 0x31b   :  { %1730 = vmatpush3.bf16.msra.mxu0 %v457_v28 }
 0x31c   :  { %1743 = vmatprep.subr.bf16.mxu0 %v2208_v29 }
 0x31e   :  { %1740 = vmatmul.mubr.msk.bf16.vlgmr.msra.gmra.mrb[12].mxu1 %vm329_vm1, %v518_v24 }
 0x3e1   :  { %v1725_v32 = vpop.f32.mrb[8].mxu1 }
 0x3e2   :  { %v385_v38 = vadd.f32 %v1725_v32, %v2215_v30  ;;  %v376_v39 = vpop.f32.mrb[9].mxu1 }
 0x3e3   :  { %v377_v41 = vadd.f32 %v376_v39, %v2220_v31  ;;  %v1726_v42 = vpop.f32.mrb[10].mxu1 }
 0x3e4   :  { %v388_v43 = vadd.f32 %v1726_v42, %v2225_v37  ;;  %v379_v44 = vpop.f32.mrb[11].mxu1  ;;  %v393_v47 = vsel %vm54_vm0, %v385_v38, -inf }
 0x3e5   :  { %v380_v46 = vadd.f32 %v379_v44, %v2231_v40  ;;  %v391_v50 = vsel %vm54_vm0, %v377_v41, -inf }
 0x3e6   :  { %v394_v49 = vsel %vm54_vm0, %v388_v43, -inf }
 0x3e7   :  { %v396_v51 = vmax.f32 %v393_v47, %v394_v49  ;;  %v392_v52 = vsel %vm54_vm0, %v380_v46, -inf }
 0x3e8   :  { %v395_v53 = vmax.f32 %v391_v50, %v392_v52 }
 0x3ea   :  { %v397_v54 = vmax.f32 %v395_v53, %v396_v51 }
 0x3ec   :  { %v398_v55 = vrot.slane %v397_v54, 4 }
 0x3ee   :  { %v399_v56 = vmax.f32 %v397_v54, %v398_v55 }
 0x3f0   :  { %v400_v57 = vrot.slane %v399_v56, 2 }
 0x3f1   :  { %v1741_v58 = vpop.f32.mrb[12].mxu1 }
 0x3f2   :  { %v401_v59 = vmax.f32 %v399_v56, %v400_v57  ;;  %v580_v60 = vadd.f32 %v1741_v58, %v2215_v30  ;;  %v571_v61 = vpop.f32.mrb[13].mxu1 }
 0x3f3   :  { %v572_v62 = vadd.f32 %v571_v61, %v2220_v31  ;;  %v1742_v63 = vpop.f32.mrb[14].mxu1 }
 0x3f4   :  { %v402_v0 = vrot.slane %v401_v59, 1  ;;  %v583_v2 = vadd.f32 %v1742_v63, %v2225_v37  ;;  %v574_v3 = vpop.f32.mrb[15].mxu1  ;;  %v588_v5 = vsel %vm54_vm0, %v580_v60, -inf }
 0x3f5   :  { %v575_v4 = vadd.f32 %v574_v3, %v2231_v40  ;;  %v586_v7 = vsel %vm54_vm0, %v572_v62, -inf }
 0x3f6   :  { %v403_v33 = vmax.f32 %v401_v59, %v402_v0  ;;  %v589_v6 = vsel %vm54_vm0, %v583_v2, -inf }
 0x3f7   :  { %v591_v8 = vmax.f32 %v588_v5, %v589_v6  ;;  %v587_v9 = vsel %vm54_vm0, %v575_v4, -inf }
 0x3f8   :  { %v405_v10 = vsub.f32 %v380_v46, %v403_v33  ;;  %v406_v11 = vsub.f32 %v385_v38, %v403_v33  ;;  %v407_v13 = vsub.f32 %v388_v43, %v403_v33  ;;  %v590_v14 = vmax.f32 %v586_v7, %v587_v9 }
 0x3f9   :  { %v404_v15 = vsub.f32 %v377_v41, %v403_v33 }
 0x3fa   :  { %v410_v16 = vmul.f32 1.442695, %v405_v10  ;;  %v592_v17 = vmax.f32 %v590_v14, %v591_v8  ;;  %v412_v35 = vmul.f32 1.442695, %v406_v11  ;;  %v414_v20 = vmul.f32 1.442695, %v407_v13 }
 0x3fb   :  { %v408_v19 = vmul.f32 1.442695, %v404_v15 }
 0x3fc   :  { %1899 = vpow2.f32 %v410_v16  ;;  %v593_v36 = vrot.slane %v592_v17, 4 }
 0x3fd   :  { %1901 = vpow2.f32 %v408_v19 }
 0x3fe   :  { %v594_v21 = vmax.f32 %v592_v17, %v593_v36  ;;  %1903 = vpow2.f32 %v412_v35 }
 0x3ff   :  { %1905 = vpow2.f32 %v414_v20 }
 0x400   :  { %v595_v22 = vrot.slane %v594_v21, 2 }
 0x402   :  { %v596_v23 = vmax.f32 %v594_v21, %v595_v22 }
 0x404   :  { %v597_v24 = vrot.slane %v596_v23, 1 }
 0x406   :  { %v1900_v25 = vpop.eup %1899  ;;  %v598_v26 = vmax.f32 %v596_v23, %v597_v24 }
 0x407   :  { %v1902_v39 = vpop.eup %1901  ;;  %v417_v41 = vsel %vm54_vm0, %v1900_v25, 0.0 }
 0x408   :  { %v600_v28 = vsub.f32 %v575_v4, %v598_v26  ;;  %v601_v32 = vsub.f32 %v580_v60, %v598_v26  ;;  %v602_v38 = vsub.f32 %v583_v2, %v598_v26  ;;  %v599_v42 = vsub.f32 %v572_v62, %v598_v26  ;;  %v1904_v43 = vpop.eup %1903 }
 0x409   :  { %v416_v47 = vsel %vm54_vm0, %v1902_v39, 0.0  ;;  %v1906_v50 = vpop.eup %1905  ;;  %v419_v53 = vsel %vm54_vm0, %v1904_v43, 0.0 }
 0x40a   :  { %v605_v44 = vmul.f32 1.442695, %v600_v28  ;;  %v607_v46 = vmul.f32 1.442695, %v601_v32  ;;  %v603_v49 = vmul.f32 1.442695, %v599_v42  ;;  %v418_v51 = vadd.f32 %v417_v41, %v416_v47  ;;  %v650_v41 = vpop.permute.xlu1 %649 }
 0x40b   :  { %v609_v52 = vmul.f32 1.442695, %v602_v38  ;;  %v421_v55 = vsel %vm54_vm0, %v1906_v50, 0.0 }
 0x40c   :  { %1907 = vpow2.f32 %v605_v44  ;;  %v420_v54 = vadd.f32 %v419_v53, %v418_v51 }
 0x40d   :  { %1909 = vpow2.f32 %v607_v46 }
 0x40e   :  { %1911 = vpow2.f32 %v603_v49  ;;  %v422_v56 = vadd.f32 %v421_v55, %v420_v54 }
 0x40f   :  { %1913 = vpow2.f32 %v609_v52 }
 0x410   :  { %v423_v57 = vrot.slane %v422_v56, 4 }
 0x412   :  { %v424_v58 = vadd.f32 %v423_v57, %v422_v56 }
 0x414   :  { %v425_v60 = vrot.slane %v424_v58, 2 }
 0x416   :  { %v1908_v59 = vpop.eup %1907  ;;  %v426_v63 = vadd.f32 %v425_v60, %v424_v58 }
 0x417   :  { %v1910_v61 = vpop.eup %1909  ;;  %v612_v62 = vsel %vm54_vm0, %v1908_v59, 0.0 }
 0x418   :  { %v1912_v0 = vpop.eup %1911  ;;  %v427_v2 = vrot.slane %v426_v63, 1  ;;  %v614_v6 = vsel %vm54_vm0, %v1910_v61, 0.0 }
 0x419   :  { %v611_v3 = vsel %vm54_vm0, %v1912_v0, 0.0  ;;  %v1914_v4 = vpop.eup %1913 }
 0x41a   :  { %v613_v33 = vadd.f32 %v612_v62, %v611_v3  ;;  %v428_v5 = vadd.f32 %v427_v2, %v426_v63  ;;  %v616_v8 = vsel %vm54_vm0, %v1914_v4, 0.0 }
 0x41c   :  { %v615_v7 = vadd.f32 %v614_v6, %v613_v33  ;;  %1915 = vrcp.f32 %v428_v5 }
 0x41e   :  { %v617_v9 = vadd.f32 %v616_v8, %v615_v7 }
 0x420   :  { %v618_v10 = vrot.slane %v617_v9, 4 }
 0x422   :  { %v619_v11 = vadd.f32 %v618_v10, %v617_v9 }
 0x424   :  { %v620_v13 = vrot.slane %v619_v11, 2 }
 0x426   :  { %v621_v14 = vadd.f32 %v620_v13, %v619_v11  ;;  %v1916_v15 = vpop.eup %1915 }
 0x427   :  { %v2256_v16 = vmul.f32 %v1916_v15, %v1902_v39  ;;  %v2258_v17 = vmul.f32 %v1916_v15, %v1900_v25  ;;  %v2260_v19 = vmul.f32 %v1916_v15, %v1904_v43  ;;  %v2262_v35 = vmul.f32 %v1916_v15, %v1906_v50  ;;  %v713_v39 = vpop.permute.xlu0 %712 }
 0x428   :  { %v622_v36 = vrot.slane %v621_v14, 1 }
 0x429   :  { %v434_v20 = vpack.c.bf16 %v2258_v17, %v2256_v16  ;;  %v435_v22 = vpack.c.bf16 %v2262_v35, %v2260_v19 }
 0x42a   :  { %v623_v21 = vadd.f32 %v622_v36, %v621_v14 }
 0x42b   :  { %436 = vxpose.xlu1.c.b16.start [1/2] (short) (narrow) %v434_v20, 32  ;;  %v715_v42 = vpop.permute.xlu0 %714 }
 0x42c   :  { %1917 = vrcp.f32 %v623_v21  ;;  %v726_v47 = vsel %vm329_vm1, %v715_v42, 0 }
 0x42f   :  { %437 = vxpose.xlu1.c.b16.end [2/2] (short) (narrow) %v435_v22, 32  ;;  %v709_v44 = vpop.permute.xlu0 %708 }
 0x433   :  { %838 = vrot.lane.b32.xlu1 %v2152_v27, %s1969_s1 }
 0x436   :  { %v1918_v23 = vpop.eup %1917 }
 0x437   :  { %840 = vrot.lane.b32.xlu1 %v2157_v45, %s1969_s1  ;;  %v2270_v24 = vmul.f32 %v1918_v23, %v1912_v0  ;;  %v2272_v25 = vmul.f32 %v1918_v23, %v1908_v59  ;;  %v2274_v26 = vmul.f32 %v1918_v23, %v1910_v61  ;;  %v2276_v28 = vmul.f32 %v1918_v23, %v1914_v4 }
 0x439   :  { %v629_v32 = vpack.c.bf16 %v2272_v25, %v2270_v24  ;;  %v630_v38 = vpack.c.bf16 %v2276_v28, %v2274_v26 }
 0x43b   :  { %631 = vxpose.xlu0.c.b16.start [1/2] (short) (narrow) %v629_v32, 32  ;;  %905 = vrot.lane.b32.xlu1 %v2182_v18, %s1970_s27 }
 0x43f   :  { %632 = vxpose.xlu0.c.b16.end [2/2] (short) (narrow) %v630_v38, 32  ;;  %899 = vrot.lane.b32.xlu1 %v2172_v34, %s1971_s3 }
 0x443   :  { %901 = vrot.lane.b32.xlu1 %v2176_v12, %s1971_s3  ;;  %v723_v12 = vsel %vm329_vm1, %v713_v39, 0 }
 0x447   :  { %1029 = vrot.lane.b32.xlu1 %v2152_v27, %s1972_s29  ;;  %v711_v27 = vpop.permute.xlu0 %710 }
 0x448   :  { %903 = vrot.lane.b32.xlu0 %v2165_v1, %s1970_s27 }
 0x44b   :  { %1031 = vrot.lane.b32.xlu1 %v2157_v45, %s1972_s29 }
 0x491   :  { %v444_v18 = vpop.trf.xlu1 }
 0x492   :  { %1731 = vmatprep.mubr.msk.bf16.mxu0 %vm54_vm0, %v444_v18 }
 0x495   :  { %v445_v43 = vpop.trf.xlu1 }
 0x496   :  { %1732 = vmatmul.mubr.msk.bf16.vlgmr.msra.gmra.mrb[0].mxu0 %vm54_vm0, %v445_v43 }
 0x497   :  { %1744 = vmatpush3.bf16.msra.mxu0 %v2208_v29 }
 0x498   :  { %1745 = vmatprep.subr.bf16.mxu0 %v650_v41 }
 0x49b   :  { %1746 = vmatpush3.bf16.msra.mxu0 %v650_v41 }
 0x49c   :  { %1823 = vmatprep.subr.msk.bf16.mxu0 %vm329_vm1, %v713_v39 }
 0x4a1   :  { %v639_v1 = vpop.trf.xlu0 }
 0x4a2   :  { %1747 = vmatprep.mubr.msk.bf16.mxu0 %vm54_vm0, %v639_v1 }
 0x4a5   :  { %v640_v45 = vpop.trf.xlu0  ;;  %v839_v34 = vpop.permute.xlu1 %838 }
 0x4a6   :  { %1748 = vmatmul.mubr.msk.bf16.vlgmr.msra.gmra.mrb[4].mxu0 %vm54_vm0, %v640_v45  ;;  %1759 = vmatprep.subr.bf16.mxu1 %v839_v34 }
 0x4a7   :  { %1752 = vmatpush3.bf16.xpose.msra.mxu0 %v723_v12  ;;  %1755 = vmatprep.mubr.msk.bf16.mxu0 %vm329_vm1, %v709_v44 }
 0x4a8   :  { %1824 = vmatprep.subr.msk.bf16.mxu0 %vm329_vm1, %v715_v42  ;;  %1760 = vmatpush3.bf16.msra.mxu1 %v839_v34 }
 0x4a9   :  { %v841_v29 = vpop.permute.xlu1 %840 }
 0x4aa   :  { %1761 = vmatprep.subr.bf16.mxu1 %v841_v29 }
 0x4ac   :  { %1762 = vmatpush3.bf16.msra.mxu1 %v841_v29 }
 0x4ad   :  { %v2297_v46 = vpop.permute.xlu1 %905 }
 0x4af   :  { %1754 = vmatpush3.bf16.xpose.msra.mxu0 %v726_v47 }
 0x4b1   :  { %v2300_v49 = vpop.permute.xlu1 %899 }
 0x4b5   :  { %v2302_v50 = vpop.permute.xlu1 %901 }
 0x4b6   :  { %1756 = vmatmul.mubr.msk.bf16.vlgmr.msra.gmra.mrb[8].mxu0 %vm329_vm1, %v711_v27 }
 0x4b9   :  { %v1030_v51 = vpop.permute.xlu1 %1029 }
 0x4ba   :  { %v2305_v52 = vpop.permute.xlu0 %903  ;;  %1775 = vmatprep.subr.bf16.mxu0 %v1030_v51 }
 0x4bb   :  { %1825 = vmatprep.subr.msk.bf16.mxu1 %vm329_vm1, %v2305_v52  ;;  %1776 = vmatpush3.bf16.msra.mxu0 %v1030_v51 }
 0x4bd   :  { %v1032_v53 = vpop.permute.xlu1 %1031 }
 0x4be   :  { %1777 = vmatprep.subr.bf16.mxu0 %v1032_v53 }
 0x4bf   :  { %1778 = vmatpush3.bf16.msra.mxu0 %v1032_v53 }
 0x569   :  { %v2309_v54 = vpop.f32.mrb[0].mxu0 }
 0x56a   :  { %v2311_v55 = vpop.f32.mrb[1].mxu0 }
 0x56b   :  { %v2313_v56 = vpop.f32.mrb[2].mxu0 }
 0x56c   :  { %v2315_v57 = vpop.f32.mrb[3].mxu0 }
 0x579   :  { %v2317_v58 = vpop.f32.mrb[4].mxu0 }
 0x57a   :  { %v2319_v59 = vpop.f32.mrb[5].mxu0 }
 0x57b   :  { %v2321_v60 = vpop.f32.mrb[6].mxu0 }
 0x57c   :  { %v1848_v61 = vpack.i.bf16 %v2321_v60, %v2317_v58  ;;  %v2325_v62 = vpop.f32.mrb[7].mxu0  ;;  %v917_v58 = vsel %vm329_vm1, %v2297_v46, 0 }
 0x57d   :  { %v1843_v63 = vpack.i.bf16 %v2325_v62, %v2319_v59 }
 0x589   :  { %v1757_v0 = vpop.f32.mrb[8].mxu0 }
 0x58a   :  { %v771_v2 = vadd.f32 %v1757_v0, %v2215_v30  ;;  %v762_v3 = vpop.f32.mrb[9].mxu0 }
 0x58b   :  { %v763_v4 = vadd.f32 %v762_v3, %v2220_v31  ;;  %v1758_v33 = vpop.f32.mrb[10].mxu0 }
 0x58c   :  { %v774_v5 = vadd.f32 %v1758_v33, %v2225_v37  ;;  %v765_v6 = vpop.f32.mrb[11].mxu0  ;;  %v779_v8 = vsel %vm54_vm0, %v771_v2, -inf }
 0x58d   :  { %v766_v7 = vadd.f32 %v765_v6, %v2231_v40  ;;  %v777_v10 = vsel %vm54_vm0, %v763_v4, -inf }
 0x58e   :  { %v780_v9 = vsel %vm54_vm0, %v774_v5, -inf }
 0x58f   :  { %v782_v11 = vmax.f32 %v779_v8, %v780_v9  ;;  %v778_v13 = vsel %vm54_vm0, %v766_v7, -inf }
 0x590   :  { %v781_v14 = vmax.f32 %v777_v10, %v778_v13 }
 0x592   :  { %v783_v15 = vmax.f32 %v781_v14, %v782_v11 }
 0x594   :  { %v784_v36 = vrot.slane %v783_v15, 4 }
 0x596   :  { %v785_v20 = vmax.f32 %v783_v15, %v784_v36 }
 0x598   :  { %v786_v21 = vrot.slane %v785_v20, 2 }
 0x59a   :  { %v787_v22 = vmax.f32 %v785_v20, %v786_v21  ;;  %v914_v20 = vsel %vm329_vm1, %v2305_v52, 0 }
 0x59c   :  { %v788_v23 = vrot.slane %v787_v22, 1 }
 0x59e   :  { %v789_v32 = vmax.f32 %v787_v22, %v788_v23 }
 0x5a0   :  { %v790_v38 = vsub.f32 %v763_v4, %v789_v32  ;;  %v791_v39 = vsub.f32 %v766_v7, %v789_v32  ;;  %v792_v41 = vsub.f32 %v771_v2, %v789_v32  ;;  %v793_v42 = vsub.f32 %v774_v5, %v789_v32 }
 0x5a2   :  { %v794_v18 = vmul.f32 1.442695, %v790_v38  ;;  %v796_v43 = vmul.f32 1.442695, %v791_v39  ;;  %v798_v44 = vmul.f32 1.442695, %v792_v41 }
 0x5a3   :  { %v800_v27 = vmul.f32 1.442695, %v793_v42 }
 0x5a4   :  { %1919 = vpow2.f32 %v794_v18 }
 0x5a5   :  { %1921 = vpow2.f32 %v796_v43 }
 0x5a6   :  { %1923 = vpow2.f32 %v798_v44 }
 0x5a7   :  { %1925 = vpow2.f32 %v800_v27 }
 0x5ae   :  { %v1920_v1 = vpop.eup %1919 }
 0x5af   :  { %v1922_v45 = vpop.eup %1921  ;;  %v802_v34 = vsel %vm54_vm0, %v1920_v1, 0.0 }
 0x5b0   :  { %v1924_v12 = vpop.eup %1923  ;;  %v803_v29 = vsel %vm54_vm0, %v1922_v45, 0.0 }
 0x5b1   :  { %v1926_v47 = vpop.eup %1925  ;;  %v804_v51 = vadd.f32 %v803_v29, %v802_v34  ;;  %v805_v53 = vsel %vm54_vm0, %v1924_v12, 0.0 }
 0x5b2   :  { %v807_v62 = vsel %vm54_vm0, %v1926_v47, 0.0 }
 0x5b3   :  { %v806_v59 = vadd.f32 %v805_v53, %v804_v51 }
 0x5b5   :  { %v808_v0 = vadd.f32 %v807_v62, %v806_v59 }
 0x5b7   :  { %v809_v2 = vrot.slane %v808_v0, 4 }
 0x5b9   :  { %v810_v3 = vadd.f32 %v809_v2, %v808_v0 }
 0x5bb   :  { %v811_v4 = vrot.slane %v810_v3, 2 }
 0x5bd   :  { %v812_v33 = vadd.f32 %v811_v4, %v810_v3 }
 0x5bf   :  { %v813_v5 = vrot.slane %v812_v33, 1 }
 0x5c1   :  { %v814_v6 = vadd.f32 %v813_v5, %v812_v33 }
 0x5c3   :  { %1927 = vrcp.f32 %v814_v6 }
 0x5cd   :  { %v1928_v7 = vpop.eup %1927 }
 0x5ce   :  { %v2341_v8 = vmul.f32 %v1928_v7, %v1920_v1  ;;  %v2343_v9 = vmul.f32 %v1928_v7, %v1922_v45  ;;  %v2345_v10 = vmul.f32 %v1928_v7, %v1924_v12  ;;  %v2347_v11 = vmul.f32 %v1928_v7, %v1926_v47 }
 0x5d0   :  { %v820_v13 = vpack.c.bf16 %v2343_v9, %v2341_v8  ;;  %v821_v14 = vpack.c.bf16 %v2347_v11, %v2345_v10 }
 0x5d2   :  { %822 = vxpose.xlu0.c.b16.start [1/2] (short) (narrow) %v820_v13, 32 }
 0x5d6   :  { %823 = vxpose.xlu0.c.b16.end [2/2] (short) (narrow) %v821_v14, 32 }
 0x5df   :  { %1844 = vrot.lane.b32.xlu0 %v1843_v63, %s1973_s30 }
 0x5e3   :  { %1849 = vrot.lane.b32.xlu0 %v1848_v61, %s1973_s30 }
 0x638   :  { %v830_v15 = vpop.trf.xlu0 }
 0x639   :  { %1763 = vmatprep.mubr.msk.bf16.mxu1 %vm54_vm0, %v830_v15 }
 0x63c   :  { %v831_v36 = vpop.trf.xlu0 }
 0x63d   :  { %1764 = vmatmul.mubr.msk.bf16.vlgmr.msra.gmra.mrb[16].mxu1 %vm54_vm0, %v831_v36 }
 0x63e   :  { %1768 = vmatpush3.bf16.xpose.msra.mxu1 %v914_v20  ;;  %1771 = vmatprep.mubr.msk.bf16.mxu1 %vm329_vm1, %v2300_v49 }
 0x63f   :  { %1826 = vmatprep.subr.msk.bf16.mxu1 %vm329_vm1, %v2297_v46 }
 0x646   :  { %1770 = vmatpush3.bf16.xpose.msra.mxu1 %v917_v58 }
 0x64d   :  { %1772 = vmatmul.mubr.msk.bf16.vlgmr.msra.gmra.mrb[20].mxu1 %vm329_vm1, %v2302_v50 }
 0x710   :  { %v2368_v60 = vpop.f32.mrb[16].mxu1 }
 0x711   :  { %v884_v61 = vpop.f32.mrb[17].mxu1 }
 0x712   :  { %v2370_v52 = vpop.f32.mrb[18].mxu1 }
 0x713   :  { %v1858_v63 = vpack.i.bf16 %v2370_v52, %v2368_v60  ;;  %v887_v21 = vpop.f32.mrb[19].mxu1 }
 0x714   :  { %v1853_v49 = vpack.i.bf16 %v887_v21, %v884_v61 }
 0x716   :  { %1854 = vrot.lane.b32.xlu0 %v1853_v49, %s1974_s13 }
 0x720   :  { %v1773_v22 = vpop.f32.mrb[20].mxu1 }
 0x721   :  { %v962_v46 = vadd.f32 %v1773_v22, %v2215_v30  ;;  %v953_v23 = vpop.f32.mrb[21].mxu1 }
 0x722   :  { %v954_v32 = vadd.f32 %v953_v23, %v2220_v31  ;;  %v1774_v50 = vpop.f32.mrb[22].mxu1 }
 0x723   :  { %v965_v38 = vadd.f32 %v1774_v50, %v2225_v37  ;;  %v956_v39 = vpop.f32.mrb[23].mxu1  ;;  %v970_v42 = vsel %vm54_vm0, %v962_v46, -inf }
 0x724   :  { %v957_v41 = vadd.f32 %v956_v39, %v2231_v40  ;;  %v968_v43 = vsel %vm54_vm0, %v954_v32, -inf }
 0x725   :  { %v971_v18 = vsel %vm54_vm0, %v965_v38, -inf }
 0x726   :  { %v973_v44 = vmax.f32 %v970_v42, %v971_v18  ;;  %v969_v27 = vsel %vm54_vm0, %v957_v41, -inf }
 0x727   :  { %v972_v1 = vmax.f32 %v968_v43, %v969_v27  ;;  %v1880_v27 = vld [vmem:[%s2610_s8 + $0x8] sm:$0xff]  }
 0x729   :  { %v974_v30 = vmax.f32 %v972_v1, %v973_v44  ;;  %v1879_v44 = vld [vmem:[%s2610_s8] sm:$0xff]  }
 0x72a   :  { %1783 = vmatprep.subr.bf16.mxu0 %v1879_v44 }
 0x72b   :  { %v975_v45 = vrot.slane %v974_v30, 4 }
 0x72d   :  { %v976_v34 = vmax.f32 %v974_v30, %v975_v45 }
 0x72f   :  { %v977_v31 = vrot.slane %v976_v34, 2 }
 0x731   :  { %v978_v12 = vmax.f32 %v976_v34, %v977_v31  ;;  %v1845_v34 = vpop.permute.xlu0 %1844 }
 0x733   :  { %v979_v29 = vrot.slane %v978_v12, 1 }
 0x735   :  { %v980_v37 = vmax.f32 %v978_v12, %v979_v29  ;;  %v1850_v31 = vpop.permute.xlu0 %1849  ;;  %v1847_v29 = vunpack.i.h.bf16 %v1845_v34 }
 0x737   :  { %v981_v47 = vsub.f32 %v954_v32, %v980_v37  ;;  %v982_v51 = vsub.f32 %v957_v41, %v980_v37  ;;  %v983_v40 = vsub.f32 %v962_v46, %v980_v37  ;;  %v984_v53 = vsub.f32 %v965_v38, %v980_v37 }
 0x738   :  { %v1846_v37 = vunpack.i.l.bf16 %v1845_v34  ;;  %v1958_v34 = vld [vmem:[%s2604_s0 + $0x8] sm:$0xff] }
 0x739   :  { %v985_v59 = vmul.f32 1.442695, %v981_v47  ;;  %v987_v62 = vmul.f32 1.442695, %v982_v51  ;;  %v989_v0 = vmul.f32 1.442695, %v983_v40  ;;  %v1852_v51 = vunpack.i.h.bf16 %v1850_v31 }
 0x73a   :  { %v991_v2 = vmul.f32 1.442695, %v984_v53  ;;  %v1851_v40 = vunpack.i.l.bf16 %v1850_v31 }
 0x73b   :  { %1929 = vpow2.f32 %v985_v59 }
 0x73c   :  { %1931 = vpow2.f32 %v987_v62 }
 0x73d   :  { %1933 = vpow2.f32 %v989_v0 }
 0x73e   :  { %1935 = vpow2.f32 %v991_v2  ;;  %v1216_v2 = vsel %vm329_vm1, %v2315_v57, %v1847_v29 }
 0x745   :  { %v1930_v3 = vpop.eup %1929 }
 0x746   :  { %v1932_v4 = vpop.eup %1931  ;;  %v993_v33 = vsel %vm54_vm0, %v1930_v3, 0.0 }
 0x747   :  { %v1934_v5 = vpop.eup %1933  ;;  %v994_v6 = vsel %vm54_vm0, %v1932_v4, 0.0 }
 0x748   :  { %v1936_v7 = vpop.eup %1935  ;;  %v995_v13 = vadd.f32 %v994_v6, %v993_v33  ;;  %v996_v14 = vsel %vm54_vm0, %v1934_v5, 0.0  ;;  %v1218_v33 = vsel %vm329_vm1, %v2313_v56, %v1852_v51 }
 0x749   :  { %v998_v36 = vsel %vm54_vm0, %v1936_v7, 0.0 }
 0x74a   :  { %v997_v15 = vadd.f32 %v996_v14, %v995_v13 }
 0x74c   :  { %v999_v20 = vadd.f32 %v998_v36, %v997_v15 }
 0x74e   :  { %v1000_v58 = vrot.slane %v999_v20, 4 }
 0x750   :  { %v1001_v61 = vadd.f32 %v1000_v58, %v999_v20 }
 0x752   :  { %v1002_v21 = vrot.slane %v1001_v61, 2 }
 0x754   :  { %v1003_v49 = vadd.f32 %v1002_v21, %v1001_v61 }
 0x756   :  { %v1004_v22 = vrot.slane %v1003_v49, 1 }
 0x758   :  { %v1005_v46 = vadd.f32 %v1004_v22, %v1003_v49 }
 0x75a   :  { %1937 = vrcp.f32 %v1005_v46  ;;  %v2429_v46 = vld [vmem:[%s2607_s4] sm:$0xff] }
 0x764   :  { %v1938_v23 = vpop.eup %1937 }
 0x765   :  { %v2387_v32 = vmul.f32 %v1938_v23, %v1930_v3  ;;  %v2389_v50 = vmul.f32 %v1938_v23, %v1932_v4  ;;  %v2391_v38 = vmul.f32 %v1938_v23, %v1934_v5  ;;  %v2393_v39 = vmul.f32 %v1938_v23, %v1936_v7 }
 0x766   :  { %v1215_v3 = vsel %vm329_vm1, %v2311_v55, %v1846_v37  ;;  %v1217_v5 = vsel %vm329_vm1, %v2309_v54, %v1851_v40  ;;  %v1237_v54 = vsub.s32 4, %v2134_v48  ;;  %v1959_v37 = vld [vmem:[%s2604_s0 + $0x18] sm:$0xff] }
 0x767   :  { %v1011_v41 = vpack.c.bf16 %v2389_v50, %v2387_v32  ;;  %v1012_v42 = vpack.c.bf16 %v2393_v39, %v2391_v38 }
 0x768   :  { %v1238_v23 = vrot.slane %v2429_v46, %v1237_v54 }
 0x769   :  { %1013 = vxpose.xlu1.c.b16.start [1/2] (short) (narrow) %v1011_v41, 32 }
 0x76d   :  { %1014 = vxpose.xlu1.c.b16.end [2/2] (short) (narrow) %v1012_v42, 32 }
 0x771   :  { %1859 = vrot.lane.b32.xlu1 %v1858_v63, %s1974_s13 }
 0x788   :  { %v1855_v47 = vpop.permute.xlu0 %1854 }
 0x789   :  { %v1857_v62 = vunpack.i.h.bf16 %v1855_v47  ;;  %v1856_v0 = vunpack.i.l.bf16 %v1855_v47 }
 0x78b   :  { %v1220_v57 = vsel %vm1219_vm2, %v1215_v3, %v1856_v0  ;;  %v1221_v58 = vsel %vm1219_vm2, %v1216_v2, %v1857_v62 }
 0x7cf   :  { %v1021_v18 = vpop.trf.xlu1 }
 0x7d0   :  { %1779 = vmatprep.mubr.msk.bf16.mxu0 %vm54_vm0, %v1021_v18 }
 0x7d3   :  { %v1022_v43 = vpop.trf.xlu1 }
 0x7d4   :  { %1780 = vmatmul.mubr.msk.bf16.vlgmr.msra.gmra.mrb[12].mxu0 %vm54_vm0, %v1022_v43 }
 0x7d5   :  { %1784 = vmatpush3.bf16.msra.mxu0 %v1879_v44 }
 0x7d6   :  { %1785 = vmatprep.subr.bf16.mxu0 %v1880_v27 }
 0x7d9   :  { %1786 = vmatpush3.bf16.msra.mxu0 %v1880_v27 }
 0x7e3   :  { %v1860_v12 = vpop.permute.xlu1 %1859 }
 0x7e4   :  { %v1862_v53 = vunpack.i.h.bf16 %v1860_v12  ;;  %v1861_v59 = vunpack.i.l.bf16 %v1860_v12 }
 0x7e6   :  { %v1222_v14 = vsel %vm1219_vm2, %v1217_v5, %v1861_v59  ;;  %v1223_v15 = vsel %vm1219_vm2, %v1218_v33, %v1862_v53 }
 0x8a7   :  { %v1781_v60 = vpop.f32.mrb[12].mxu0 }
 0x8a8   :  { %v1075_v52 = vpop.f32.mrb[13].mxu0 }
 0x8a9   :  { %v1782_v63 = vpop.f32.mrb[14].mxu0 }
 0x8aa   :  { %v1868_v1 = vpack.i.bf16 %v1782_v63, %v1781_v60  ;;  %v1078_v30 = vpop.f32.mrb[15].mxu0  ;;  %v1956_v60 = vld [vmem:[%s2604_s0] sm:$0xff] }
 0x8ab   :  { %v1863_v45 = vpack.i.bf16 %v1078_v30, %v1075_v52 }
 0x8ac   :  { %1869 = vrot.lane.b32.xlu1 %v1868_v1, %s1975_s17  ;;  %v1957_v1 = vld [vmem:[%s2604_s0 + $0x10] sm:$0xff] }
 0x8ad   :  { %1864 = vrot.lane.b32.xlu0 %v1863_v45, %s1975_s17 }
 0x91e   :  { %v1870_v4 = vpop.permute.xlu1 %1869 }
 0x91f   :  { %v1872_v6 = vunpack.i.h.bf16 %v1870_v4  ;;  %v1871_v7 = vunpack.i.l.bf16 %v1870_v4  ;;  %v1865_v13 = vpop.permute.xlu0 %1864 }
 0x920   :  { %v1867_v36 = vunpack.i.h.bf16 %v1865_v13  ;;  %v1866_v20 = vunpack.i.l.bf16 %v1865_v13 }
 0x921   :  { %v1227_v55 = vsel %vm1224_vm3, %v1222_v14, %v1871_v7  ;;  %v1228_v61 = vsel %vm1224_vm3, %v1223_v15, %v1872_v6 }
 0x922   :  { %v1230_v21 = vpack.c.bf16 %v1228_v61, %v1227_v55  ;;  %v1225_v49 = vsel %vm1224_vm3, %v1220_v57, %v1866_v20  ;;  %v1226_v56 = vsel %vm1224_vm3, %v1221_v58, %v1867_v36 }
 0x923   :  { %v1229_v22 = vpack.c.bf16 %v1226_v56, %v1225_v49 }
 0x925   :  { %1787 = vmatprep.mubr.msk.bf16.mxu0 %vm54_vm0, %v1229_v22 }
 0x926   :  { %1788 = vmatmul.mubr.msk.bf16.vlgmr.msra.gmra.mrb[16].mxu0 %vm54_vm0, %v1230_v21 }
 0x9f9   :  { %v1789_v41 = vpop.f32.mrb[16].mxu0 }
 0x9fa   :  { %v1291_v42 = vpop.f32.mrb[17].mxu0  ;;  %v1300_v18 = vadd.f32 %v1789_v41, %v1238_v23 }
 0x9fb   :  { %v1292_v43 = vadd.f32 %v1291_v42, %v1238_v23  ;;  %v1790_v44 = vpop.f32.mrb[18].mxu0  ;;  %v1372_v42 = vsub.s32 3, %v2134_v48 }
 0x9fc   :  { %v1294_v27 = vpop.f32.mrb[19].mxu0  ;;  %v2440_v30 = vadd.f32 %v1957_v1, %v1300_v18  ;;  %v1303_v45 = vadd.f32 %v1790_v44, %v1238_v23 }
 0x9fd   :  { %v2435_v52 = vadd.f32 %v1956_v60, %v1292_v43  ;;  %v1295_v63 = vadd.f32 %v1294_v27, %v1238_v23 }
 0x9fe   :  { %v2454_v47 = vadd.f32 %v1959_v37, %v1303_v45  ;;  %v1316_v51 = vsel %vm54_vm0, %v2440_v30, 0.0  ;;  %v1373_v45 = vrot.slane %v2429_v46, %v1372_v42 }
 0x9ff   :  { %v2445_v31 = vadd.f32 %v1958_v34, %v1295_v63  ;;  %v1310_v12 = vsel %vm54_vm0, %v2435_v52, 0.0 }
 0xa00   :  { %1311 = vadd.xlane.f32.xlu0 %v1310_v12  ;;  %v1319_v40 = vsel %vm54_vm0, %v2454_v47, 0.0 }
 0xa01   :  { %v1313_v29 = vsel %vm54_vm0, %v2445_v31, 0.0 }
 0xa02   :  { %1314 = vadd.xlane.f32.xlu1 %v1313_v29  ;;  %v1651_v29 = vld [vmem:[%s2612_s2] ss:$0 sm:$0xff] }
 0xa04   :  { %1317 = vadd.xlane.f32.xlu0 %v1316_v51 }
 0xa08   :  { %1320 = vadd.xlane.f32.xlu0 %v1319_v40 }
 0xa8d   :  { %v1312_v53 = vpop.xlane.xlu0 %1311 }
 0xa8e   :  { %v1322_v59 = vmul.f32 0.03125, %v1312_v53 }
 0xa8f   :  { %v1315_v62 = vpop.xlane.xlu1 %1314 }
 0xa90   :  { %v2461_v0 = vsub.f32 %v2435_v52, %v1322_v59  ;;  %v1323_v2 = vmul.f32 0.03125, %v1315_v62 }
 0xa91   :  { %v1318_v3 = vpop.xlane.xlu0 %1317 }
 0xa92   :  { %v2464_v4 = vsub.f32 %v2445_v31, %v1323_v2  ;;  %v1324_v33 = vmul.f32 0.03125, %v1318_v3  ;;  %v1330_v5 = vmul.f32 %v2461_v0, %v2461_v0 }
 0xa94   :  { %v2469_v6 = vsub.f32 %v2440_v30, %v1324_v33  ;;  %v1334_v7 = vsel %vm54_vm0, %v1330_v5, 0.0  ;;  %v1331_v13 = vmul.f32 %v2464_v4, %v2464_v4 }
 0xa95   :  { %1335 = vadd.xlane.f32.xlu0 %v1334_v7  ;;  %v1321_v14 = vpop.xlane.xlu0 %1320 }
 0xa96   :  { %v1325_v15 = vmul.f32 0.03125, %v1321_v14  ;;  %v1337_v36 = vsel %vm54_vm0, %v1331_v13, 0.0  ;;  %v1332_v20 = vmul.f32 %v2469_v6, %v2469_v6 }
 0xa97   :  { %1338 = vadd.xlane.f32.xlu1 %v1337_v36 }
 0xa98   :  { %v2478_v57 = vsub.f32 %v2454_v47, %v1325_v15  ;;  %v1340_v58 = vsel %vm54_vm0, %v1332_v20, 0.0 }
 0xa99   :  { %1341 = vadd.xlane.f32.xlu0 %v1340_v58 }
 0xa9a   :  { %v1333_v55 = vmul.f32 %v2478_v57, %v2478_v57 }
 0xa9c   :  { %v1343_v61 = vsel %vm54_vm0, %v1333_v55, 0.0 }
 0xa9d   :  { %1344 = vadd.xlane.f32.xlu1 %v1343_v61 }
 0xaae   :  { %1096 = vrot.lane.b32.xlu1 %v2272_v25, %s1963_s28  ;;  %v1881_v25 = vld [vmem:[%s2611_s9] sm:$0xff]  }
 0xaaf   :  { %1094 = vrot.lane.b32.xlu0 %v2270_v24, %s1963_s28  ;;  %1791 = vmatprep.subr.bf16.mxu1 %v1881_v25  ;;  %v1882_v24 = vld [vmem:[%s2611_s9 + $0x8] sm:$0xff]  }
 0xab0   :  { %1792 = vmatpush3.bf16.msra.mxu1 %v1881_v25 }
 0xab1   :  { %1793 = vmatprep.subr.bf16.mxu1 %v1882_v24 }
 0xab2   :  { %1098 = vrot.lane.b32.xlu1 %v2274_v26, %s1963_s28 }
 0xab3   :  { %1110 = vrot.lane.b32.xlu0 %v2341_v8, %s1961_s23 }
 0xab4   :  { %1794 = vmatpush3.bf16.msra.mxu1 %v1882_v24 }
 0xab6   :  { %1100 = vrot.lane.b32.xlu1 %v2276_v28, %s1963_s28 }
 0xab7   :  { %1114 = vrot.lane.b32.xlu0 %v2345_v10, %s1961_s23 }
 0xaba   :  { %1112 = vrot.lane.b32.xlu1 %v2343_v9, %s1961_s23 }
 0xabb   :  { %1126 = vrot.lane.b32.xlu0 %v2387_v32, %s1962_s25 }
 0xabe   :  { %1116 = vrot.lane.b32.xlu1 %v2347_v11, %s1961_s23 }
 0xabf   :  { %1130 = vrot.lane.b32.xlu0 %v2391_v38, %s1962_s25 }
 0xac2   :  { %1128 = vrot.lane.b32.xlu1 %v2389_v50, %s1962_s25  ;;  %v1364_v50 = vsub.s32 2, %v2134_v48 }
 0xac4   :  { %v1365_v41 = vrot.slane %v2429_v46, %v1364_v50  ;;  %v1890_v50 = vld [vmem:[%s2614_s10 + $0x38] sm:$0xff]  }
 0xac6   :  { %1132 = vrot.lane.b32.xlu1 %v2393_v39, %s1962_s25 }
 0xb22   :  { %v1336_v26 = vpop.xlane.xlu0 %1335 }
 0xb23   :  { %v1346_v28 = vmul.f32 0.03125, %v1336_v26 }
 0xb24   :  { %v1339_v8 = vpop.xlane.xlu1 %1338 }
 0xb25   :  { %v1350_v9 = vadd.f32 1e-05, %v1346_v28  ;;  %v1347_v10 = vmul.f32 0.03125, %v1339_v8 }
 0xb26   :  { %v1342_v11 = vpop.xlane.xlu0 %1341 }
 0xb27   :  { %1939 = vrsqrt.f32 %v1350_v9  ;;  %v1351_v32 = vadd.f32 1e-05, %v1347_v10  ;;  %v1348_v21 = vmul.f32 0.03125, %v1342_v11 }
 0xb29   :  { %1941 = vrsqrt.f32 %v1351_v32  ;;  %v1352_v49 = vadd.f32 1e-05, %v1348_v21  ;;  %v1883_v32 = vld [vmem:[%s2614_s10] sm:$0xff]   ;;  %v1885_v21 = vld [vmem:[%s2614_s10 + $0x10] sm:$0xff]  }
 0xb2a   :  { %v1345_v38 = vpop.xlane.xlu1 %1344  ;;  %v1095_v56 = vpop.permute.xlu0 %1094  ;;  %1799 = vmatprep.subr.bf16.mxu0 %v1883_v32 }
 0xb2b   :  { %1943 = vrsqrt.f32 %v1352_v49  ;;  %v1349_v22 = vmul.f32 0.03125, %v1345_v38  ;;  %v1138_v12 = vsel %vm54_vm0, %v2256_v16, %v1095_v56  ;;  %1800 = vmatpush3.bf16.msra.mxu0 %v1883_v32  ;;  %v1886_v49 = vld [vmem:[%s2614_s10 + $0x18] sm:$0xff]   ;;  %v1887_v38 = vld [vmem:[%s2614_s10 + $0x20] sm:$0xff]   ;;  %v1888_v56 = vld [vmem:[%s2614_s10 + $0x28] sm:$0xff]  }
 0xb2d   :  { %v1353_v54 = vadd.f32 1e-05, %v1349_v22  ;;  %v1889_v22 = vld [vmem:[%s2614_s10 + $0x30] sm:$0xff]  }
 0xb2e   :  { %v1097_v23 = vpop.permute.xlu1 %1096  ;;  %v1111_v39 = vpop.permute.xlu0 %1110 }
 0xb2f   :  { %1945 = vrsqrt.f32 %v1353_v54  ;;  %v1143_v51 = vsel %vm1142_vm4, %v1138_v12, %v1111_v39  ;;  %v1139_v61 = vsel %vm54_vm0, %v2258_v17, %v1097_v23  ;;  %v1656_v54 = vld [vmem:[%s2615_s6] ss:$0 sm:$0xff] }
 0xb31   :  { %v1940_v18 = vpop.eup %1939 }
 0xb32   :  { %v1358_v43 = vmul.f32 %v1940_v18, %v2461_v0  ;;  %v1099_v44 = vpop.permute.xlu1 %1098  ;;  %v1115_v27 = vpop.permute.xlu0 %1114 }
 0xb33   :  { %v1942_v60 = vpop.eup %1941  ;;  %v1140_v62 = vsel %vm54_vm0, %v2260_v19, %v1099_v44 }
 0xb34   :  { %v1359_v63 = vmul.f32 %v1942_v60, %v2464_v4  ;;  %v1366_v1 = vmul.f32 %v1365_v41, %v1358_v43  ;;  %v1145_v7 = vsel %vm1142_vm4, %v1140_v62, %v1115_v27 }
 0xb35   :  { %v1944_v34 = vpop.eup %1943 }
 0xb36   :  { %v1360_v37 = vmul.f32 %v1944_v34, %v2469_v6  ;;  %v1101_v40 = vpop.permute.xlu1 %1100  ;;  %v1127_v53 = vpop.permute.xlu0 %1126  ;;  %v1367_v59 = vmul.f32 %v1365_v41, %v1359_v63  ;;  %v1374_v3 = vadd.f32 %v1373_v45, %v1366_v1 }
 0xb37   :  { %v1148_v0 = vsel %vm1147_vm5, %v1143_v51, %v1127_v53  ;;  %v1141_v8 = vsel %vm54_vm0, %v2262_v35, %v1101_v40  ;;  %v1884_v35 = vld [vmem:[%s2614_s10 + $0x8] sm:$0xff]  }
 0xb38   :  { %v1159_v2 = vmul.f32 %v1651_v29, %v1148_v0  ;;  %v1375_v4 = vadd.f32 %v1373_v45, %v1367_v59  ;;  %v1368_v33 = vmul.f32 %v1365_v41, %v1360_v37  ;;  %1801 = vmatprep.subr.bf16.mxu0 %v1884_v35 }
 0xb39   :  { %v1946_v16 = vpop.eup %1945  ;;  %1802 = vmatpush3.bf16.msra.mxu0 %v1884_v35 }
 0xb3a   :  { %v1361_v5 = vmul.f32 %v1946_v16, %v2478_v57  ;;  %1163 = vst [vmem:[%s2613_s12] sm:$0xff] %v1159_v2  ;;  %v1113_v6 = vpop.permute.xlu1 %1112  ;;  %v1131_v13 = vpop.permute.xlu0 %1130  ;;  %v1378_v14 = vpack.c.bf16 %v1375_v4, %v1374_v3  ;;  %v1376_v57 = vadd.f32 %v1373_v45, %v1368_v33  ;;  %1803 = vmatprep.subr.bf16.mxu0 %v1885_v21 }
 0xb3b   :  { %v1150_v19 = vsel %vm1147_vm5, %v1145_v7, %v1131_v13  ;;  %v1144_v25 = vsel %vm1142_vm4, %v1139_v61, %v1113_v6 }
 0xb3c   :  { %v1369_v15 = vmul.f32 %v1365_v41, %v1361_v5  ;;  %v1161_v36 = vmul.f32 %v1651_v29, %v1150_v19  ;;  %1795 = vmatprep.mubr.msk.bf16.mxu1 %vm54_vm0, %v1378_v14 }
 0xb3d   :  { %1804 = vmatpush3.bf16.msra.mxu0 %v1885_v21 }
 0xb3e   :  { %1165 = vst [vmem:[%s2613_s12 + $0x10] sm:$0xff] %v1161_v36  ;;  %v1117_v20 = vpop.permute.xlu1 %1116  ;;  %v1377_v58 = vadd.f32 %v1373_v45, %v1369_v15  ;;  %1805 = vmatprep.subr.bf16.mxu0 %v1886_v49 }
 0xb3f   :  { %v1146_v9 = vsel %vm1142_vm4, %v1141_v8, %v1117_v20 }
 0xb40   :  { %v1379_v55 = vpack.c.bf16 %v1377_v58, %v1376_v57 }
 0xb41   :  { %1806 = vmatpush3.bf16.msra.mxu0 %v1886_v49 }
 0xb42   :  { %v1129_v24 = vpop.permute.xlu1 %1128  ;;  %1796 = vmatmul.mubr.msk.bf16.vlgmr.msra.gmra.mrb[24].mxu1 %vm54_vm0, %v1379_v55  ;;  %1807 = vmatprep.subr.bf16.mxu0 %v1887_v38 }
 0xb43   :  { %v1149_v26 = vsel %vm1147_vm5, %v1144_v25, %v1129_v24 }
 0xb44   :  { %v1160_v28 = vmul.f32 %v1651_v29, %v1149_v26 }
 0xb45   :  { %1808 = vmatpush3.bf16.msra.mxu0 %v1887_v38 }
 0xb46   :  { %1164 = vst [vmem:[%s2613_s12 + $0x8] sm:$0xff] %v1160_v28  ;;  %v1133_v10 = vpop.permute.xlu1 %1132  ;;  %1809 = vmatprep.subr.bf16.mxu0 %v1888_v56 }
 0xb47   :  { %v1151_v17 = vsel %vm1147_vm5, %v1146_v9, %v1133_v10  ;;  %v1514_v10 = vsub.s32 5, %v2134_v48 }
 0xb48   :  { %v1162_v11 = vmul.f32 %v1651_v29, %v1151_v17 }
 0xb49   :  { %1810 = vmatpush3.bf16.msra.mxu0 %v1888_v56  ;;  %v1515_v17 = vrot.slane %v2429_v46, %v1514_v10 }
 0xb4a   :  { %1166 = vst [vmem:[%s2613_s12 + $0x18] sm:$0xff] %v1162_v11  ;;  %1811 = vmatprep.subr.bf16.mxu0 %v1889_v22 }
 0xb4d   :  { %1812 = vmatpush3.bf16.msra.mxu0 %v1889_v22 }
 0xb4e   :  { %1813 = vmatprep.subr.bf16.mxu0 %v1890_v50 }
 0xb51   :  { %1814 = vmatpush3.bf16.msra.mxu0 %v1890_v50 }
 0xc15   :  { %v1797_v23 = vpop.f32.mrb[24].mxu1 }
 0xc16   :  { %v1452_v39 = vadd.f32 %v1797_v23, %v1656_v54  ;;  %v1443_v41 = vpop.f32.mrb[25].mxu1 }
 0xc17   :  { %v1444_v42 = vadd.f32 %v1656_v54, %v1443_v41  ;;  %v1798_v18 = vpop.f32.mrb[26].mxu1 }
 0xc18   :  { %v1460_v43 = vmul.f32 %v1452_v39, %v1452_v39  ;;  %v1455_v44 = vadd.f32 %v1798_v18, %v1656_v54  ;;  %v1446_v27 = vpop.f32.mrb[27].mxu1 }
 0xc19   :  { %v1458_v60 = vmul.f32 %v1444_v42, %v1444_v42  ;;  %v1447_v63 = vadd.f32 %v1656_v54, %v1446_v27 }
 0xc1a   :  { %v1464_v1 = vmul.f32 %v1460_v43, %v1452_v39  ;;  %v1461_v45 = vmul.f32 %v1455_v44, %v1455_v44 }
 0xc1b   :  { %v1462_v34 = vmul.f32 %v1458_v60, %v1444_v42  ;;  %v1459_v12 = vmul.f32 %v1447_v63, %v1447_v63 }
 0xc1c   :  { %v1468_v29 = vmul.f32 0.044715, %v1464_v1  ;;  %v1465_v37 = vmul.f32 %v1461_v45, %v1455_v44 }
 0xc1d   :  { %v1466_v51 = vmul.f32 0.044715, %v1462_v34  ;;  %v1463_v40 = vmul.f32 %v1459_v12, %v1447_v63 }
 0xc1e   :  { %v1472_v53 = vadd.f32 %v1468_v29, %v1452_v39  ;;  %v1469_v59 = vmul.f32 0.044715, %v1465_v37 }
 0xc1f   :  { %v1470_v62 = vadd.f32 %v1466_v51, %v1444_v42  ;;  %v1467_v0 = vmul.f32 0.044715, %v1463_v40 }
 0xc20   :  { %v1476_v2 = vmul.f32 0.7978846, %v1472_v53  ;;  %v1473_v3 = vadd.f32 %v1469_v59, %v1455_v44 }
 0xc21   :  { %v1474_v4 = vmul.f32 0.7978846, %v1470_v62  ;;  %v1471_v16 = vadd.f32 %v1467_v0, %v1447_v63 }
 0xc22   :  { %1947 = vtanh.f32 %v1476_v2  ;;  %v1477_v33 = vmul.f32 0.7978846, %v1473_v3 }
 0xc23   :  { %1949 = vtanh.f32 %v1474_v4  ;;  %v1475_v5 = vmul.f32 0.7978846, %v1471_v16 }
 0xc24   :  { %1951 = vtanh.f32 %v1477_v33 }
 0xc25   :  { %1953 = vtanh.f32 %v1475_v5 }
 0xc2c   :  { %v1948_v7 = vpop.eup %1947 }
 0xc2d   :  { %v1950_v6 = vpop.eup %1949  ;;  %v1484_v13 = vadd.f32 1.0, %v1948_v7 }
 0xc2e   :  { %v1952_v14 = vpop.eup %1951  ;;  %v1482_v19 = vadd.f32 1.0, %v1950_v6 }
 0xc2f   :  { %v1954_v15 = vpop.eup %1953  ;;  %v1488_v36 = vmul.f32 0.5, %v1484_v13  ;;  %v1485_v20 = vadd.f32 1.0, %v1952_v14 }
 0xc30   :  { %v1483_v57 = vadd.f32 1.0, %v1954_v15  ;;  %v1486_v58 = vmul.f32 0.5, %v1482_v19 }
 0xc31   :  { %v1489_v55 = vmul.f32 0.5, %v1485_v20  ;;  %v1492_v25 = vmul.f32 %v1488_v36, %v1452_v39 }
 0xc32   :  { %v1487_v61 = vmul.f32 0.5, %v1483_v57  ;;  %v1490_v26 = vmul.f32 %v1486_v58, %v1444_v42 }
 0xc33   :  { %v1493_v24 = vmul.f32 %v1489_v55, %v1455_v44 }
 0xc34   :  { %v1491_v28 = vmul.f32 %v1487_v61, %v1447_v63 }
 0xc35   :  { %v1495_v8 = vpack.c.bf16 %v1493_v24, %v1492_v25 }
 0xc36   :  { %v1494_v9 = vpack.c.bf16 %v1491_v28, %v1490_v26 }
 0xc38   :  { %1815 = vmatprep.mubr.bf16.mxu0 %v1494_v9 }
 0xc39   :  { %1816 = vmatmul.mubr.bf16.vlgmr.msra.gmra.mrb[20].mxu0 %v1495_v8 }
 0xd0c   :  { %v1817_v11 = vpop.f32.mrb[20].mxu0 }
 0xd0d   :  { %v1607_v32 = vadd.f32 %v1817_v11, %v1515_v17  ;;  %v1598_v35 = vpop.f32.mrb[21].mxu0 }
 0xd0e   :  { %v1599_v21 = vadd.f32 %v1598_v35, %v1515_v17  ;;  %v1818_v49 = vpop.f32.mrb[22].mxu0 }
 0xd0f   :  { %v1615_v38 = vadd.f32 %v1607_v32, %v2440_v30  ;;  %v1610_v56 = vadd.f32 %v1818_v49, %v1515_v17  ;;  %v1601_v22 = vpop.f32.mrb[23].mxu0 }
 0xd10   :  { %v1613_v50 = vadd.f32 %v1599_v21, %v2435_v52  ;;  %v1602_v54 = vadd.f32 %v1601_v22, %v1515_v17 }
 0xd11   :  { %1619 = vst.msk [vmem:[%s2616_s11 + $0x10] sm:$0xff] %vm54_vm0, %v1615_v38  ;;  %v1616_v48 = vadd.f32 %v1610_v56, %v2454_v47 }
 0xd12   :  { %1617 = vst.msk [vmem:[%s2616_s11] sm:$0xff] %vm54_vm0, %v1613_v50  ;;  %v1614_v46 = vadd.f32 %v1602_v54, %v2445_v31 }
 0xd13   :  { %1620 = vst.msk [vmem:[%s2616_s11 + $0x18] sm:$0xff] %vm54_vm0, %v1616_v48 }
 0xd14   :  { %1618 = vst.msk [vmem:[%s2616_s11 + $0x8] sm:$0xff] %vm54_vm0, %v1614_v46 }

// kernel: _lambda_.3
= control target key start
LH: loop header
LB: loop body
LE: loop exit
PB: predicated region body
PF: predicated region fallthrough
CT: control target
= control target key end

     0   :  { %vm54_vm0 = vcmask 261120   ;;  %v2036_v32 = vmov 0   ;;  %s2037_s23 = smov 64   ;;  %s2038_s25 = smov 96   ;;  %v108_v42 = vlaneseq  ;;  %vm329_vm1 = vcmask 64512   ;;  %s2692_s0 = inlined_call_operand.vmem [shape: f32[32,32], index: 0, kind: input, shape index: {}]   ;;  %s2693_s7 = inlined_call_operand.vmem [shape: bf16[32,160], index: 7, kind: input, shape index: {}]   ;;  %s2694_s3 = inlined_call_operand.vmem [shape: f32[32,64], index: 3, kind: input, shape index: {}]   ;;  %s2695_s4 = inlined_call_operand.vmem [shape: f32[8,32], index: 4, kind: input, shape index: {}]   ;;  %s2696_s5 = inlined_call_operand.vmem [shape: f32[1,160], index: 5, kind: input, shape index: {}]   ;;  %s2697_s1 = inlined_call_operand.vmem [shape: f32[32,32], index: 1, kind: input, shape index: {}]   ;;  %s2698_s8 = inlined_call_operand.vmem [shape: bf16[32,32], index: 8, kind: input, shape index: {}]   ;;  %s2699_s9 = inlined_call_operand.vmem [shape: bf16[32,128], index: 9, kind: input, shape index: {}]   ;;  %s2700_s10 = inlined_call_operand.vmem [shape: bf16[128,32], index: 10, kind: input, shape index: {}]   ;;  %s2701_s6 = inlined_call_operand.vmem [shape: f32[1,128], index: 6, kind: input, shape index: {}]   ;;  %s2702_s2 = inlined_call_operand.vmem [shape: f32[1,128], index: 2, kind: input, shape index: {}]   ;;  %s2703_s12 = inlined_call_operand.vmem [shape: f32[32,128], index: 12, kind: output, shape index: {1}]   ;;  %s2704_s11 = inlined_call_operand.vmem [shape: f32[32,32], index: 11, kind: output, shape index: {0}]  }
   0x1   :  { %v41_v0 = vld [vmem:[%s2692_s0] sm:$0xff]  ;;  %v43_v1 = vld [vmem:[%s2692_s0 + $0x10] sm:$0xff]  ;;  %v42_v2 = vld [vmem:[%s2692_s0 + $0x8] sm:$0xff]  ;;  %200 = vmatprep.mubr.bf16.mxu1 %v2036_v32  ;;  %s2039_s28 = smov 32   ;;  %s2041_s14 = smov 88   ;;  %vm1219_vm2 = vcmask 130048  }
   0x2   :  { %v55_v3 = vsel %vm54_vm0, %v41_v0, 0.0  ;;  %v61_v4 = vsel %vm54_vm0, %v43_v1, 0.0  ;;  %v44_v5 = vld [vmem:[%s2692_s0 + $0x18] sm:$0xff]  ;;  %v58_v6 = vsel %vm54_vm0, %v42_v2, 0.0  ;;  %v1941_v28 = vld [vmem:[%s2693_s7 + $0x4] ss:$8 sps:$4 sm:$0xff]  }
   0x3   :  { %56 = vadd.xlane.f32.xlu0 %v55_v3  ;;  %62 = vadd.xlane.f32.xlu1 %v61_v4  ;;  %v64_v7 = vsel %vm54_vm0, %v44_v5, 0.0  ;;  %v1943_v29 = vld [vmem:[%s2693_s7] ss:$8 sps:$4 sm:$0xff]   ;;  %v1944_v30 = vld [vmem:[%s2693_s7 + $0x14] ss:$8 sps:$4 sm:$0xff]   ;;  %v2210_v48 = vshrl.u32 %v108_v42, 7 }
   0x4   :  { %168 = vmatprep.subr.bf16.mxu1 %v1941_v28  ;;  %v1946_v31 = vld [vmem:[%s2693_s7 + $0x10] ss:$8 sps:$4 sm:$0xff]   ;;  %v2169_v33 = vld [vmem:[%s2694_s3 + $0x8] sm:$0xff]  ;;  %v2174_v34 = vld [vmem:[%s2694_s3] sm:$0xff]  ;;  %s2042_s15 = smov 56   ;;  %s2043_s16 = smov 112  }
   0x5   :  { %169 = vmatpush1.bf16.msra.mxu1 %v1943_v29  ;;  %v2183_v35 = vld [vmem:[%s2694_s3 + $0x10] sm:$0xff]  ;;  %v2196_v36 = vld [vmem:[%s2694_s3 + $0x18] sm:$0xff]  ;;  %v110_v51 = vsub.s32 0, %v2210_v48  ;;  %v49_v52 = vld [vmem:[%s2695_s4] sm:$0xff]  ;;  %v118_v56 = vsub.s32 1, %v2210_v48  ;;  %s2044_s17 = smov 80  }
   0x6   :  { %170 = vmatprep.subr.bf16.mxu1 %v1944_v30  ;;  %s2046_s27 = smov 104   ;;  %s2047_s3 = smov 72   ;;  %vm1224_vm3 = vcmask 195584   ;;  %vm1142_vm4 = vcmask 523264   ;;  %vm1147_vm5 = vcmask 785408  }
   0x7   :  { %59 = vadd.xlane.f32.xlu0 %v58_v6  ;;  %65 = vadd.xlane.f32.xlu1 %v64_v7  ;;  %v111_v55 = vrot.slane %v49_v52, %v110_v51  ;;  %v119_v60 = vrot.slane %v49_v52, %v118_v56  ;;  %s2048_s29 = smov 40   ;;  %s2049_s30 = smov 8  }
   0x8   :  { %s2050_s13 = smov 16  }
   0x9   :  { %171 = vmatpush1.bf16.msra.mxu1 %v1946_v31 }
  0x90   :  { %v57_v8 = vpop.xlane.xlu0 %56  ;;  %v63_v9 = vpop.xlane.xlu1 %62 }
  0x91   :  { %v68_v10 = vmul.f32 0.03125, %v57_v8  ;;  %v70_v11 = vmul.f32 0.03125, %v63_v9 }
  0x93   :  { %v2133_v12 = vsub.f32 %v41_v0, %v68_v10  ;;  %v2135_v13 = vsub.f32 %v43_v1, %v70_v11  ;;  %v130_v11 = vld [vmem:[%s2696_s5] sm:$0x3]  ;;  %s2040_s5 = smov 120  }
  0x94   :  { %v60_v14 = vpop.xlane.xlu0 %59  ;;  %v66_v15 = vpop.xlane.xlu1 %65 }
  0x95   :  { %v69_v16 = vmul.f32 0.03125, %v60_v14  ;;  %v71_v17 = vmul.f32 0.03125, %v66_v15  ;;  %v76_v18 = vmul.f32 %v2133_v12, %v2133_v12  ;;  %v78_v19 = vmul.f32 %v2135_v13, %v2135_v13 }
  0x96   :  { %v139_v14 = vrot.slane %v130_v11, %v118_v56 }
  0x97   :  { %v2141_v20 = vsub.f32 %v42_v2, %v69_v16  ;;  %v2143_v21 = vsub.f32 %v44_v5, %v71_v17  ;;  %v80_v22 = vsel %vm54_vm0, %v76_v18, 0.0  ;;  %v86_v23 = vsel %vm54_vm0, %v78_v19, 0.0 }
  0x98   :  { %81 = vadd.xlane.f32.xlu0 %v80_v22 }
  0x99   :  { %v77_v24 = vmul.f32 %v2141_v20, %v2141_v20  ;;  %v79_v25 = vmul.f32 %v2143_v21, %v2143_v21 }
  0x9b   :  { %v83_v26 = vsel %vm54_vm0, %v77_v24, 0.0  ;;  %v89_v27 = vsel %vm54_vm0, %v79_v25, 0.0 }
  0x9c   :  { %87 = vadd.xlane.f32.xlu0 %v86_v23  ;;  %84 = vadd.xlane.f32.xlu1 %v83_v26 }
  0xa0   :  { %90 = vadd.xlane.f32.xlu1 %v89_v27 }
  0xb1   :  { %231 = vrot.lane.b32.xlu1 %v2169_v33, %s2037_s23 }
  0xb2   :  { %229 = vrot.lane.b32.xlu0 %v2174_v34, %s2037_s23 }
  0xb5   :  { %281 = vrot.lane.b32.xlu1 %v2174_v34, %s2038_s25 }
  0xb6   :  { %285 = vrot.lane.b32.xlu0 %v2183_v35, %s2038_s25 }
  0xb9   :  { %283 = vrot.lane.b32.xlu1 %v2169_v33, %s2038_s25 }
  0xba   :  { %233 = vrot.lane.b32.xlu0 %v2183_v35, %s2037_s23 }
  0xbd   :  { %287 = vrot.lane.b32.xlu1 %v2196_v36, %s2038_s25 }
  0xbe   :  { %265 = vrot.lane.b32.xlu0 %v2174_v34, %s2039_s28 }
  0xc1   :  { %235 = vrot.lane.b32.xlu1 %v2196_v36, %s2037_s23 }
  0xc2   :  { %269 = vrot.lane.b32.xlu0 %v2183_v35, %s2039_s28 }
  0xc5   :  { %267 = vrot.lane.b32.xlu1 %v2169_v33, %s2039_s28 }
  0xc9   :  { %271 = vrot.lane.b32.xlu1 %v2196_v36, %s2039_s28 }
 0x125   :  { %v82_v37 = vpop.xlane.xlu0 %81 }
 0x126   :  { %v92_v38 = vmul.f32 0.03125, %v82_v37 }
 0x128   :  { %v96_v39 = vadd.f32 1e-05, %v92_v38 }
 0x129   :  { %v85_v40 = vpop.xlane.xlu1 %84  ;;  %v88_v41 = vpop.xlane.xlu0 %87 }
 0x12a   :  { %1959 = vrsqrt.f32 %v96_v39  ;;  %v93_v43 = vmul.f32 0.03125, %v85_v40  ;;  %v94_v44 = vmul.f32 0.03125, %v88_v41 }
 0x12c   :  { %v97_v45 = vadd.f32 1e-05, %v93_v43  ;;  %v98_v46 = vadd.f32 1e-05, %v94_v44 }
 0x12d   :  { %v91_v47 = vpop.xlane.xlu1 %90  ;;  %v230_v18 = vpop.permute.xlu0 %229 }
 0x12e   :  { %1961 = vrsqrt.f32 %v97_v45  ;;  %v95_v49 = vmul.f32 0.03125, %v91_v47 }
 0x12f   :  { %1963 = vrsqrt.f32 %v98_v46 }
 0x130   :  { %v99_v50 = vadd.f32 1e-05, %v95_v49 }
 0x131   :  { %v232_v10 = vpop.permute.xlu1 %231  ;;  %v286_v30 = vpop.permute.xlu0 %285 }
 0x132   :  { %1965 = vrsqrt.f32 %v99_v50 }
 0x134   :  { %v1960_v53 = vpop.eup %1959 }
 0x135   :  { %v104_v54 = vmul.f32 %v1960_v53, %v2133_v12  ;;  %v135_v12 = vrot.slane %v130_v11, %v110_v51  ;;  %v234_v47 = vpop.permute.xlu0 %233 }
 0x137   :  { %v112_v59 = vmul.f32 %v111_v55, %v104_v54 }
 0x138   :  { %v1962_v57 = vpop.eup %1961 }
 0x139   :  { %v105_v58 = vmul.f32 %v1962_v57, %v2141_v20  ;;  %v1964_v61 = vpop.eup %1963  ;;  %v120_v2 = vadd.f32 %v119_v60, %v112_v59  ;;  %v266_v52 = vpop.permute.xlu0 %265 }
 0x13a   :  { %v106_v0 = vmul.f32 %v1964_v61, %v2135_v13  ;;  %v282_v13 = vpop.permute.xlu1 %281 }
 0x13b   :  { %v113_v62 = vmul.f32 %v111_v55, %v105_v58 }
 0x13c   :  { %v1966_v63 = vpop.eup %1965  ;;  %v114_v6 = vmul.f32 %v111_v55, %v106_v0 }
 0x13d   :  { %v107_v1 = vmul.f32 %v1966_v63, %v2143_v21  ;;  %v121_v3 = vadd.f32 %v119_v60, %v113_v62  ;;  %v270_v54 = vpop.permute.xlu0 %269 }
 0x13e   :  { %v122_v8 = vadd.f32 %v119_v60, %v114_v6  ;;  %v284_v24 = vpop.permute.xlu1 %283 }
 0x13f   :  { %v124_v4 = vpack.c.bf16 %v121_v3, %v120_v2  ;;  %v115_v5 = vmul.f32 %v111_v55, %v107_v1 }
 0x141   :  { %1701 = vmatmul.mubr.msk.bf16.vlgmr.msra.gmra.mrb[0].mxu1 %vm54_vm0, %v124_v4  ;;  %v123_v7 = vadd.f32 %v119_v60, %v115_v5 }
 0x142   :  { %210 = vmatprep.mubr.bf16.mxu1 %v2036_v32  ;;  %v288_v40 = vpop.permute.xlu1 %287 }
 0x143   :  { %v125_v9 = vpack.c.bf16 %v123_v7, %v122_v8 }
 0x146   :  { %v236_v50 = vpop.permute.xlu1 %235 }
 0x149   :  { %1702 = vmatmul.mubr.msk.bf16.gmra.mrb[4].mxu1 %vm54_vm0, %v125_v9 }
 0x14a   :  { %v268_v53 = vpop.permute.xlu1 %267 }
 0x14e   :  { %v272_v55 = vpop.permute.xlu1 %271 }
 0x214   :  { %v202_v15 = vpop.f32.mrb[0].mxu1 }
 0x215   :  { %v203_v16 = vadd.f32 %v202_v15, %v135_v12  ;;  %v204_v17 = vpop.f32.mrb[1].mxu1 }
 0x216   :  { %v206_v19 = vpop.f32.mrb[2].mxu1  ;;  %v205_v20 = vadd.f32 %v204_v17, %v139_v14 }
 0x217   :  { %v207_v21 = vadd.f32 %v206_v19, %v135_v12  ;;  %v208_v22 = vpop.f32.mrb[3].mxu1  ;;  %v241_v23 = vmul.f32 %v230_v18, %v203_v16  ;;  %v221_v57 = vmul.f32 %v203_v16, %v2174_v34  ;;  %v277_v63 = vmul.f32 %v266_v52, %v203_v16 }
 0x218   :  { %v209_v25 = vadd.f32 %v208_v22, %v139_v14  ;;  %v293_v28 = vmul.f32 %v282_v13, %v205_v20 }
 0x219   :  { %249 = vrot.lane.b32.xlu0 %v241_v23, %s2039_s28  ;;  %v242_v26 = vmul.f32 %v232_v10, %v207_v21  ;;  %v2228_v27 = vpack.c.bf16 %v207_v21, %v203_v16  ;;  %v222_v58 = vmul.f32 %v207_v21, %v2169_v33  ;;  %v278_v0 = vmul.f32 %v268_v53, %v207_v21 }
 0x21a   :  { %v294_v31 = vmul.f32 %v284_v24, %v209_v25 }
 0x21b   :  { %251 = vrot.lane.b32.xlu1 %v242_v26, %s2039_s28 }
 0x21c   :  { %v212_v29 = vpop.f32.mrb[4].mxu1 }
 0x21d   :  { %v213_v32 = vadd.f32 %v212_v29, %v135_v12  ;;  %v214_v37 = vpop.f32.mrb[5].mxu1  ;;  %301 = vrot.lane.b32.xlu0 %v293_v28, %s2039_s28 }
 0x21e   :  { %v215_v38 = vadd.f32 %v214_v37, %v139_v14  ;;  %v216_v39 = vpop.f32.mrb[6].mxu1  ;;  %v2301_v37 = vld [vmem:[%s2697_s1 + $0x18] sm:$0xff] }
 0x21f   :  { %v217_v41 = vadd.f32 %v216_v39, %v135_v12  ;;  %303 = vrot.lane.b32.xlu1 %v294_v31, %s2039_s28  ;;  %v218_v42 = vpop.f32.mrb[7].mxu1  ;;  %v243_v49 = vmul.f32 %v234_v47, %v213_v32  ;;  %v279_v6 = vmul.f32 %v270_v54, %v213_v32  ;;  %v223_v13 = vmul.f32 %v213_v32, %v2183_v35  ;;  %v2296_v31 = vld [vmem:[%s2697_s1] sm:$0xff] }
 0x220   :  { %v295_v43 = vmul.f32 %v286_v30, %v215_v38  ;;  %v219_v44 = vadd.f32 %v218_v42, %v139_v14  ;;  %v2291_v30 = vld [vmem:[%s2697_s1 + $0x10] sm:$0xff] }
 0x221   :  { %v2233_v45 = vpack.c.bf16 %v217_v41, %v213_v32  ;;  %v244_v51 = vmul.f32 %v236_v50, %v217_v41  ;;  %v280_v7 = vmul.f32 %v272_v55, %v217_v41  ;;  %v224_v14 = vmul.f32 %v217_v41, %v2196_v36 }
 0x222   :  { %v296_v46 = vmul.f32 %v288_v40, %v219_v44  ;;  %305 = vrot.lane.b32.xlu0 %v295_v43, %s2039_s28  ;;  %v2307_v40 = vld [vmem:[%s2697_s1 + $0x8] sm:$0xff]  ;;  %s2045_s1 = smov 48  }
 0x224   :  { %307 = vrot.lane.b32.xlu1 %v296_v46, %s2039_s28 }
 0x226   :  { %253 = vrot.lane.b32.xlu0 %v243_v49, %s2039_s28 }
 0x228   :  { %255 = vrot.lane.b32.xlu1 %v244_v51, %s2039_s28 }
 0x28b   :  { %v250_v56 = vpop.permute.xlu0 %249 }
 0x28c   :  { %v261_v60 = vadd.f32 %v250_v56, %v221_v57 }
 0x28d   :  { %v252_v59 = vpop.permute.xlu1 %251 }
 0x28e   :  { %v262_v61 = vadd.f32 %v252_v59, %v222_v58 }
 0x28f   :  { %v302_v62 = vpop.permute.xlu0 %301 }
 0x290   :  { %v2241_v1 = vpack.c.bf16 %v262_v61, %v261_v60  ;;  %v313_v3 = vadd.f32 %v302_v62, %v277_v63 }
 0x291   :  { %v304_v2 = vpop.permute.xlu1 %303 }
 0x292   :  { %v314_v4 = vadd.f32 %v304_v2, %v278_v0  ;;  %521 = vrot.lane.b32.xlu1 %v2241_v1, %s2040_s5  ;;  %1887 = vmatprep.subr.msk.bf16.mxu1 %vm329_vm1, %v2241_v1  ;;  %v337_v33 = vsel %vm329_vm1, %v2241_v1, 0 }
 0x293   :  { %1788 = vmatpush3.bf16.xpose.msra.mxu1 %v337_v33 }
 0x294   :  { %v2248_v34 = vpack.c.bf16 %v314_v4, %v313_v3  ;;  %v306_v5 = vpop.permute.xlu0 %305 }
 0x295   :  { %v315_v9 = vadd.f32 %v306_v5, %v279_v6 }
 0x296   :  { %v308_v8 = vpop.permute.xlu1 %307  ;;  %325 = vrot.lane.b32.xlu0 %v2248_v34, %s2038_s25 }
 0x297   :  { %v316_v10 = vadd.f32 %v308_v8, %v280_v7 }
 0x298   :  { %v254_v11 = vpop.permute.xlu0 %253 }
 0x299   :  { %v2252_v12 = vpack.c.bf16 %v316_v10, %v315_v9  ;;  %v263_v16 = vadd.f32 %v254_v11, %v223_v13 }
 0x29a   :  { %v256_v15 = vpop.permute.xlu1 %255 }
 0x29b   :  { %v264_v17 = vadd.f32 %v256_v15, %v224_v14  ;;  %327 = vrot.lane.b32.xlu0 %v2252_v12, %s2038_s25 }
 0x29d   :  { %v2258_v18 = vpack.c.bf16 %v264_v17, %v263_v16 }
 0x29f   :  { %515 = vrot.lane.b32.xlu0 %v2248_v34, %s2041_s14  ;;  %523 = vrot.lane.b32.xlu1 %v2258_v18, %s2040_s5  ;;  %v340_v19 = vsel %vm329_vm1, %v2258_v18, 0 }
 0x2a0   :  { %1888 = vmatprep.subr.msk.bf16.mxu1 %vm329_vm1, %v2258_v18 }
 0x2a1   :  { %1790 = vmatpush3.bf16.xpose.msra.mxu1 %v340_v19 }
 0x2a3   :  { %454 = vrot.lane.b32.xlu0 %v2228_v27, %s2037_s23  ;;  %517 = vrot.lane.b32.xlu1 %v2252_v12, %s2041_s14 }
 0x2a7   :  { %647 = vrot.lane.b32.xlu0 %v2228_v27, %s2042_s15  ;;  %456 = vrot.lane.b32.xlu1 %v2233_v45, %s2037_s23 }
 0x2ab   :  { %712 = vrot.lane.b32.xlu0 %v2241_v1, %s2043_s16  ;;  %649 = vrot.lane.b32.xlu1 %v2233_v45, %s2042_s15 }
 0x2af   :  { %714 = vrot.lane.b32.xlu0 %v2258_v18, %s2043_s16 }
 0x2b3   :  { %708 = vrot.lane.b32.xlu0 %v2248_v34, %s2044_s17 }
 0x2b7   :  { %710 = vrot.lane.b32.xlu0 %v2252_v12, %s2044_s17  ;;  %s2051_s17 = smov 24  }
 0x304   :  { %v522_v35 = vpop.permute.xlu1 %521 }
 0x305   :  { %1889 = vmatprep.subr.msk.bf16.mxu1 %vm329_vm1, %v522_v35  ;;  %v532_v21 = vsel %vm329_vm1, %v522_v35, 0 }
 0x308   :  { %v326_v36 = vpop.permute.xlu0 %325 }
 0x309   :  { %1791 = vmatprep.mubr.msk.bf16.mxu1 %vm329_vm1, %v326_v36 }
 0x30d   :  { %v328_v20 = vpop.permute.xlu0 %327 }
 0x30e   :  { %1792 = vmatmul.mubr.msk.bf16.vlgmr.msra.gmra.mrb[8].mxu1 %vm329_vm1, %v328_v20 }
 0x30f   :  { %1804 = vmatpush3.bf16.xpose.msra.mxu1 %v532_v21 }
 0x311   :  { %v524_v22 = vpop.permute.xlu1 %523  ;;  %v516_v23 = vpop.permute.xlu0 %515 }
 0x312   :  { %1890 = vmatprep.subr.msk.bf16.mxu1 %vm329_vm1, %v524_v22  ;;  %1807 = vmatprep.mubr.msk.bf16.mxu1 %vm329_vm1, %v516_v23  ;;  %v535_v26 = vsel %vm329_vm1, %v524_v22, 0 }
 0x315   :  { %v518_v24 = vpop.permute.xlu1 %517  ;;  %v455_v25 = vpop.permute.xlu0 %454 }
 0x316   :  { %1795 = vmatprep.subr.bf16.mxu0 %v455_v25 }
 0x317   :  { %1806 = vmatpush3.bf16.xpose.msra.mxu1 %v535_v26  ;;  %1796 = vmatpush3.bf16.msra.mxu0 %v455_v25 }
 0x319   :  { %v457_v28 = vpop.permute.xlu1 %456  ;;  %v2284_v29 = vpop.permute.xlu0 %647 }
 0x31a   :  { %1797 = vmatprep.subr.bf16.mxu0 %v457_v28 }
 0x31b   :  { %1798 = vmatpush3.bf16.msra.mxu0 %v457_v28 }
 0x31c   :  { %1811 = vmatprep.subr.bf16.mxu0 %v2284_v29 }
 0x31e   :  { %1808 = vmatmul.mubr.msk.bf16.vlgmr.msra.gmra.mrb[12].mxu1 %vm329_vm1, %v518_v24 }
 0x3e1   :  { %v1793_v32 = vpop.f32.mrb[8].mxu1 }
 0x3e2   :  { %v385_v38 = vadd.f32 %v1793_v32, %v2291_v30  ;;  %v376_v39 = vpop.f32.mrb[9].mxu1 }
 0x3e3   :  { %v377_v41 = vadd.f32 %v376_v39, %v2296_v31  ;;  %v1794_v42 = vpop.f32.mrb[10].mxu1 }
 0x3e4   :  { %v388_v43 = vadd.f32 %v1794_v42, %v2301_v37  ;;  %v379_v44 = vpop.f32.mrb[11].mxu1  ;;  %v393_v47 = vsel %vm54_vm0, %v385_v38, -inf }
 0x3e5   :  { %v380_v46 = vadd.f32 %v379_v44, %v2307_v40  ;;  %v391_v50 = vsel %vm54_vm0, %v377_v41, -inf }
 0x3e6   :  { %v394_v49 = vsel %vm54_vm0, %v388_v43, -inf }
 0x3e7   :  { %v396_v51 = vmax.f32 %v393_v47, %v394_v49  ;;  %v392_v52 = vsel %vm54_vm0, %v380_v46, -inf }
 0x3e8   :  { %v395_v53 = vmax.f32 %v391_v50, %v392_v52 }
 0x3ea   :  { %v397_v54 = vmax.f32 %v395_v53, %v396_v51 }
 0x3ec   :  { %v398_v55 = vrot.slane %v397_v54, 4 }
 0x3ee   :  { %v399_v56 = vmax.f32 %v397_v54, %v398_v55 }
 0x3f0   :  { %v400_v57 = vrot.slane %v399_v56, 2 }
 0x3f1   :  { %v1809_v58 = vpop.f32.mrb[12].mxu1 }
 0x3f2   :  { %v401_v59 = vmax.f32 %v399_v56, %v400_v57  ;;  %v580_v60 = vadd.f32 %v1809_v58, %v2291_v30  ;;  %v571_v61 = vpop.f32.mrb[13].mxu1 }
 0x3f3   :  { %v572_v62 = vadd.f32 %v571_v61, %v2296_v31  ;;  %v1810_v63 = vpop.f32.mrb[14].mxu1 }
 0x3f4   :  { %v402_v0 = vrot.slane %v401_v59, 1  ;;  %v583_v2 = vadd.f32 %v1810_v63, %v2301_v37  ;;  %v574_v3 = vpop.f32.mrb[15].mxu1  ;;  %v588_v5 = vsel %vm54_vm0, %v580_v60, -inf }
 0x3f5   :  { %v575_v4 = vadd.f32 %v574_v3, %v2307_v40  ;;  %v586_v7 = vsel %vm54_vm0, %v572_v62, -inf }
 0x3f6   :  { %v403_v33 = vmax.f32 %v401_v59, %v402_v0  ;;  %v589_v6 = vsel %vm54_vm0, %v583_v2, -inf }
 0x3f7   :  { %v591_v8 = vmax.f32 %v588_v5, %v589_v6  ;;  %v587_v9 = vsel %vm54_vm0, %v575_v4, -inf }
 0x3f8   :  { %v405_v10 = vsub.f32 %v380_v46, %v403_v33  ;;  %v406_v11 = vsub.f32 %v385_v38, %v403_v33  ;;  %v407_v13 = vsub.f32 %v388_v43, %v403_v33  ;;  %v590_v14 = vmax.f32 %v586_v7, %v587_v9 }
 0x3f9   :  { %v404_v15 = vsub.f32 %v377_v41, %v403_v33 }
 0x3fa   :  { %v410_v16 = vmul.f32 1.442695, %v405_v10  ;;  %v592_v17 = vmax.f32 %v590_v14, %v591_v8  ;;  %v412_v35 = vmul.f32 1.442695, %v406_v11  ;;  %v414_v20 = vmul.f32 1.442695, %v407_v13 }
 0x3fb   :  { %v408_v19 = vmul.f32 1.442695, %v404_v15 }
 0x3fc   :  { %1967 = vpow2.f32 %v410_v16  ;;  %v593_v36 = vrot.slane %v592_v17, 4 }
 0x3fd   :  { %1969 = vpow2.f32 %v408_v19 }
 0x3fe   :  { %v594_v21 = vmax.f32 %v592_v17, %v593_v36  ;;  %1971 = vpow2.f32 %v412_v35 }
 0x3ff   :  { %1973 = vpow2.f32 %v414_v20 }
 0x400   :  { %v595_v22 = vrot.slane %v594_v21, 2 }
 0x402   :  { %v596_v23 = vmax.f32 %v594_v21, %v595_v22 }
 0x404   :  { %v597_v24 = vrot.slane %v596_v23, 1 }
 0x406   :  { %v1968_v25 = vpop.eup %1967  ;;  %v598_v26 = vmax.f32 %v596_v23, %v597_v24 }
 0x407   :  { %v1970_v39 = vpop.eup %1969  ;;  %v417_v41 = vsel %vm54_vm0, %v1968_v25, 0.0 }
 0x408   :  { %v600_v28 = vsub.f32 %v575_v4, %v598_v26  ;;  %v601_v32 = vsub.f32 %v580_v60, %v598_v26  ;;  %v602_v38 = vsub.f32 %v583_v2, %v598_v26  ;;  %v599_v42 = vsub.f32 %v572_v62, %v598_v26  ;;  %v1972_v43 = vpop.eup %1971 }
 0x409   :  { %v416_v47 = vsel %vm54_vm0, %v1970_v39, 0.0  ;;  %v1974_v50 = vpop.eup %1973  ;;  %v419_v53 = vsel %vm54_vm0, %v1972_v43, 0.0 }
 0x40a   :  { %v605_v44 = vmul.f32 1.442695, %v600_v28  ;;  %v607_v46 = vmul.f32 1.442695, %v601_v32  ;;  %v603_v49 = vmul.f32 1.442695, %v599_v42  ;;  %v418_v51 = vadd.f32 %v417_v41, %v416_v47  ;;  %v650_v41 = vpop.permute.xlu1 %649 }
 0x40b   :  { %v609_v52 = vmul.f32 1.442695, %v602_v38  ;;  %v421_v55 = vsel %vm54_vm0, %v1974_v50, 0.0 }
 0x40c   :  { %1975 = vpow2.f32 %v605_v44  ;;  %v420_v54 = vadd.f32 %v419_v53, %v418_v51 }
 0x40d   :  { %1977 = vpow2.f32 %v607_v46 }
 0x40e   :  { %1979 = vpow2.f32 %v603_v49  ;;  %v422_v56 = vadd.f32 %v421_v55, %v420_v54 }
 0x40f   :  { %1981 = vpow2.f32 %v609_v52 }
 0x410   :  { %v423_v57 = vrot.slane %v422_v56, 4 }
 0x412   :  { %v424_v58 = vadd.f32 %v423_v57, %v422_v56 }
 0x414   :  { %v425_v60 = vrot.slane %v424_v58, 2 }
 0x416   :  { %v1976_v59 = vpop.eup %1975  ;;  %v426_v63 = vadd.f32 %v425_v60, %v424_v58 }
 0x417   :  { %v1978_v61 = vpop.eup %1977  ;;  %v612_v62 = vsel %vm54_vm0, %v1976_v59, 0.0 }
 0x418   :  { %v1980_v0 = vpop.eup %1979  ;;  %v427_v2 = vrot.slane %v426_v63, 1  ;;  %v614_v6 = vsel %vm54_vm0, %v1978_v61, 0.0 }
 0x419   :  { %v611_v3 = vsel %vm54_vm0, %v1980_v0, 0.0  ;;  %v1982_v4 = vpop.eup %1981 }
 0x41a   :  { %v613_v33 = vadd.f32 %v612_v62, %v611_v3  ;;  %v428_v5 = vadd.f32 %v427_v2, %v426_v63  ;;  %v616_v8 = vsel %vm54_vm0, %v1982_v4, 0.0 }
 0x41c   :  { %v615_v7 = vadd.f32 %v614_v6, %v613_v33  ;;  %1983 = vrcp.f32 %v428_v5 }
 0x41e   :  { %v617_v9 = vadd.f32 %v616_v8, %v615_v7 }
 0x420   :  { %v618_v10 = vrot.slane %v617_v9, 4 }
 0x422   :  { %v619_v11 = vadd.f32 %v618_v10, %v617_v9 }
 0x424   :  { %v620_v13 = vrot.slane %v619_v11, 2 }
 0x426   :  { %v621_v14 = vadd.f32 %v620_v13, %v619_v11  ;;  %v1984_v15 = vpop.eup %1983 }
 0x427   :  { %v2332_v16 = vmul.f32 %v1984_v15, %v1970_v39  ;;  %v2334_v17 = vmul.f32 %v1984_v15, %v1968_v25  ;;  %v2336_v19 = vmul.f32 %v1984_v15, %v1972_v43  ;;  %v2338_v35 = vmul.f32 %v1984_v15, %v1974_v50  ;;  %v713_v39 = vpop.permute.xlu0 %712 }
 0x428   :  { %v622_v36 = vrot.slane %v621_v14, 1 }
 0x429   :  { %v434_v20 = vpack.c.bf16 %v2334_v17, %v2332_v16  ;;  %v435_v22 = vpack.c.bf16 %v2338_v35, %v2336_v19 }
 0x42a   :  { %v623_v21 = vadd.f32 %v622_v36, %v621_v14 }
 0x42b   :  { %436 = vxpose.xlu1.c.b16.start [1/2] (short) (narrow) %v434_v20, 32  ;;  %v715_v42 = vpop.permute.xlu0 %714 }
 0x42c   :  { %1985 = vrcp.f32 %v623_v21  ;;  %v726_v47 = vsel %vm329_vm1, %v715_v42, 0 }
 0x42f   :  { %437 = vxpose.xlu1.c.b16.end [2/2] (short) (narrow) %v435_v22, 32  ;;  %v709_v44 = vpop.permute.xlu0 %708 }
 0x433   :  { %838 = vrot.lane.b32.xlu1 %v2228_v27, %s2045_s1 }
 0x436   :  { %v1986_v23 = vpop.eup %1985 }
 0x437   :  { %840 = vrot.lane.b32.xlu1 %v2233_v45, %s2045_s1  ;;  %v2346_v24 = vmul.f32 %v1986_v23, %v1980_v0  ;;  %v2348_v25 = vmul.f32 %v1986_v23, %v1976_v59  ;;  %v2350_v26 = vmul.f32 %v1986_v23, %v1978_v61  ;;  %v2352_v28 = vmul.f32 %v1986_v23, %v1982_v4 }
 0x439   :  { %v629_v32 = vpack.c.bf16 %v2348_v25, %v2346_v24  ;;  %v630_v38 = vpack.c.bf16 %v2352_v28, %v2350_v26 }
 0x43b   :  { %631 = vxpose.xlu0.c.b16.start [1/2] (short) (narrow) %v629_v32, 32  ;;  %905 = vrot.lane.b32.xlu1 %v2258_v18, %s2046_s27 }
 0x43f   :  { %632 = vxpose.xlu0.c.b16.end [2/2] (short) (narrow) %v630_v38, 32  ;;  %899 = vrot.lane.b32.xlu1 %v2248_v34, %s2047_s3 }
 0x443   :  { %901 = vrot.lane.b32.xlu1 %v2252_v12, %s2047_s3  ;;  %v723_v12 = vsel %vm329_vm1, %v713_v39, 0 }
 0x447   :  { %1029 = vrot.lane.b32.xlu1 %v2228_v27, %s2048_s29  ;;  %v711_v27 = vpop.permute.xlu0 %710 }
 0x448   :  { %903 = vrot.lane.b32.xlu0 %v2241_v1, %s2046_s27 }
 0x44b   :  { %1031 = vrot.lane.b32.xlu1 %v2233_v45, %s2048_s29 }
 0x491   :  { %v444_v18 = vpop.trf.xlu1 }
 0x492   :  { %1799 = vmatprep.mubr.msk.bf16.mxu0 %vm54_vm0, %v444_v18 }
 0x495   :  { %v445_v43 = vpop.trf.xlu1 }
 0x496   :  { %1800 = vmatmul.mubr.msk.bf16.vlgmr.msra.gmra.mrb[0].mxu0 %vm54_vm0, %v445_v43 }
 0x497   :  { %1812 = vmatpush3.bf16.msra.mxu0 %v2284_v29 }
 0x498   :  { %1813 = vmatprep.subr.bf16.mxu0 %v650_v41 }
 0x49b   :  { %1814 = vmatpush3.bf16.msra.mxu0 %v650_v41 }
 0x49c   :  { %1891 = vmatprep.subr.msk.bf16.mxu0 %vm329_vm1, %v713_v39 }
 0x4a1   :  { %v639_v1 = vpop.trf.xlu0 }
 0x4a2   :  { %1815 = vmatprep.mubr.msk.bf16.mxu0 %vm54_vm0, %v639_v1 }
 0x4a5   :  { %v640_v45 = vpop.trf.xlu0  ;;  %v839_v34 = vpop.permute.xlu1 %838 }
 0x4a6   :  { %1816 = vmatmul.mubr.msk.bf16.vlgmr.msra.gmra.mrb[4].mxu0 %vm54_vm0, %v640_v45  ;;  %1827 = vmatprep.subr.bf16.mxu1 %v839_v34 }
 0x4a7   :  { %1820 = vmatpush3.bf16.xpose.msra.mxu0 %v723_v12  ;;  %1823 = vmatprep.mubr.msk.bf16.mxu0 %vm329_vm1, %v709_v44 }
 0x4a8   :  { %1892 = vmatprep.subr.msk.bf16.mxu0 %vm329_vm1, %v715_v42  ;;  %1828 = vmatpush3.bf16.msra.mxu1 %v839_v34 }
 0x4a9   :  { %v841_v29 = vpop.permute.xlu1 %840 }
 0x4aa   :  { %1829 = vmatprep.subr.bf16.mxu1 %v841_v29 }
 0x4ac   :  { %1830 = vmatpush3.bf16.msra.mxu1 %v841_v29 }
 0x4ad   :  { %v2373_v46 = vpop.permute.xlu1 %905 }
 0x4af   :  { %1822 = vmatpush3.bf16.xpose.msra.mxu0 %v726_v47 }
 0x4b1   :  { %v2376_v49 = vpop.permute.xlu1 %899 }
 0x4b5   :  { %v2378_v50 = vpop.permute.xlu1 %901 }
 0x4b6   :  { %1824 = vmatmul.mubr.msk.bf16.vlgmr.msra.gmra.mrb[8].mxu0 %vm329_vm1, %v711_v27 }
 0x4b9   :  { %v1030_v51 = vpop.permute.xlu1 %1029 }
 0x4ba   :  { %v2381_v52 = vpop.permute.xlu0 %903  ;;  %1843 = vmatprep.subr.bf16.mxu0 %v1030_v51 }
 0x4bb   :  { %1893 = vmatprep.subr.msk.bf16.mxu1 %vm329_vm1, %v2381_v52  ;;  %1844 = vmatpush3.bf16.msra.mxu0 %v1030_v51 }
 0x4bd   :  { %v1032_v53 = vpop.permute.xlu1 %1031 }
 0x4be   :  { %1845 = vmatprep.subr.bf16.mxu0 %v1032_v53 }
 0x4bf   :  { %1846 = vmatpush3.bf16.msra.mxu0 %v1032_v53 }
 0x569   :  { %v2385_v54 = vpop.f32.mrb[0].mxu0 }
 0x56a   :  { %v2387_v55 = vpop.f32.mrb[1].mxu0 }
 0x56b   :  { %v2389_v56 = vpop.f32.mrb[2].mxu0 }
 0x56c   :  { %v2391_v57 = vpop.f32.mrb[3].mxu0 }
 0x579   :  { %v2393_v58 = vpop.f32.mrb[4].mxu0 }
 0x57a   :  { %v2395_v59 = vpop.f32.mrb[5].mxu0 }
 0x57b   :  { %v2397_v60 = vpop.f32.mrb[6].mxu0 }
 0x57c   :  { %v1916_v61 = vpack.i.bf16 %v2397_v60, %v2393_v58  ;;  %v2401_v62 = vpop.f32.mrb[7].mxu0  ;;  %v917_v58 = vsel %vm329_vm1, %v2373_v46, 0 }
 0x57d   :  { %v1911_v63 = vpack.i.bf16 %v2401_v62, %v2395_v59 }
 0x589   :  { %v1825_v0 = vpop.f32.mrb[8].mxu0 }
 0x58a   :  { %v771_v2 = vadd.f32 %v1825_v0, %v2291_v30  ;;  %v762_v3 = vpop.f32.mrb[9].mxu0 }
 0x58b   :  { %v763_v4 = vadd.f32 %v762_v3, %v2296_v31  ;;  %v1826_v33 = vpop.f32.mrb[10].mxu0 }
 0x58c   :  { %v774_v5 = vadd.f32 %v1826_v33, %v2301_v37  ;;  %v765_v6 = vpop.f32.mrb[11].mxu0  ;;  %v779_v8 = vsel %vm54_vm0, %v771_v2, -inf }
 0x58d   :  { %v766_v7 = vadd.f32 %v765_v6, %v2307_v40  ;;  %v777_v10 = vsel %vm54_vm0, %v763_v4, -inf }
 0x58e   :  { %v780_v9 = vsel %vm54_vm0, %v774_v5, -inf }
 0x58f   :  { %v782_v11 = vmax.f32 %v779_v8, %v780_v9  ;;  %v778_v13 = vsel %vm54_vm0, %v766_v7, -inf }
 0x590   :  { %v781_v14 = vmax.f32 %v777_v10, %v778_v13 }
 0x592   :  { %v783_v15 = vmax.f32 %v781_v14, %v782_v11 }
 0x594   :  { %v784_v36 = vrot.slane %v783_v15, 4 }
 0x596   :  { %v785_v20 = vmax.f32 %v783_v15, %v784_v36 }
 0x598   :  { %v786_v21 = vrot.slane %v785_v20, 2 }
 0x59a   :  { %v787_v22 = vmax.f32 %v785_v20, %v786_v21  ;;  %v914_v20 = vsel %vm329_vm1, %v2381_v52, 0 }
 0x59c   :  { %v788_v23 = vrot.slane %v787_v22, 1 }
 0x59e   :  { %v789_v32 = vmax.f32 %v787_v22, %v788_v23 }
 0x5a0   :  { %v790_v38 = vsub.f32 %v763_v4, %v789_v32  ;;  %v791_v39 = vsub.f32 %v766_v7, %v789_v32  ;;  %v792_v41 = vsub.f32 %v771_v2, %v789_v32  ;;  %v793_v42 = vsub.f32 %v774_v5, %v789_v32 }
 0x5a2   :  { %v794_v18 = vmul.f32 1.442695, %v790_v38  ;;  %v796_v43 = vmul.f32 1.442695, %v791_v39  ;;  %v798_v44 = vmul.f32 1.442695, %v792_v41 }
 0x5a3   :  { %v800_v27 = vmul.f32 1.442695, %v793_v42 }
 0x5a4   :  { %1987 = vpow2.f32 %v794_v18 }
 0x5a5   :  { %1989 = vpow2.f32 %v796_v43 }
 0x5a6   :  { %1991 = vpow2.f32 %v798_v44 }
 0x5a7   :  { %1993 = vpow2.f32 %v800_v27 }
 0x5ae   :  { %v1988_v1 = vpop.eup %1987 }
 0x5af   :  { %v1990_v45 = vpop.eup %1989  ;;  %v802_v34 = vsel %vm54_vm0, %v1988_v1, 0.0 }
 0x5b0   :  { %v1992_v12 = vpop.eup %1991  ;;  %v803_v29 = vsel %vm54_vm0, %v1990_v45, 0.0 }
 0x5b1   :  { %v1994_v47 = vpop.eup %1993  ;;  %v804_v51 = vadd.f32 %v803_v29, %v802_v34  ;;  %v805_v53 = vsel %vm54_vm0, %v1992_v12, 0.0 }
 0x5b2   :  { %v807_v62 = vsel %vm54_vm0, %v1994_v47, 0.0 }
 0x5b3   :  { %v806_v59 = vadd.f32 %v805_v53, %v804_v51 }
 0x5b5   :  { %v808_v0 = vadd.f32 %v807_v62, %v806_v59 }
 0x5b7   :  { %v809_v2 = vrot.slane %v808_v0, 4 }
 0x5b9   :  { %v810_v3 = vadd.f32 %v809_v2, %v808_v0 }
 0x5bb   :  { %v811_v4 = vrot.slane %v810_v3, 2 }
 0x5bd   :  { %v812_v33 = vadd.f32 %v811_v4, %v810_v3 }
 0x5bf   :  { %v813_v5 = vrot.slane %v812_v33, 1 }
 0x5c1   :  { %v814_v6 = vadd.f32 %v813_v5, %v812_v33 }
 0x5c3   :  { %1995 = vrcp.f32 %v814_v6 }
 0x5cd   :  { %v1996_v7 = vpop.eup %1995 }
 0x5ce   :  { %v2417_v8 = vmul.f32 %v1996_v7, %v1988_v1  ;;  %v2419_v9 = vmul.f32 %v1996_v7, %v1990_v45  ;;  %v2421_v10 = vmul.f32 %v1996_v7, %v1992_v12  ;;  %v2423_v11 = vmul.f32 %v1996_v7, %v1994_v47 }
 0x5d0   :  { %v820_v13 = vpack.c.bf16 %v2419_v9, %v2417_v8  ;;  %v821_v14 = vpack.c.bf16 %v2423_v11, %v2421_v10 }
 0x5d2   :  { %822 = vxpose.xlu0.c.b16.start [1/2] (short) (narrow) %v820_v13, 32 }
 0x5d6   :  { %823 = vxpose.xlu0.c.b16.end [2/2] (short) (narrow) %v821_v14, 32 }
 0x5df   :  { %1912 = vrot.lane.b32.xlu0 %v1911_v63, %s2049_s30 }
 0x5e3   :  { %1917 = vrot.lane.b32.xlu0 %v1916_v61, %s2049_s30 }
 0x638   :  { %v830_v15 = vpop.trf.xlu0 }
 0x639   :  { %1831 = vmatprep.mubr.msk.bf16.mxu1 %vm54_vm0, %v830_v15 }
 0x63c   :  { %v831_v36 = vpop.trf.xlu0 }
 0x63d   :  { %1832 = vmatmul.mubr.msk.bf16.vlgmr.msra.gmra.mrb[16].mxu1 %vm54_vm0, %v831_v36 }
 0x63e   :  { %1836 = vmatpush3.bf16.xpose.msra.mxu1 %v914_v20  ;;  %1839 = vmatprep.mubr.msk.bf16.mxu1 %vm329_vm1, %v2376_v49 }
 0x63f   :  { %1894 = vmatprep.subr.msk.bf16.mxu1 %vm329_vm1, %v2373_v46 }
 0x646   :  { %1838 = vmatpush3.bf16.xpose.msra.mxu1 %v917_v58 }
 0x64d   :  { %1840 = vmatmul.mubr.msk.bf16.vlgmr.msra.gmra.mrb[20].mxu1 %vm329_vm1, %v2378_v50 }
 0x710   :  { %v2444_v60 = vpop.f32.mrb[16].mxu1 }
 0x711   :  { %v884_v61 = vpop.f32.mrb[17].mxu1 }
 0x712   :  { %v2446_v52 = vpop.f32.mrb[18].mxu1 }
 0x713   :  { %v1926_v63 = vpack.i.bf16 %v2446_v52, %v2444_v60  ;;  %v887_v21 = vpop.f32.mrb[19].mxu1 }
 0x714   :  { %v1921_v49 = vpack.i.bf16 %v887_v21, %v884_v61 }
 0x716   :  { %1922 = vrot.lane.b32.xlu0 %v1921_v49, %s2050_s13 }
 0x720   :  { %v1841_v22 = vpop.f32.mrb[20].mxu1 }
 0x721   :  { %v962_v46 = vadd.f32 %v1841_v22, %v2291_v30  ;;  %v953_v23 = vpop.f32.mrb[21].mxu1 }
 0x722   :  { %v954_v32 = vadd.f32 %v953_v23, %v2296_v31  ;;  %v1842_v50 = vpop.f32.mrb[22].mxu1 }
 0x723   :  { %v965_v38 = vadd.f32 %v1842_v50, %v2301_v37  ;;  %v956_v39 = vpop.f32.mrb[23].mxu1  ;;  %v970_v42 = vsel %vm54_vm0, %v962_v46, -inf }
 0x724   :  { %v957_v41 = vadd.f32 %v956_v39, %v2307_v40  ;;  %v968_v43 = vsel %vm54_vm0, %v954_v32, -inf }
 0x725   :  { %v971_v18 = vsel %vm54_vm0, %v965_v38, -inf }
 0x726   :  { %v973_v44 = vmax.f32 %v970_v42, %v971_v18  ;;  %v969_v27 = vsel %vm54_vm0, %v957_v41, -inf }
 0x727   :  { %v972_v1 = vmax.f32 %v968_v43, %v969_v27  ;;  %v1948_v27 = vld [vmem:[%s2698_s8 + $0x8] sm:$0xff]  }
 0x729   :  { %v974_v30 = vmax.f32 %v972_v1, %v973_v44  ;;  %v1947_v44 = vld [vmem:[%s2698_s8] sm:$0xff]  }
 0x72a   :  { %1851 = vmatprep.subr.bf16.mxu0 %v1947_v44 }
 0x72b   :  { %v975_v45 = vrot.slane %v974_v30, 4 }
 0x72d   :  { %v976_v34 = vmax.f32 %v974_v30, %v975_v45 }
 0x72f   :  { %v977_v31 = vrot.slane %v976_v34, 2 }
 0x731   :  { %v978_v12 = vmax.f32 %v976_v34, %v977_v31  ;;  %v1913_v34 = vpop.permute.xlu0 %1912 }
 0x733   :  { %v979_v29 = vrot.slane %v978_v12, 1 }
 0x735   :  { %v980_v37 = vmax.f32 %v978_v12, %v979_v29  ;;  %v1918_v31 = vpop.permute.xlu0 %1917  ;;  %v1915_v29 = vunpack.i.h.bf16 %v1913_v34 }
 0x737   :  { %v981_v47 = vsub.f32 %v954_v32, %v980_v37  ;;  %v982_v51 = vsub.f32 %v957_v41, %v980_v37  ;;  %v983_v40 = vsub.f32 %v962_v46, %v980_v37  ;;  %v984_v53 = vsub.f32 %v965_v38, %v980_v37 }
 0x738   :  { %v1914_v37 = vunpack.i.l.bf16 %v1913_v34  ;;  %v2034_v34 = vld [vmem:[%s2692_s0 + $0x8] sm:$0xff] }
 0x739   :  { %v985_v59 = vmul.f32 1.442695, %v981_v47  ;;  %v987_v62 = vmul.f32 1.442695, %v982_v51  ;;  %v989_v0 = vmul.f32 1.442695, %v983_v40  ;;  %v1920_v51 = vunpack.i.h.bf16 %v1918_v31 }
 0x73a   :  { %v991_v2 = vmul.f32 1.442695, %v984_v53  ;;  %v1919_v40 = vunpack.i.l.bf16 %v1918_v31 }
 0x73b   :  { %1997 = vpow2.f32 %v985_v59 }
 0x73c   :  { %1999 = vpow2.f32 %v987_v62 }
 0x73d   :  { %2001 = vpow2.f32 %v989_v0 }
 0x73e   :  { %2003 = vpow2.f32 %v991_v2  ;;  %v1216_v2 = vsel %vm329_vm1, %v2391_v57, %v1915_v29 }
 0x745   :  { %v1998_v3 = vpop.eup %1997 }
 0x746   :  { %v2000_v4 = vpop.eup %1999  ;;  %v993_v33 = vsel %vm54_vm0, %v1998_v3, 0.0 }
 0x747   :  { %v2002_v5 = vpop.eup %2001  ;;  %v994_v6 = vsel %vm54_vm0, %v2000_v4, 0.0 }
 0x748   :  { %v2004_v7 = vpop.eup %2003  ;;  %v995_v13 = vadd.f32 %v994_v6, %v993_v33  ;;  %v996_v14 = vsel %vm54_vm0, %v2002_v5, 0.0  ;;  %v1218_v33 = vsel %vm329_vm1, %v2389_v56, %v1920_v51 }
 0x749   :  { %v998_v36 = vsel %vm54_vm0, %v2004_v7, 0.0 }
 0x74a   :  { %v997_v15 = vadd.f32 %v996_v14, %v995_v13 }
 0x74c   :  { %v999_v20 = vadd.f32 %v998_v36, %v997_v15 }
 0x74e   :  { %v1000_v58 = vrot.slane %v999_v20, 4 }
 0x750   :  { %v1001_v61 = vadd.f32 %v1000_v58, %v999_v20 }
 0x752   :  { %v1002_v21 = vrot.slane %v1001_v61, 2 }
 0x754   :  { %v1003_v49 = vadd.f32 %v1002_v21, %v1001_v61 }
 0x756   :  { %v1004_v22 = vrot.slane %v1003_v49, 1 }
 0x758   :  { %v1005_v46 = vadd.f32 %v1004_v22, %v1003_v49 }
 0x75a   :  { %2005 = vrcp.f32 %v1005_v46  ;;  %v2505_v46 = vld [vmem:[%s2695_s4] sm:$0xff] }
 0x764   :  { %v2006_v23 = vpop.eup %2005 }
 0x765   :  { %v2463_v32 = vmul.f32 %v2006_v23, %v1998_v3  ;;  %v2465_v50 = vmul.f32 %v2006_v23, %v2000_v4  ;;  %v2467_v38 = vmul.f32 %v2006_v23, %v2002_v5  ;;  %v2469_v39 = vmul.f32 %v2006_v23, %v2004_v7 }
 0x766   :  { %v1215_v3 = vsel %vm329_vm1, %v2387_v55, %v1914_v37  ;;  %v1217_v5 = vsel %vm329_vm1, %v2385_v54, %v1919_v40  ;;  %v1237_v54 = vsub.s32 4, %v2210_v48  ;;  %v2035_v37 = vld [vmem:[%s2692_s0 + $0x18] sm:$0xff] }
 0x767   :  { %v1011_v41 = vpack.c.bf16 %v2465_v50, %v2463_v32  ;;  %v1012_v42 = vpack.c.bf16 %v2469_v39, %v2467_v38 }
 0x768   :  { %v1238_v23 = vrot.slane %v2505_v46, %v1237_v54 }
 0x769   :  { %1013 = vxpose.xlu1.c.b16.start [1/2] (short) (narrow) %v1011_v41, 32 }
 0x76d   :  { %1014 = vxpose.xlu1.c.b16.end [2/2] (short) (narrow) %v1012_v42, 32 }
 0x771   :  { %1927 = vrot.lane.b32.xlu1 %v1926_v63, %s2050_s13 }
 0x788   :  { %v1923_v47 = vpop.permute.xlu0 %1922 }
 0x789   :  { %v1925_v62 = vunpack.i.h.bf16 %v1923_v47  ;;  %v1924_v0 = vunpack.i.l.bf16 %v1923_v47 }
 0x78b   :  { %v1220_v57 = vsel %vm1219_vm2, %v1215_v3, %v1924_v0  ;;  %v1221_v58 = vsel %vm1219_vm2, %v1216_v2, %v1925_v62 }
 0x7cf   :  { %v1021_v18 = vpop.trf.xlu1 }
 0x7d0   :  { %1847 = vmatprep.mubr.msk.bf16.mxu0 %vm54_vm0, %v1021_v18 }
 0x7d3   :  { %v1022_v43 = vpop.trf.xlu1 }
 0x7d4   :  { %1848 = vmatmul.mubr.msk.bf16.vlgmr.msra.gmra.mrb[12].mxu0 %vm54_vm0, %v1022_v43 }
 0x7d5   :  { %1852 = vmatpush3.bf16.msra.mxu0 %v1947_v44 }
 0x7d6   :  { %1853 = vmatprep.subr.bf16.mxu0 %v1948_v27 }
 0x7d9   :  { %1854 = vmatpush3.bf16.msra.mxu0 %v1948_v27 }
 0x7e3   :  { %v1928_v12 = vpop.permute.xlu1 %1927 }
 0x7e4   :  { %v1930_v53 = vunpack.i.h.bf16 %v1928_v12  ;;  %v1929_v59 = vunpack.i.l.bf16 %v1928_v12 }
 0x7e6   :  { %v1222_v14 = vsel %vm1219_vm2, %v1217_v5, %v1929_v59  ;;  %v1223_v15 = vsel %vm1219_vm2, %v1218_v33, %v1930_v53 }
 0x8a7   :  { %v1849_v60 = vpop.f32.mrb[12].mxu0 }
 0x8a8   :  { %v1075_v52 = vpop.f32.mrb[13].mxu0 }
 0x8a9   :  { %v1850_v63 = vpop.f32.mrb[14].mxu0 }
 0x8aa   :  { %v1936_v1 = vpack.i.bf16 %v1850_v63, %v1849_v60  ;;  %v1078_v30 = vpop.f32.mrb[15].mxu0  ;;  %v2032_v60 = vld [vmem:[%s2692_s0] sm:$0xff] }
 0x8ab   :  { %v1931_v45 = vpack.i.bf16 %v1078_v30, %v1075_v52 }
 0x8ac   :  { %1937 = vrot.lane.b32.xlu1 %v1936_v1, %s2051_s17  ;;  %v2033_v1 = vld [vmem:[%s2692_s0 + $0x10] sm:$0xff] }
 0x8ad   :  { %1932 = vrot.lane.b32.xlu0 %v1931_v45, %s2051_s17 }
 0x91e   :  { %v1938_v4 = vpop.permute.xlu1 %1937 }
 0x91f   :  { %v1940_v6 = vunpack.i.h.bf16 %v1938_v4  ;;  %v1939_v7 = vunpack.i.l.bf16 %v1938_v4  ;;  %v1933_v13 = vpop.permute.xlu0 %1932 }
 0x920   :  { %v1935_v36 = vunpack.i.h.bf16 %v1933_v13  ;;  %v1934_v20 = vunpack.i.l.bf16 %v1933_v13 }
 0x921   :  { %v1227_v55 = vsel %vm1224_vm3, %v1222_v14, %v1939_v7  ;;  %v1228_v61 = vsel %vm1224_vm3, %v1223_v15, %v1940_v6 }
 0x922   :  { %v1230_v21 = vpack.c.bf16 %v1228_v61, %v1227_v55  ;;  %v1225_v49 = vsel %vm1224_vm3, %v1220_v57, %v1934_v20  ;;  %v1226_v56 = vsel %vm1224_vm3, %v1221_v58, %v1935_v36 }
 0x923   :  { %v1229_v22 = vpack.c.bf16 %v1226_v56, %v1225_v49  ;;  %v1950_v49 = vld [vmem:[%s2699_s9 + $0x8] sm:$0xff]  }
 0x925   :  { %1855 = vmatprep.mubr.msk.bf16.mxu0 %vm54_vm0, %v1229_v22 }
 0x926   :  { %1856 = vmatmul.mubr.msk.bf16.vlgmr.msra.gmra.mrb[16].mxu0 %vm54_vm0, %v1230_v21  ;;  %v1949_v21 = vld [vmem:[%s2699_s9] sm:$0xff]  }
 0x927   :  { %1859 = vmatprep.subr.bf16.mxu1 %v1949_v21 }
 0x928   :  { %1860 = vmatpush3.bf16.msra.mxu1 %v1949_v21  ;;  %v1957_v21 = vld [vmem:[%s2700_s10 + $0x30] sm:$0xff]  }
 0x929   :  { %1861 = vmatprep.subr.bf16.mxu1 %v1950_v49 }
 0x92c   :  { %1862 = vmatpush3.bf16.msra.mxu1 %v1950_v49  ;;  %v1958_v49 = vld [vmem:[%s2700_s10 + $0x38] sm:$0xff]  }
 0x9f9   :  { %v1857_v41 = vpop.f32.mrb[16].mxu0 }
 0x9fa   :  { %v1291_v42 = vpop.f32.mrb[17].mxu0  ;;  %v1300_v18 = vadd.f32 %v1857_v41, %v1238_v23 }
 0x9fb   :  { %v1292_v43 = vadd.f32 %v1291_v42, %v1238_v23  ;;  %v1858_v44 = vpop.f32.mrb[18].mxu0 }
 0x9fc   :  { %v1294_v27 = vpop.f32.mrb[19].mxu0  ;;  %v2516_v30 = vadd.f32 %v2033_v1, %v1300_v18  ;;  %v1303_v45 = vadd.f32 %v1858_v44, %v1238_v23 }
 0x9fd   :  { %v2511_v52 = vadd.f32 %v2032_v60, %v1292_v43  ;;  %v1295_v63 = vadd.f32 %v1294_v27, %v1238_v23 }
 0x9fe   :  { %v2530_v47 = vadd.f32 %v2035_v37, %v1303_v45  ;;  %v1316_v51 = vsel %vm54_vm0, %v2516_v30, 0.0 }
 0x9ff   :  { %v2521_v31 = vadd.f32 %v2034_v34, %v1295_v63  ;;  %v1310_v12 = vsel %vm54_vm0, %v2511_v52, 0.0  ;;  %v1364_v63 = vsub.s32 2, %v2210_v48  ;;  %v1372_v34 = vsub.s32 3, %v2210_v48 }
 0xa00   :  { %1311 = vadd.xlane.f32.xlu0 %v1310_v12  ;;  %v1319_v40 = vsel %vm54_vm0, %v2530_v47, 0.0 }
 0xa01   :  { %v1313_v29 = vsel %vm54_vm0, %v2521_v31, 0.0  ;;  %v1365_v45 = vrot.slane %v2505_v46, %v1364_v63 }
 0xa02   :  { %1314 = vadd.xlane.f32.xlu1 %v1313_v29 }
 0xa04   :  { %1317 = vadd.xlane.f32.xlu0 %v1316_v51 }
 0xa08   :  { %1320 = vadd.xlane.f32.xlu0 %v1319_v40 }
 0xa8d   :  { %v1312_v53 = vpop.xlane.xlu0 %1311 }
 0xa8e   :  { %v1322_v59 = vmul.f32 0.03125, %v1312_v53  ;;  %v1373_v53 = vrot.slane %v2505_v46, %v1372_v34 }
 0xa8f   :  { %v1315_v62 = vpop.xlane.xlu1 %1314 }
 0xa90   :  { %v1326_v0 = vsub.f32 %v2511_v52, %v1322_v59  ;;  %v1323_v2 = vmul.f32 0.03125, %v1315_v62 }
 0xa91   :  { %v1318_v3 = vpop.xlane.xlu0 %1317 }
 0xa92   :  { %v1327_v4 = vsub.f32 %v2521_v31, %v1323_v2  ;;  %v1324_v33 = vmul.f32 0.03125, %v1318_v3  ;;  %v1330_v5 = vmul.f32 %v1326_v0, %v1326_v0 }
 0xa94   :  { %v1328_v6 = vsub.f32 %v2516_v30, %v1324_v33  ;;  %v1334_v7 = vsel %vm54_vm0, %v1330_v5, 0.0  ;;  %v1331_v13 = vmul.f32 %v1327_v4, %v1327_v4 }
 0xa95   :  { %1335 = vadd.xlane.f32.xlu0 %v1334_v7  ;;  %v1321_v14 = vpop.xlane.xlu0 %1320 }
 0xa96   :  { %v1325_v15 = vmul.f32 0.03125, %v1321_v14  ;;  %v1337_v36 = vsel %vm54_vm0, %v1331_v13, 0.0  ;;  %v1332_v20 = vmul.f32 %v1328_v6, %v1328_v6 }
 0xa97   :  { %1338 = vadd.xlane.f32.xlu1 %v1337_v36 }
 0xa98   :  { %v1329_v57 = vsub.f32 %v2530_v47, %v1325_v15  ;;  %v1340_v58 = vsel %vm54_vm0, %v1332_v20, 0.0 }
 0xa99   :  { %1341 = vadd.xlane.f32.xlu0 %v1340_v58  ;;  %v1954_v58 = vld [vmem:[%s2700_s10 + $0x18] sm:$0xff]  }
 0xa9a   :  { %v1333_v55 = vmul.f32 %v1329_v57, %v1329_v57 }
 0xa9c   :  { %v1343_v61 = vsel %vm54_vm0, %v1333_v55, 0.0  ;;  %v1955_v55 = vld [vmem:[%s2700_s10 + $0x20] sm:$0xff]  }
 0xa9d   :  { %1344 = vadd.xlane.f32.xlu1 %v1343_v61  ;;  %v1956_v61 = vld [vmem:[%s2700_s10 + $0x28] sm:$0xff]  }
 0xb22   :  { %v1336_v56 = vpop.xlane.xlu0 %1335 }
 0xb23   :  { %v1346_v22 = vmul.f32 0.03125, %v1336_v56  ;;  %v1724_v56 = vld [vmem:[%s2701_s6] ss:$0 sm:$0xff] }
 0xb24   :  { %v1339_v54 = vpop.xlane.xlu1 %1338 }
 0xb25   :  { %v1350_v23 = vadd.f32 1e-05, %v1346_v22  ;;  %v1347_v41 = vmul.f32 0.03125, %v1339_v54 }
 0xb26   :  { %v1342_v42 = vpop.xlane.xlu0 %1341 }
 0xb27   :  { %2007 = vrsqrt.f32 %v1350_v23  ;;  %v1351_v18 = vadd.f32 1e-05, %v1347_v41  ;;  %v1348_v43 = vmul.f32 0.03125, %v1342_v42 }
 0xb29   :  { %2009 = vrsqrt.f32 %v1351_v18  ;;  %v1352_v44 = vadd.f32 1e-05, %v1348_v43 }
 0xb2a   :  { %v1345_v27 = vpop.xlane.xlu1 %1344 }
 0xb2b   :  { %2011 = vrsqrt.f32 %v1352_v44  ;;  %v1349_v60 = vmul.f32 0.03125, %v1345_v27 }
 0xb2d   :  { %v1353_v1 = vadd.f32 1e-05, %v1349_v60 }
 0xb2f   :  { %2013 = vrsqrt.f32 %v1353_v1 }
 0xb31   :  { %v2008_v12 = vpop.eup %2007 }
 0xb32   :  { %v1358_v29 = vmul.f32 %v2008_v12, %v1326_v0 }
 0xb33   :  { %v2010_v37 = vpop.eup %2009 }
 0xb34   :  { %v1359_v51 = vmul.f32 %v2010_v37, %v1327_v4  ;;  %v1366_v40 = vmul.f32 %v1365_v45, %v1358_v29  ;;  %v1951_v4 = vld [vmem:[%s2700_s10] sm:$0xff]  }
 0xb35   :  { %v2012_v59 = vpop.eup %2011  ;;  %1867 = vmatprep.subr.bf16.mxu0 %v1951_v4 }
 0xb36   :  { %v1360_v62 = vmul.f32 %v2012_v59, %v1328_v6  ;;  %v1367_v2 = vmul.f32 %v1365_v45, %v1359_v51  ;;  %v1374_v3 = vadd.f32 %v1373_v53, %v1366_v40  ;;  %1868 = vmatpush3.bf16.msra.mxu0 %v1951_v4  ;;  %v1952_v6 = vld [vmem:[%s2700_s10 + $0x8] sm:$0xff]  }
 0xb37   :  { %1869 = vmatprep.subr.bf16.mxu0 %v1952_v6 }
 0xb38   :  { %v1375_v33 = vadd.f32 %v1373_v53, %v1367_v2  ;;  %v1368_v7 = vmul.f32 %v1365_v45, %v1360_v62 }
 0xb39   :  { %v2014_v5 = vpop.eup %2013 }
 0xb3a   :  { %v1361_v13 = vmul.f32 %v2014_v5, %v1329_v57  ;;  %v1378_v14 = vpack.c.bf16 %v1375_v33, %v1374_v3  ;;  %v1376_v36 = vadd.f32 %v1373_v53, %v1368_v7  ;;  %1870 = vmatpush3.bf16.msra.mxu0 %v1952_v6  ;;  %v1953_v57 = vld [vmem:[%s2700_s10 + $0x10] sm:$0xff]  }
 0xb3b   :  { %1871 = vmatprep.subr.bf16.mxu0 %v1953_v57 }
 0xb3c   :  { %v1369_v15 = vmul.f32 %v1365_v45, %v1361_v13  ;;  %1863 = vmatprep.mubr.msk.bf16.mxu1 %vm54_vm0, %v1378_v14 }
 0xb3e   :  { %v1377_v20 = vadd.f32 %v1373_v53, %v1369_v15  ;;  %1872 = vmatpush3.bf16.msra.mxu0 %v1953_v57 }
 0xb3f   :  { %1873 = vmatprep.subr.bf16.mxu0 %v1954_v58 }
 0xb40   :  { %v1379_v0 = vpack.c.bf16 %v1377_v20, %v1376_v36 }
 0xb42   :  { %1864 = vmatmul.mubr.msk.bf16.vlgmr.msra.gmra.mrb[24].mxu1 %vm54_vm0, %v1379_v0  ;;  %1874 = vmatpush3.bf16.msra.mxu0 %v1954_v58 }
 0xb43   :  { %1875 = vmatprep.subr.bf16.mxu0 %v1955_v55 }
 0xb46   :  { %1876 = vmatpush3.bf16.msra.mxu0 %v1955_v55 }
 0xb47   :  { %1877 = vmatprep.subr.bf16.mxu0 %v1956_v61 }
 0xb4a   :  { %1878 = vmatpush3.bf16.msra.mxu0 %v1956_v61 }
 0xb4b   :  { %1879 = vmatprep.subr.bf16.mxu0 %v1957_v21 }
 0xb4e   :  { %1880 = vmatpush3.bf16.msra.mxu0 %v1957_v21 }
 0xb4f   :  { %1881 = vmatprep.subr.bf16.mxu0 %v1958_v49 }
 0xb52   :  { %1882 = vmatpush3.bf16.msra.mxu0 %v1958_v49 }
 0xc15   :  { %v1865_v22 = vpop.f32.mrb[24].mxu1 }
 0xc16   :  { %v1452_v54 = vadd.f32 %v1865_v22, %v1724_v56  ;;  %v1443_v23 = vpop.f32.mrb[25].mxu1 }
 0xc17   :  { %v1444_v41 = vadd.f32 %v1724_v56, %v1443_v23  ;;  %v1866_v42 = vpop.f32.mrb[26].mxu1 }
 0xc18   :  { %v1460_v18 = vmul.f32 %v1452_v54, %v1452_v54  ;;  %v1455_v43 = vadd.f32 %v1866_v42, %v1724_v56  ;;  %v1446_v44 = vpop.f32.mrb[27].mxu1 }
 0xc19   :  { %v1458_v27 = vmul.f32 %v1444_v41, %v1444_v41  ;;  %v1447_v60 = vadd.f32 %v1724_v56, %v1446_v44  ;;  %v1514_v44 = vsub.s32 5, %v2210_v48 }
 0xc1a   :  { %v1464_v63 = vmul.f32 %v1460_v18, %v1452_v54  ;;  %v1461_v1 = vmul.f32 %v1455_v43, %v1455_v43 }
 0xc1b   :  { %v1462_v45 = vmul.f32 %v1458_v27, %v1444_v41  ;;  %v1459_v34 = vmul.f32 %v1447_v60, %v1447_v60  ;;  %v1515_v27 = vrot.slane %v2505_v46, %v1514_v44 }
 0xc1c   :  { %v1468_v12 = vmul.f32 0.044715, %v1464_v63  ;;  %v1465_v29 = vmul.f32 %v1461_v1, %v1455_v43 }
 0xc1d   :  { %v1466_v37 = vmul.f32 0.044715, %v1462_v45  ;;  %v1463_v51 = vmul.f32 %v1459_v34, %v1447_v60 }
 0xc1e   :  { %v1472_v40 = vadd.f32 %v1468_v12, %v1452_v54  ;;  %v1469_v53 = vmul.f32 0.044715, %v1465_v29 }
 0xc1f   :  { %v1470_v59 = vadd.f32 %v1466_v37, %v1444_v41  ;;  %v1467_v62 = vmul.f32 0.044715, %v1463_v51 }
 0xc20   :  { %v1476_v2 = vmul.f32 0.7978846, %v1472_v40  ;;  %v1473_v3 = vadd.f32 %v1469_v53, %v1455_v43 }
 0xc21   :  { %v1474_v33 = vmul.f32 0.7978846, %v1470_v59  ;;  %v1471_v5 = vadd.f32 %v1467_v62, %v1447_v60 }
 0xc22   :  { %2015 = vtanh.f32 %v1476_v2  ;;  %v1477_v7 = vmul.f32 0.7978846, %v1473_v3 }
 0xc23   :  { %2017 = vtanh.f32 %v1474_v33  ;;  %v1475_v13 = vmul.f32 0.7978846, %v1471_v5 }
 0xc24   :  { %2019 = vtanh.f32 %v1477_v7 }
 0xc25   :  { %2021 = vtanh.f32 %v1475_v13 }
 0xc2c   :  { %v2016_v14 = vpop.eup %2015 }
 0xc2d   :  { %v2018_v15 = vpop.eup %2017  ;;  %v1484_v36 = vadd.f32 1.0, %v2016_v14 }
 0xc2e   :  { %v2020_v20 = vpop.eup %2019  ;;  %v1482_v0 = vadd.f32 1.0, %v2018_v15 }
 0xc2f   :  { %v2022_v4 = vpop.eup %2021  ;;  %v1488_v6 = vmul.f32 0.5, %v1484_v36  ;;  %v1485_v57 = vadd.f32 1.0, %v2020_v20 }
 0xc30   :  { %v1483_v58 = vadd.f32 1.0, %v2022_v4  ;;  %v1486_v55 = vmul.f32 0.5, %v1482_v0 }
 0xc31   :  { %v1489_v61 = vmul.f32 0.5, %v1485_v57  ;;  %v1492_v49 = vmul.f32 %v1488_v6, %v1452_v54 }
 0xc32   :  { %v1487_v21 = vmul.f32 0.5, %v1483_v58  ;;  %v1490_v22 = vmul.f32 %v1486_v55, %v1444_v41 }
 0xc33   :  { %v1493_v56 = vmul.f32 %v1489_v61, %v1455_v43 }
 0xc34   :  { %v1491_v23 = vmul.f32 %v1487_v21, %v1447_v60 }
 0xc35   :  { %v1495_v42 = vpack.c.bf16 %v1493_v56, %v1492_v49 }
 0xc36   :  { %v1494_v18 = vpack.c.bf16 %v1491_v23, %v1490_v22 }
 0xc38   :  { %1883 = vmatprep.mubr.bf16.mxu0 %v1494_v18 }
 0xc39   :  { %1884 = vmatmul.mubr.bf16.vlgmr.msra.gmra.mrb[20].mxu0 %v1495_v42 }
 0xd0c   :  { %v1885_v63 = vpop.f32.mrb[20].mxu0 }
 0xd0d   :  { %v1598_v1 = vpop.f32.mrb[21].mxu0  ;;  %v1607_v45 = vadd.f32 %v1885_v63, %v1515_v27 }
 0xd0e   :  { %v1599_v34 = vadd.f32 %v1598_v1, %v1515_v27  ;;  %v1886_v12 = vpop.f32.mrb[22].mxu0 }
 0xd0f   :  { %v1610_v29 = vadd.f32 %v1886_v12, %v1515_v27  ;;  %v1601_v37 = vpop.f32.mrb[23].mxu0  ;;  %v1615_v60 = vadd.f32 %v1607_v45, %v2516_v30 }
 0xd10   :  { %v1602_v51 = vadd.f32 %v1601_v37, %v1515_v27  ;;  %v1613_v54 = vadd.f32 %v1599_v34, %v2511_v52 }
 0xd11   :  { %v1616_v41 = vadd.f32 %v1610_v29, %v2530_v47  ;;  %v1623_v59 = vsel %vm54_vm0, %v1615_v60, 0.0 }
 0xd12   :  { %v1617_v43 = vsel %vm54_vm0, %v1613_v54, 0.0  ;;  %v1614_v53 = vadd.f32 %v1602_v51, %v2521_v31  ;;  %v1671_v51 = vsub.s32 6, %v2210_v48 }
 0xd13   :  { %1618 = vadd.xlane.f32.xlu0 %v1617_v43  ;;  %v1626_v40 = vsel %vm54_vm0, %v1616_v41, 0.0 }
 0xd14   :  { %1627 = vadd.xlane.f32.xlu1 %v1626_v40  ;;  %v1620_v62 = vsel %vm54_vm0, %v1614_v53, 0.0  ;;  %v1679_v40 = vsub.s32 7, %v2210_v48 }
 0xd17   :  { %1624 = vadd.xlane.f32.xlu0 %v1623_v59 }
 0xd18   :  { %1621 = vadd.xlane.f32.xlu1 %v1620_v62  ;;  %v1672_v62 = vrot.slane %v2505_v46, %v1671_v51 }
 0xd29   :  { %1096 = vrot.lane.b32.xlu1 %v2348_v25, %s2039_s28 }
 0xd2d   :  { %1098 = vrot.lane.b32.xlu1 %v2350_v26, %s2039_s28  ;;  %1094 = vrot.lane.b32.xlu0 %v2346_v24, %s2039_s28 }
 0xd31   :  { %1100 = vrot.lane.b32.xlu1 %v2352_v28, %s2039_s28  ;;  %1110 = vrot.lane.b32.xlu0 %v2417_v8, %s2037_s23 }
 0xd35   :  { %1112 = vrot.lane.b32.xlu1 %v2419_v9, %s2037_s23  ;;  %1114 = vrot.lane.b32.xlu0 %v2421_v10, %s2037_s23 }
 0xd39   :  { %1116 = vrot.lane.b32.xlu1 %v2423_v11, %s2037_s23 }
 0xd3d   :  { %1128 = vrot.lane.b32.xlu1 %v2465_v50, %s2038_s25 }
 0xda0   :  { %v1619_v25 = vpop.xlane.xlu0 %1618 }
 0xda1   :  { %v1628_v24 = vpop.xlane.xlu1 %1627  ;;  %v1629_v52 = vmul.f32 0.03125, %v1619_v25 }
 0xda2   :  { %v1632_v26 = vmul.f32 0.03125, %v1628_v24  ;;  %v1680_v24 = vrot.slane %v2505_v46, %v1679_v40 }
 0xda3   :  { %v2615_v10 = vsub.f32 %v1613_v54, %v1629_v52 }
 0xda4   :  { %v2611_v28 = vsub.f32 %v1616_v41, %v1632_v26  ;;  %v1625_v30 = vpop.xlane.xlu0 %1624 }
 0xda5   :  { %v1631_v8 = vmul.f32 0.03125, %v1625_v30  ;;  %v1622_v31 = vpop.xlane.xlu1 %1621  ;;  %v1637_v14 = vmul.f32 %v2615_v10, %v2615_v10 }
 0xda6   :  { %v1630_v47 = vmul.f32 0.03125, %v1622_v31  ;;  %v1640_v9 = vmul.f32 %v2611_v28, %v2611_v28 }
 0xda7   :  { %v2617_v2 = vsub.f32 %v1615_v60, %v1631_v8  ;;  %v1641_v0 = vsel %vm54_vm0, %v1637_v14, 0.0 }
 0xda8   :  { %v2619_v11 = vsub.f32 %v1614_v53, %v1630_v47  ;;  %v1095_v50 = vpop.permute.xlu0 %1094  ;;  %v1650_v3 = vsel %vm54_vm0, %v1640_v9, 0.0 }
 0xda9   :  { %1651 = vadd.xlane.f32.xlu1 %v1650_v3  ;;  %v1097_v33 = vpop.permute.xlu1 %1096  ;;  %v1639_v5 = vmul.f32 %v2617_v2, %v2617_v2 }
 0xdaa   :  { %v1638_v7 = vmul.f32 %v2619_v11, %v2619_v11  ;;  %v1139_v56 = vsel %vm54_vm0, %v2334_v17, %v1097_v33 }
 0xdab   :  { %v1647_v13 = vsel %vm54_vm0, %v1639_v5, 0.0 }
 0xdac   :  { %1648 = vadd.xlane.f32.xlu0 %v1647_v13  ;;  %v1111_v15 = vpop.permute.xlu0 %1110  ;;  %v1644_v36 = vsel %vm54_vm0, %v1638_v7, 0.0 }
 0xdad   :  { %1645 = vadd.xlane.f32.xlu1 %v1644_v36  ;;  %v1099_v20 = vpop.permute.xlu1 %1098 }
 0xdae   :  { %v1140_v4 = vsel %vm54_vm0, %v2336_v19, %v1099_v20  ;;  %v1719_v19 = vld [vmem:[%s2702_s2] ss:$0 sm:$0xff] }
 0xdb0   :  { %1642 = vadd.xlane.f32.xlu0 %v1641_v0  ;;  %v1115_v6 = vpop.permute.xlu0 %1114 }
 0xdb1   :  { %v1145_v57 = vsel %vm1142_vm4, %v1140_v4, %v1115_v6  ;;  %v1101_v58 = vpop.permute.xlu1 %1100 }
 0xdb2   :  { %v1141_v61 = vsel %vm54_vm0, %v2338_v35, %v1101_v58 }
 0xdb5   :  { %v1113_v55 = vpop.permute.xlu1 %1112 }
 0xdb6   :  { %v1144_v22 = vsel %vm1142_vm4, %v1139_v56, %v1113_v55 }
 0xdb9   :  { %v1117_v21 = vpop.permute.xlu1 %1116 }
 0xdba   :  { %v1146_v49 = vsel %vm1142_vm4, %v1141_v61, %v1117_v21 }
 0xdbd   :  { %v1129_v23 = vpop.permute.xlu1 %1128 }
 0xdbe   :  { %v1149_v42 = vsel %vm1147_vm5, %v1144_v22, %v1129_v23  ;;  %1132 = vrot.lane.b32.xlu1 %v2469_v39, %s2038_s25 }
 0xdbf   :  { %v1160_v35 = vmul.f32 %v1719_v19, %v1149_v42 }
 0xdc1   :  { %1164 = vst [vmem:[%s2703_s12 + $0x8] sm:$0xff] %v1160_v35 }
 0xdc6   :  { %1126 = vrot.lane.b32.xlu0 %v2463_v32, %s2038_s25 }
 0xdca   :  { %1130 = vrot.lane.b32.xlu0 %v2467_v38, %s2038_s25  ;;  %v1138_v38 = vsel %vm54_vm0, %v2332_v16, %v1095_v50 }
 0xdcb   :  { %v1143_v43 = vsel %vm1142_vm4, %v1138_v38, %v1111_v15 }
 0xe36   :  { %v1652_v17 = vpop.xlane.xlu1 %1651 }
 0xe37   :  { %v1656_v18 = vmul.f32 0.03125, %v1652_v17 }
 0xe39   :  { %v1660_v44 = vadd.f32 1e-05, %v1656_v18  ;;  %v1649_v27 = vpop.xlane.xlu0 %1648 }
 0xe3a   :  { %v1655_v63 = vmul.f32 0.03125, %v1649_v27  ;;  %v1646_v1 = vpop.xlane.xlu1 %1645 }
 0xe3b   :  { %2023 = vrsqrt.f32 %v1660_v44  ;;  %v1654_v45 = vmul.f32 0.03125, %v1646_v1 }
 0xe3c   :  { %v1659_v39 = vadd.f32 1e-05, %v1655_v63 }
 0xe3d   :  { %v1658_v34 = vadd.f32 1e-05, %v1654_v45  ;;  %v1643_v12 = vpop.xlane.xlu0 %1642 }
 0xe3e   :  { %2025 = vrsqrt.f32 %v1659_v39  ;;  %v1653_v29 = vmul.f32 0.03125, %v1643_v12  ;;  %v1133_v37 = vpop.permute.xlu1 %1132 }
 0xe3f   :  { %2027 = vrsqrt.f32 %v1658_v34  ;;  %v1151_v32 = vsel %vm1147_vm5, %v1146_v49, %v1133_v37 }
 0xe40   :  { %v1657_v54 = vadd.f32 1e-05, %v1653_v29  ;;  %v1162_v41 = vmul.f32 %v1719_v19, %v1151_v32 }
 0xe41   :  { %v1127_v60 = vpop.permute.xlu0 %1126 }
 0xe42   :  { %2029 = vrsqrt.f32 %v1657_v54  ;;  %1166 = vst [vmem:[%s2703_s12 + $0x18] sm:$0xff] %v1162_v41  ;;  %v1148_v53 = vsel %vm1147_vm5, %v1143_v43, %v1127_v60 }
 0xe43   :  { %v1159_v59 = vmul.f32 %v1719_v19, %v1148_v53 }
 0xe45   :  { %v2024_v16 = vpop.eup %2023  ;;  %1163 = vst [vmem:[%s2703_s12] sm:$0xff] %v1159_v59  ;;  %v1131_v25 = vpop.permute.xlu0 %1130 }
 0xe46   :  { %v1668_v48 = vmul.f32 %v2024_v16, %v2611_v28  ;;  %v1150_v26 = vsel %vm1147_vm5, %v1145_v57, %v1131_v25 }
 0xe47   :  { %v1161_v52 = vmul.f32 %v1719_v19, %v1150_v26 }
 0xe48   :  { %v2026_v30 = vpop.eup %2025  ;;  %v1676_v8 = vmul.f32 %v1672_v62, %v1668_v48 }
 0xe49   :  { %v2028_v31 = vpop.eup %2027  ;;  %v1667_v47 = vmul.f32 %v2026_v30, %v2617_v2  ;;  %1165 = vst [vmem:[%s2703_s12 + $0x10] sm:$0xff] %v1161_v52 }
 0xe4a   :  { %v1684_v9 = vadd.f32 %v1680_v24, %v1676_v8  ;;  %v1666_v50 = vmul.f32 %v2028_v31, %v2619_v11 }
 0xe4b   :  { %v1675_v3 = vmul.f32 %v1672_v62, %v1667_v47 }
 0xe4c   :  { %v2030_v33 = vpop.eup %2029  ;;  %1688 = vst.msk [vmem:[%s2704_s11 + $0x18] sm:$0xff] %vm54_vm0, %v1684_v9  ;;  %v1674_v46 = vmul.f32 %v1672_v62, %v1666_v50 }
 0xe4d   :  { %v1683_v28 = vadd.f32 %v1680_v24, %v1675_v3  ;;  %v1665_v5 = vmul.f32 %v2030_v33, %v2615_v10 }
 0xe4e   :  { %v1682_v7 = vadd.f32 %v1680_v24, %v1674_v46 }
 0xe4f   :  { %1687 = vst.msk [vmem:[%s2704_s11 + $0x10] sm:$0xff] %vm54_vm0, %v1683_v28  ;;  %v1673_v2 = vmul.f32 %v1672_v62, %v1665_v5 }
 0xe50   :  { %1686 = vst.msk [vmem:[%s2704_s11 + $0x8] sm:$0xff] %vm54_vm0, %v1682_v7 }
 0xe51   :  { %v1681_v11 = vadd.f32 %v1680_v24, %v1673_v2 }
 0xe53   :  { %1685 = vst.msk [vmem:[%s2704_s11] sm:$0xff] %vm54_vm0, %v1681_v11 }

</bundles_post_ra>
